<compile_context>
chip_gen: v5e
topology: v5e:2x2
jax: 0.10.0
libtpu: 0.0.40
codegen_flags: <defaults>
</compile_context>

<pallas_src>
import functools

import jax
import jax.numpy as jnp
from jax import lax
from jax.experimental import pallas as pl
from jax.experimental.pallas import tpu as pltpu


def _feature_map(x):
    # elu(x) + 1  ==  x + 1  (x > 0) ,  exp(x)  (x <= 0)
    return jnp.where(x > 0, x + 1.0, jnp.exp(x))


def _causal_linear_attn_kernel(q_ref, k_ref, v_ref, mask_ref, o_ref,
                               s_ref, z_ref, *,
                               num_heads, qk_dim, v_dim, eps, compute_dtype):
    """One (batch, seq-chunk) grid step; all heads processed in-kernel.

    q_ref, k_ref : (1, T, H*E)   raw queries / keys (feature map in-kernel)
    v_ref        : (1, T, H*M)   values
    mask_ref     : (1, T, 1)     key padding mask (1.0 = keep)
    o_ref        : (1, T, H*M)   output
    s_ref        : (H, E, M) f32 running sum_j k_j (x) v_j   (carried over chunks)
    z_ref        : (H, 1, E) f32 running sum_j k_j           (carried over chunks)
    """
    H, E, M = num_heads, qk_dim, v_dim
    cdt = compute_dtype
    highp = jnp.dtype(cdt) == jnp.dtype(jnp.float32)

    t = pl.program_id(1)

    @pl.when(t == 0)
    def _():
        s_ref[...] = jnp.zeros_like(s_ref)
        z_ref[...] = jnp.zeros_like(z_ref)

    qf = _feature_map(q_ref[0].astype(jnp.float32))              # (T, H*E)
    kf = _feature_map(k_ref[0].astype(jnp.float32))              # (T, H*E)
    kf = kf * mask_ref[0].astype(jnp.float32)                    # key padding
    vt = v_ref[0].astype(jnp.float32)                            # (T, H*M)

    T = qf.shape[0]
    causal = (lax.broadcasted_iota(jnp.int32, (T, T), 0) >=
              lax.broadcasted_iota(jnp.int32, (T, T), 1))

    outs = []
    for h in range(H):                                           # static unroll
        q_h = qf[:, h * E:(h + 1) * E]                           # (T, E) f32
        k_h = kf[:, h * E:(h + 1) * E]                           # (T, E) f32
        v_h = vt[:, h * M:(h + 1) * M]                           # (T, M) f32

        q_c = q_h.astype(cdt)
        k_c = k_h.astype(cdt)
        v_c = v_h.astype(cdt)

        # intra-chunk causal scores:  a[i, j] = q_i . k_j   (j <= i)
        a = lax.dot_general(q_c, k_c, (((1,), (1,)), ((), ())),
                            preferred_element_type=jnp.float32)  # (T, T)
        a = jnp.where(causal, a, 0.0)

        # numerator: previous-chunk state contribution + intra-chunk term
        s_c = s_ref[h].astype(cdt)                               # (E, M)
        num = jnp.dot(q_c, s_c, preferred_element_type=jnp.float32)
        num = num + jnp.dot(a.astype(cdt), v_c,
                            preferred_element_type=jnp.float32)  # (T, M)

        # denominator: q_l . cumsum(K)_l (inclusive)
        den = jnp.sum(q_h * z_ref[h], axis=-1, keepdims=True)    # (T, 1)
        den = den + jnp.sum(a, axis=-1, keepdims=True)
        inv = pl.reciprocal(den + eps, approx=not highp)

        outs.append(num * inv)                                   # (T, M) f32

        # carry state forward (f32 accumulators)
        s_ref[h] = s_ref[h] + lax.dot_general(
            k_c, v_c, (((0,), (0,)), ((), ())),
            preferred_element_type=jnp.float32)                  # (E, M)
        z_ref[h] = z_ref[h] + jnp.sum(k_h, axis=0, keepdims=True)

    out = outs[0] if H == 1 else jnp.concatenate(outs, axis=-1)  # (T, H*M)
    o_ref[0] = out.astype(o_ref.dtype)                           # lane-dense store


def causal_linear_attention(queries, keys, values, key_padding_mask=None,
                            eps=1e-6, chunk=256,
                            compute_dtype=jnp.bfloat16):
    """queries/keys: (N, L, H, E), values: (N, L, H, M) — same as the torch module.

    chunk: sequence tile length (256 for v6e/v7x, 128 is a good v5e choice).
    compute_dtype: MXU operand dtype (accumulation is always f32).
    """
    N, L, H, E = queries.shape
    assert keys.shape == (N, L, H, E)
    M = values.shape[-1]
    assert values.shape == (N, L, H, M)

    chunk = min(chunk, L)
    if L % chunk:
        cands = [c for c in range(chunk, 0, -1) if L % c == 0 and c % 8 == 0]
        chunk = cands[0] if cands else L

    if key_padding_mask is None:
        mask = jnp.ones((N, L, 1), dtype=queries.dtype)
    else:
        mask = key_padding_mask.astype(queries.dtype).reshape(N, L, 1)

    # Free (contiguous) reshapes — no HBM transposes.
    qf = queries.reshape(N, L, H * E)
    kf = keys.reshape(N, L, H * E)
    vf = values.reshape(N, L, H * M)

    kernel = functools.partial(
        _causal_linear_attn_kernel,
        num_heads=H, qk_dim=E, v_dim=M, eps=eps, compute_dtype=compute_dtype)

    out = pl.pallas_call(
        kernel,
        out_shape=jax.ShapeDtypeStruct((N, L, H * M), queries.dtype),
        grid_spec=pltpu.PrefetchScalarGridSpec(
            num_scalar_prefetch=0,
            grid=(N, L // chunk),
            in_specs=[
                pl.BlockSpec((1, chunk, H * E), lambda n, t: (n, t, 0)),
                pl.BlockSpec((1, chunk, H * E), lambda n, t: (n, t, 0)),
                pl.BlockSpec((1, chunk, H * M), lambda n, t: (n, t, 0)),
                pl.BlockSpec((1, chunk, 1), lambda n, t: (n, t, 0)),
            ],
            out_specs=pl.BlockSpec((1, chunk, H * M), lambda n, t: (n, t, 0)),
            scratch_shapes=[
                pltpu.VMEM((H, E, M), jnp.float32),   # running K^T V per head
                pltpu.VMEM((H, 1, E), jnp.float32),   # running sum(K) per head
            ]),
        compiler_params=pltpu.CompilerParams(
            dimension_semantics=("parallel", "arbitrary")),
    )(qf, kf, vf, mask)

    return out.reshape(N, L, H, M)


def _reference(q, k, v, key_padding_mask=None, eps=1e-6):
    """Pure-JAX port of the torch module (cumsum formulation), for checking."""
    Q = jnp.where(q > 0, q + 1.0, jnp.exp(q))
    K = jnp.where(k > 0, k + 1.0, jnp.exp(k))
    if key_padding_mask is not None:
        K = K * key_padding_mask.astype(q.dtype)[:, :, None, None]
    Kc = jnp.cumsum(K, axis=1)
    Z = 1.0 / (jnp.einsum('nlhi,nlhi->nlh', Q, Kc) + eps)
    kv = jnp.einsum('nlhe,nlhm->nlhem', K, v)
    kvc = jnp.cumsum(kv, axis=1)
    V = jnp.einsum('nlhe,nlhem->nlhm', Q, kvc)
    return V * Z[..., None]


if __name__ == "__main__":
    # small shapes consistent with the module: (batch, seq, heads, head_dim)
    N, L, H, E, M = 2, 512, 2, 64, 64
    key = jax.random.PRNGKey(0)
    kq, kk, kv = jax.random.split(key, 3)
    q = jax.random.normal(kq, (N, L, H, E), dtype=jnp.float32)
    k = jax.random.normal(kk, (N, L, H, E), dtype=jnp.float32)
    v = jax.random.normal(kv, (N, L, H, M), dtype=jnp.float32)

    # 1) strict check: f32 compute path, multiple carried chunks
    out_f32 = jax.block_until_ready(
        causal_linear_attention(q, k, v, chunk=128, compute_dtype=jnp.float32))
    ref = jax.block_until_ready(_reference(q, k, v))
    assert out_f32.shape == ref.shape and out_f32.dtype == ref.dtype
    assert jnp.allclose(out_f32, ref, rtol=1e-3, atol=1e-4), "f32 mismatch vs reference"

    # 2) key_padding_mask path (second batch element has 64 padded keys)
    lengths = jnp.array([L, L - 64])
    mask = (jnp.arange(L)[None, :] < lengths[:, None]).astype(jnp.float32)
    out_m = jax.block_until_ready(
        causal_linear_attention(q, k, v, key_padding_mask=mask,
                                chunk=128, compute_dtype=jnp.float32))
    ref_m = jax.block_until_ready(_reference(q, k, v, key_padding_mask=mask))
    assert jnp.allclose(out_m, ref_m, rtol=1e-3, atol=1e-4), "masked mismatch vs reference"

    # 3) fast path: bf16 MXU operands, f32 accumulation, chunk=256
    out_bf = jax.block_until_ready(
        causal_linear_attention(q, k, v, chunk=256, compute_dtype=jnp.bfloat16))
    assert out_bf.shape == ref.shape and out_bf.dtype == ref.dtype
    assert jnp.allclose(out_bf, ref, rtol=5e-2, atol=5e-2), "bf16 mismatch vs reference"

    print("KERNEL_OK")
</pallas_src>

<mosaic_0001>
module attributes {stable_mosaic.version = 11 : i64} {
  func.func @_causal_linear_attn_kernel(%arg0: i32, %arg1: i32, %arg2: memref<1x128x128xf32, #tpu.memory_space<vmem>>, %arg3: memref<1x128x128xf32, #tpu.memory_space<vmem>>, %arg4: memref<1x128x128xf32, #tpu.memory_space<vmem>>, %arg5: memref<1x128x1xf32, #tpu.memory_space<vmem>>, %arg6: memref<1x128x128xf32, #tpu.memory_space<vmem>>, %arg7: memref<2x64x64xf32, #tpu.memory_space<vmem>>, %arg8: memref<2x1x64xf32, #tpu.memory_space<vmem>>) attributes {dimension_semantics = [#tpu.dimension_semantics<parallel>, #tpu.dimension_semantics<arbitrary>], iteration_bounds = array<i64: 2, 4>, scalar_prefetch = 0 : i64, scratch_operands = 2 : i64, tpu.core_type = #tpu.core_type<tc>, window_params = [{transform_indices = @transform_0, window_bounds = array<i64: 1, 128, 128>}, {transform_indices = @transform_1, window_bounds = array<i64: 1, 128, 128>}, {transform_indices = @transform_2, window_bounds = array<i64: 1, 128, 128>}, {transform_indices = @transform_3, window_bounds = array<i64: 1, 128, 1>}, {transform_indices = @transform_4, window_bounds = array<i64: 1, 128, 128>}]} {
    %c0_i32 = arith.constant 0 : i32
    %0 = arith.cmpi eq, %arg1, %c0_i32 : i32
    %1 = arith.extui %0 : i1 to i32
    %c0_i32_0 = arith.constant 0 : i32
    %2 = arith.cmpi ne, %1, %c0_i32_0 : i32
    scf.if %2 {
      %cst_71 = arith.constant 0.000000e+00 : f32
      %112 = vector.broadcast %cst_71 : f32 to vector<2x64x64xf32>
      %c0_72 = arith.constant 0 : index
      %c0_73 = arith.constant 0 : index
      %c0_74 = arith.constant 0 : index
      %113 = vector.load %arg7[%c0_72, %c0_73, %c0_74] : memref<2x64x64xf32, #tpu.memory_space<vmem>>, vector<2x64x64xf32>
      tpu.vector_store %arg7[%c0_72, %c0_73, %c0_74], %112 {strides = array<i32>} : memref<2x64x64xf32, #tpu.memory_space<vmem>>, vector<2x64x64xf32>,
      %cst_75 = arith.constant 0.000000e+00 : f32
      %114 = vector.broadcast %cst_75 : f32 to vector<2x1x64xf32>
      %c0_76 = arith.constant 0 : index
      %c0_77 = arith.constant 0 : index
      %c0_78 = arith.constant 0 : index
      %115 = vector.load %arg8[%c0_76, %c0_77, %c0_78] : memref<2x1x64xf32, #tpu.memory_space<vmem>>, vector<2x1x64xf32>
      tpu.vector_store %arg8[%c0_76, %c0_77, %c0_78], %114 {strides = array<i32>} : memref<2x1x64xf32, #tpu.memory_space<vmem>>, vector<2x1x64xf32>,
    } else {
    }
    %c0 = arith.constant 0 : index
    %c0_1 = arith.constant 0 : index
    %c0_2 = arith.constant 0 : index
    %3 = vector.load %arg2[%c0, %c0_1, %c0_2] : memref<1x128x128xf32, #tpu.memory_space<vmem>>, vector<1x128x128xf32>
    %4 = vector.shape_cast %3 : vector<1x128x128xf32> to vector<128x128xf32>
    %cst = arith.constant 0.000000e+00 : f32
    %5 = vector.broadcast %cst : f32 to vector<128x128xf32>
    %6 = arith.cmpf ogt, %4, %5 : vector<128x128xf32>
    %cst_3 = arith.constant 1.000000e+00 : f32
    %7 = vector.broadcast %cst_3 : f32 to vector<128x128xf32>
    %8 = arith.addf %4, %7 : vector<128x128xf32>
    %9 = math.exp %4 : vector<128x128xf32>
    %10 = arith.select %6, %8, %9 : vector<128x128xi1>, vector<128x128xf32>
    %c0_4 = arith.constant 0 : index
    %c0_5 = arith.constant 0 : index
    %c0_6 = arith.constant 0 : index
    %11 = vector.load %arg3[%c0_4, %c0_5, %c0_6] : memref<1x128x128xf32, #tpu.memory_space<vmem>>, vector<1x128x128xf32>
    %12 = vector.shape_cast %11 : vector<1x128x128xf32> to vector<128x128xf32>
    %cst_7 = arith.constant 0.000000e+00 : f32
    %13 = vector.broadcast %cst_7 : f32 to vector<128x128xf32>
    %14 = arith.cmpf ogt, %12, %13 : vector<128x128xf32>
    %cst_8 = arith.constant 1.000000e+00 : f32
    %15 = vector.broadcast %cst_8 : f32 to vector<128x128xf32>
    %16 = arith.addf %12, %15 : vector<128x128xf32>
    %17 = math.exp %12 : vector<128x128xf32>
    %18 = arith.select %14, %16, %17 : vector<128x128xi1>, vector<128x128xf32>
    %c0_9 = arith.constant 0 : index
    %c0_10 = arith.constant 0 : index
    %c0_11 = arith.constant 0 : index
    %19 = vector.load %arg5[%c0_9, %c0_10, %c0_11] : memref<1x128x1xf32, #tpu.memory_space<vmem>>, vector<1x128x1xf32>
    %20 = vector.shape_cast %19 : vector<1x128x1xf32> to vector<128x1xf32>
    %21 = vector.broadcast %20 : vector<128x1xf32> to vector<128x128xf32>
    %22 = arith.mulf %18, %21 : vector<128x128xf32>
    %c0_12 = arith.constant 0 : index
    %c0_13 = arith.constant 0 : index
    %c0_14 = arith.constant 0 : index
    %23 = vector.load %arg4[%c0_12, %c0_13, %c0_14] : memref<1x128x128xf32, #tpu.memory_space<vmem>>, vector<1x128x128xf32>
    %24 = vector.shape_cast %23 : vector<1x128x128xf32> to vector<128x128xf32>
    %25 = tpu.iota {dimensions = array<i32: 0>} : vector<128x128xi32>
    %26 = tpu.iota {dimensions = array<i32: 1>} : vector<128x128xi32>
    %27 = arith.cmpi sge, %25, %26 : vector<128x128xi32>
    %28 = vector.extract_strided_slice %10 {offsets = [0, 0], sizes = [128, 64], strides = [1, 1]} : vector<128x128xf32> to vector<128x64xf32>
    %29 = vector.extract_strided_slice %22 {offsets = [0, 0], sizes = [128, 64], strides = [1, 1]} : vector<128x128xf32> to vector<128x64xf32>
    %30 = vector.extract_strided_slice %24 {offsets = [0, 0], sizes = [128, 64], strides = [1, 1]} : vector<128x128xf32> to vector<128x64xf32>
    %cst_15 = arith.constant dense<0.000000e+00> : vector<128x128xf32>
    %31 = tpu.matmul %28, %29, %cst_15 {dimension_numbers = #tpu.dot_dimension_numbers<[1], [1], [0], [0], [0, 0, 1, 0], [], []>} : vector<128x64xf32>, vector<128x64xf32>, vector<128x128xf32> -> vector<128x128xf32>
    %cst_16 = arith.constant 0.000000e+00 : f32
    %32 = vector.broadcast %cst_16 : f32 to vector<128x128xf32>
    %33 = arith.select %27, %31, %32 : vector<128x128xi1>, vector<128x128xf32>
    %c0_17 = arith.constant 0 : index
    %c0_18 = arith.constant 0 : index
    %c0_19 = arith.constant 0 : index
    %34 = vector.load %arg7[%c0_17, %c0_18, %c0_19] : memref<2x64x64xf32, #tpu.memory_space<vmem>>, vector<1x64x64xf32>
    %35 = vector.shape_cast %34 : vector<1x64x64xf32> to vector<64x64xf32>
    %cst_20 = arith.constant dense<0.000000e+00> : vector<128x64xf32>
    %36 = tpu.matmul %28, %35, %cst_20 {dimension_numbers = #tpu.dot_dimension_numbers<[1], [0], [0], [1], [0, 0, 1, 1], [], []>} : vector<128x64xf32>, vector<64x64xf32>, vector<128x64xf32> -> vector<128x64xf32>
    %cst_21 = arith.constant dense<0.000000e+00> : vector<128x64xf32>
    %37 = tpu.matmul %33, %30, %cst_21 {dimension_numbers = #tpu.dot_dimension_numbers<[1], [0], [0], [1], [0, 0, 1, 1], [], []>} : vector<128x128xf32>, vector<128x64xf32>, vector<128x64xf32> -> vector<128x64xf32>
    %38 = arith.addf %36, %37 : vector<128x64xf32>
    %c0_22 = arith.constant 0 : index
    %c0_23 = arith.constant 0 : index
    %c0_24 = arith.constant 0 : index
    %39 = vector.load %arg8[%c0_22, %c0_23, %c0_24] : memref<2x1x64xf32, #tpu.memory_space<vmem>>, vector<1x1x64xf32>
    %40 = vector.shape_cast %39 : vector<1x1x64xf32> to vector<1x64xf32>
    %41 = vector.broadcast %40 : vector<1x64xf32> to vector<128x64xf32>
    %42 = arith.mulf %28, %41 : vector<128x64xf32>
    %cst_25 = arith.constant dense<0.000000e+00> : vector<128xf32>
    %43 = vector.multi_reduction <add>, %42, %cst_25 [1] : vector<128x64xf32> to vector<128xf32>
    %44 = vector.shape_cast %43 : vector<128xf32> to vector<128x1xf32>
    %cst_26 = arith.constant dense<0.000000e+00> : vector<128xf32>
    %45 = vector.multi_reduction <add>, %33, %cst_26 [1] : vector<128x128xf32> to vector<128xf32>
    %46 = vector.shape_cast %45 : vector<128xf32> to vector<128x1xf32>
    %47 = arith.addf %44, %46 : vector<128x1xf32>
    %cst_27 = arith.constant 9.99999997E-7 : f32
    %48 = vector.broadcast %cst_27 : f32 to vector<128x1xf32>
    %49 = arith.addf %47, %48 : vector<128x1xf32>
    %50 = tpu.reciprocal %49 : vector<128x1xf32> -> vector<128x1xf32>
    %51 = vector.broadcast %50 : vector<128x1xf32> to vector<128x64xf32>
    %52 = arith.mulf %38, %51 : vector<128x64xf32>
    %c0_28 = arith.constant 0 : index
    %c0_29 = arith.constant 0 : index
    %c0_30 = arith.constant 0 : index
    %53 = vector.load %arg7[%c0_28, %c0_29, %c0_30] : memref<2x64x64xf32, #tpu.memory_space<vmem>>, vector<1x64x64xf32>
    %54 = vector.shape_cast %53 : vector<1x64x64xf32> to vector<64x64xf32>
    %cst_31 = arith.constant dense<0.000000e+00> : vector<64x64xf32>
    %55 = tpu.matmul %29, %30, %cst_31 {dimension_numbers = #tpu.dot_dimension_numbers<[0], [0], [1], [1], [0, 1, 1, 1], [], []>} : vector<128x64xf32>, vector<128x64xf32>, vector<64x64xf32> -> vector<64x64xf32>
    %56 = arith.addf %54, %55 : vector<64x64xf32>
    %c0_32 = arith.constant 0 : index
    %c0_33 = arith.constant 0 : index
    %c0_34 = arith.constant 0 : index
    %57 = vector.load %arg7[%c0_32, %c0_33, %c0_34] : memref<2x64x64xf32, #tpu.memory_space<vmem>>, vector<1x64x64xf32>
    %58 = vector.shape_cast %57 : vector<1x64x64xf32> to vector<64x64xf32>
    %59 = vector.shape_cast %56 : vector<64x64xf32> to vector<1x64x64xf32>
    tpu.vector_store %arg7[%c0_32, %c0_33, %c0_34], %59 {strides = array<i32>} : memref<2x64x64xf32, #tpu.memory_space<vmem>>, vector<1x64x64xf32>,
    %c0_35 = arith.constant 0 : index
    %c0_36 = arith.constant 0 : index
    %c0_37 = arith.constant 0 : index
    %60 = vector.load %arg8[%c0_35, %c0_36, %c0_37] : memref<2x1x64xf32, #tpu.memory_space<vmem>>, vector<1x1x64xf32>
    %61 = vector.shape_cast %60 : vector<1x1x64xf32> to vector<1x64xf32>
    %cst_38 = arith.constant dense<0.000000e+00> : vector<64xf32>
    %62 = vector.multi_reduction <add>, %29, %cst_38 [0] : vector<128x64xf32> to vector<64xf32>
    %63 = vector.shape_cast %62 : vector<64xf32> to vector<1x64xf32>
    %64 = arith.addf %61, %63 : vector<1x64xf32>
    %c0_39 = arith.constant 0 : index
    %c0_40 = arith.constant 0 : index
    %c0_41 = arith.constant 0 : index
    %65 = vector.load %arg8[%c0_39, %c0_40, %c0_41] : memref<2x1x64xf32, #tpu.memory_space<vmem>>, vector<1x1x64xf32>
    %66 = vector.shape_cast %65 : vector<1x1x64xf32> to vector<1x64xf32>
    %67 = vector.shape_cast %64 : vector<1x64xf32> to vector<1x1x64xf32>
    tpu.vector_store %arg8[%c0_39, %c0_40, %c0_41], %67 {strides = array<i32>} : memref<2x1x64xf32, #tpu.memory_space<vmem>>, vector<1x1x64xf32>,
    %68 = vector.extract_strided_slice %10 {offsets = [0, 64], sizes = [128, 64], strides = [1, 1]} : vector<128x128xf32> to vector<128x64xf32>
    %69 = vector.extract_strided_slice %22 {offsets = [0, 64], sizes = [128, 64], strides = [1, 1]} : vector<128x128xf32> to vector<128x64xf32>
    %70 = vector.extract_strided_slice %24 {offsets = [0, 64], sizes = [128, 64], strides = [1, 1]} : vector<128x128xf32> to vector<128x64xf32>
    %cst_42 = arith.constant dense<0.000000e+00> : vector<128x128xf32>
    %71 = tpu.matmul %68, %69, %cst_42 {dimension_numbers = #tpu.dot_dimension_numbers<[1], [1], [0], [0], [0, 0, 1, 0], [], []>} : vector<128x64xf32>, vector<128x64xf32>, vector<128x128xf32> -> vector<128x128xf32>
    %cst_43 = arith.constant 0.000000e+00 : f32
    %72 = vector.broadcast %cst_43 : f32 to vector<128x128xf32>
    %73 = arith.select %27, %71, %72 : vector<128x128xi1>, vector<128x128xf32>
    %c1 = arith.constant 1 : index
    %c0_44 = arith.constant 0 : index
    %c0_45 = arith.constant 0 : index
    %74 = vector.load %arg7[%c1, %c0_44, %c0_45] : memref<2x64x64xf32, #tpu.memory_space<vmem>>, vector<1x64x64xf32>
    %75 = vector.shape_cast %74 : vector<1x64x64xf32> to vector<64x64xf32>
    %cst_46 = arith.constant dense<0.000000e+00> : vector<128x64xf32>
    %76 = tpu.matmul %68, %75, %cst_46 {dimension_numbers = #tpu.dot_dimension_numbers<[1], [0], [0], [1], [0, 0, 1, 1], [], []>} : vector<128x64xf32>, vector<64x64xf32>, vector<128x64xf32> -> vector<128x64xf32>
    %cst_47 = arith.constant dense<0.000000e+00> : vector<128x64xf32>
    %77 = tpu.matmul %73, %70, %cst_47 {dimension_numbers = #tpu.dot_dimension_numbers<[1], [0], [0], [1], [0, 0, 1, 1], [], []>} : vector<128x128xf32>, vector<128x64xf32>, vector<128x64xf32> -> vector<128x64xf32>
    %78 = arith.addf %76, %77 : vector<128x64xf32>
    %c1_48 = arith.constant 1 : index
    %c0_49 = arith.constant 0 : index
    %c0_50 = arith.constant 0 : index
    %79 = vector.load %arg8[%c1_48, %c0_49, %c0_50] : memref<2x1x64xf32, #tpu.memory_space<vmem>>, vector<1x1x64xf32>
    %80 = vector.shape_cast %79 : vector<1x1x64xf32> to vector<1x64xf32>
    %81 = vector.broadcast %80 : vector<1x64xf32> to vector<128x64xf32>
    %82 = arith.mulf %68, %81 : vector<128x64xf32>
    %cst_51 = arith.constant dense<0.000000e+00> : vector<128xf32>
    %83 = vector.multi_reduction <add>, %82, %cst_51 [1] : vector<128x64xf32> to vector<128xf32>
    %84 = vector.shape_cast %83 : vector<128xf32> to vector<128x1xf32>
    %cst_52 = arith.constant dense<0.000000e+00> : vector<128xf32>
    %85 = vector.multi_reduction <add>, %73, %cst_52 [1] : vector<128x128xf32> to vector<128xf32>
    %86 = vector.shape_cast %85 : vector<128xf32> to vector<128x1xf32>
    %87 = arith.addf %84, %86 : vector<128x1xf32>
    %cst_53 = arith.constant 9.99999997E-7 : f32
    %88 = vector.broadcast %cst_53 : f32 to vector<128x1xf32>
    %89 = arith.addf %87, %88 : vector<128x1xf32>
    %90 = tpu.reciprocal %89 : vector<128x1xf32> -> vector<128x1xf32>
    %91 = vector.broadcast %90 : vector<128x1xf32> to vector<128x64xf32>
    %92 = arith.mulf %78, %91 : vector<128x64xf32>
    %c1_54 = arith.constant 1 : index
    %c0_55 = arith.constant 0 : index
    %c0_56 = arith.constant 0 : index
    %93 = vector.load %arg7[%c1_54, %c0_55, %c0_56] : memref<2x64x64xf32, #tpu.memory_space<vmem>>, vector<1x64x64xf32>
    %94 = vector.shape_cast %93 : vector<1x64x64xf32> to vector<64x64xf32>
    %cst_57 = arith.constant dense<0.000000e+00> : vector<64x64xf32>
    %95 = tpu.matmul %69, %70, %cst_57 {dimension_numbers = #tpu.dot_dimension_numbers<[0], [0], [1], [1], [0, 1, 1, 1], [], []>} : vector<128x64xf32>, vector<128x64xf32>, vector<64x64xf32> -> vector<64x64xf32>
    %96 = arith.addf %94, %95 : vector<64x64xf32>
    %c1_58 = arith.constant 1 : index
    %c0_59 = arith.constant 0 : index
    %c0_60 = arith.constant 0 : index
    %97 = vector.load %arg7[%c1_58, %c0_59, %c0_60] : memref<2x64x64xf32, #tpu.memory_space<vmem>>, vector<1x64x64xf32>
    %98 = vector.shape_cast %97 : vector<1x64x64xf32> to vector<64x64xf32>
    %99 = vector.shape_cast %96 : vector<64x64xf32> to vector<1x64x64xf32>
    tpu.vector_store %arg7[%c1_58, %c0_59, %c0_60], %99 {strides = array<i32>} : memref<2x64x64xf32, #tpu.memory_space<vmem>>, vector<1x64x64xf32>,
    %c1_61 = arith.constant 1 : index
    %c0_62 = arith.constant 0 : index
    %c0_63 = arith.constant 0 : index
    %100 = vector.load %arg8[%c1_61, %c0_62, %c0_63] : memref<2x1x64xf32, #tpu.memory_space<vmem>>, vector<1x1x64xf32>
    %101 = vector.shape_cast %100 : vector<1x1x64xf32> to vector<1x64xf32>
    %cst_64 = arith.constant dense<0.000000e+00> : vector<64xf32>
    %102 = vector.multi_reduction <add>, %69, %cst_64 [0] : vector<128x64xf32> to vector<64xf32>
    %103 = vector.shape_cast %102 : vector<64xf32> to vector<1x64xf32>
    %104 = arith.addf %101, %103 : vector<1x64xf32>
    %c1_65 = arith.constant 1 : index
    %c0_66 = arith.constant 0 : index
    %c0_67 = arith.constant 0 : index
    %105 = vector.load %arg8[%c1_65, %c0_66, %c0_67] : memref<2x1x64xf32, #tpu.memory_space<vmem>>, vector<1x1x64xf32>
    %106 = vector.shape_cast %105 : vector<1x1x64xf32> to vector<1x64xf32>
    %107 = vector.shape_cast %104 : vector<1x64xf32> to vector<1x1x64xf32>
    tpu.vector_store %arg8[%c1_65, %c0_66, %c0_67], %107 {strides = array<i32>} : memref<2x1x64xf32, #tpu.memory_space<vmem>>, vector<1x1x64xf32>,
    %108 = tpu.concatenate %52, %92 in 1 : vector<128x64xf32>, vector<128x64xf32> -> vector<128x128xf32>
    %c0_68 = arith.constant 0 : index
    %c0_69 = arith.constant 0 : index
    %c0_70 = arith.constant 0 : index
    %109 = vector.load %arg6[%c0_68, %c0_69, %c0_70] : memref<1x128x128xf32, #tpu.memory_space<vmem>>, vector<1x128x128xf32>
    %110 = vector.shape_cast %109 : vector<1x128x128xf32> to vector<128x128xf32>
    %111 = vector.shape_cast %108 : vector<128x128xf32> to vector<1x128x128xf32>
    tpu.vector_store %arg6[%c0_68, %c0_69, %c0_70], %111 {strides = array<i32>} : memref<1x128x128xf32, #tpu.memory_space<vmem>>, vector<1x128x128xf32>,
    return
  }
  func.func @transform_0(%arg0: i32, %arg1: i32) -> (i32, i32, i32) {
    %c0_i32 = arith.constant 0 : i32
    %c0_i32_0 = arith.constant 0 : i32
    return %arg0, %arg1, %c0_i32 : i32, i32, i32
  }
  func.func @transform_1(%arg0: i32, %arg1: i32) -> (i32, i32, i32) {
    %c0_i32 = arith.constant 0 : i32
    %c0_i32_0 = arith.constant 0 : i32
    return %arg0, %arg1, %c0_i32 : i32, i32, i32
  }
  func.func @transform_2(%arg0: i32, %arg1: i32) -> (i32, i32, i32) {
    %c0_i32 = arith.constant 0 : i32
    %c0_i32_0 = arith.constant 0 : i32
    return %arg0, %arg1, %c0_i32 : i32, i32, i32
  }
  func.func @transform_3(%arg0: i32, %arg1: i32) -> (i32, i32, i32) {
    %c0_i32 = arith.constant 0 : i32
    %c0_i32_0 = arith.constant 0 : i32
    return %arg0, %arg1, %c0_i32 : i32, i32, i32
  }
  func.func @transform_4(%arg0: i32, %arg1: i32) -> (i32, i32, i32) {
    %c0_i32 = arith.constant 0 : i32
    %c0_i32_0 = arith.constant 0 : i32
    return %arg0, %arg1, %c0_i32 : i32, i32, i32
  }
}

</mosaic_0001>

<bundles_post_ra>
// kernel: tpu_custom_call.1
= control target key start
LH: loop header
LB: loop body
LE: loop exit
PB: predicated region body
PF: predicated region fallthrough
CT: control target
= control target key end

     0   :  { %s5637_s0 = inlined_call_operand.vmem [shape: f32[2,512,128], index: 0, kind: input, shape index: {}]   ;;  %s5638_s1 = inlined_call_operand.hbm [shape: f32[2,512,128], index: 1, kind: input, shape index: {}]   ;;  %s5639_s2 = inlined_call_operand.hbm [shape: f32[2,512,128], index: 2, kind: input, shape index: {}]   ;;  %s5640_s3 = inlined_call_operand.vmem [shape: f32[2,512,1], index: 3, kind: input, shape index: {}]   ;;  %s5641_s4 = inlined_call_operand.hbm [shape: f32[2,512,128], index: 4, kind: output, shape index: {}]  }
   0x1   :  { %5707 = sst [smem:[#allocation78_spill]] %s5638_s1 }
   0x2   :  { %9 = vsyncpa [#allocation5], 0 }
   0x3   :  { %11 = vsyncpa [#allocation5 + $0x1], 0 }
   0x4   :  { %12 = vsyncpa [#allocation8], 0 }
   0x5   :  { %14 = vsyncpa [#allocation8 + $0x1], 0 }
   0x6   :  { %15 = vsyncpa [#allocation6], 0 }
   0x7   :  { %17 = vsyncpa [#allocation6 + $0x1], 0  ;;  %s3485_s15 = smov 0   ;;  %s3487_s16 = smov 0  }
   0x8   :  { %s3489_s17 = smov 0   ;;  %s3491_s18 = smov 0  }
   0x9   :  { %s3493_s19 = smov 0   ;;  %s3495_s20 = smov 0  }
   0xa   :  { %s3497_s21 = smov 0   ;;  %s3499_s22 = smov 0  }
   0xb LB: > { %5708 = sst [smem:[#allocation13_spill]] %s3442_s20  ;;  %s2821_s23 = sadd.s32 4294967295, %s3450_s22   ;;  %s3450_s22 = sphi %s3499_s22, %s23_s22   ;;  %s3446_s21 = sphi %s3497_s21, %s5943_s21   ;;  %s3442_s20 = sphi %s3495_s20, %s5942_s20   ;;  %s3438_s19 = sphi %s3493_s19, %s5941_s19   ;;  %s3434_s18 = sphi %s3491_s18, %s5940_s18   ;;  %s3430_s17 = sphi %s3489_s17, %s5946_s17   ;;  %s3426_s16 = sphi %s3487_s16, %s5945_s16   ;;  %s3422_s15 = sphi %s3485_s15, %s5944_s15  }
   0xc   : > { %5709 = sst [smem:[#allocation14_spill]] %s3446_s21  ;;  %s2822_s24 = sadd.s32 4294967294, %s3450_s22  }
   0xd   : > { %s32_s25 = sadd.s32 1, %s3442_s20  ;;  %s35_s26 = sadd.s32 1, %s3446_s21 }
   0xe   : > { %p33_p0 = scmp.ge.s32.totalorder %s32_s25, 4  ;;  %s72_s27 = sadd.s32 1, %s3430_s17 }
   0xf   : > { %p79_p1 = scmp.ne.s32.totalorder %s3430_s17, %s3426_s16  ;;  %p80_p2 = scmp.eq.s32.totalorder %s3450_s22, 0 }
  0x10   : > { %s5948_s25 = smov (%p33_p0, %s32_s25), 0  ;;  %s5950_s26 = smov (!%p33_p0, %s35_s26), %s3446_s21 }
  0x11   : > { %5710 = sst [smem:[#allocation15_spill]] %s5948_s25  ;;  %s68_s28 = ssub.s32 %s3442_s20, %s5948_s25 }
  0x12   : > { %p3538_p3 = por %p80_p2, %p79_p1  ;;  %p37_p4 = scmp.ge.s32.totalorder %s5950_s26, 2 }
  0x13   : > { %p85_p5 = scmp.ne.s32.totalorder %s3426_s16, %s3422_s15  ;;  %p86_p6 = scmp.eq.s32.totalorder %s2821_s23, 0 }
  0x14   : > { %p167_p7 = scmp.eq.s32.totalorder %s2821_s23, 7  ;;  %s5952_s26 = smov (%p37_p4, %s5950_s26), 0 }
  0x15   : > { %5712 = sst [smem:[#allocation16_spill]] %s5952_s26  ;;  %p3546_p8 = por %p86_p6, %p85_p5 }
  0x16   : > { %p3550_p9 = por %p167_p7, %p79_p1  ;;  %s67_s6 = ssub.s32 %s3446_s21, %s5952_s26 }
  0x17   : > { %p173_p10 = scmp.eq.s32.totalorder %s2822_s24, 7  ;;  %s69_s7 = sor.u32 %s68_s28, %s67_s6 }
  0x18   : > { %p70_p11 = scmp.eq.s32.totalorder %s69_s7, 0  ;;  %p3034_p13 = scmp.lt.s32.totalorder %s3450_s22, 8 }
  0x19   : > { %p3556_p12 = por %p173_p10, %p85_p5  ;;  %s3562_s9 = sand.u32 1, %s3430_s17  }
  0x1a   : > { %s3565_s10 = scalar_select %p70_p11, %s3430_s17, %s72_s27  }
  0x1b   : > { %s2825_s11 = sshll.u32 %s3562_s9, 7  ;;  %s2826_s12 = sshll.u32 %s3442_s20, 4 }
  0x1c   : > { %s2827_s13 = sshll.u32 %s3446_s21, 6  ;;  %s210_s14 = scalar_lea.vmem [#allocation4], %s2825_s11 }
  0x1d   : > { %s220_s23 = sshll.u32 %s210_s14, 4  ;;  %s215_s24 = sadd.s32 %s2827_s13, %s2826_s12  ;;  %s221_s23 = int_to_ptr.vmem [resolvable:$true] %s220_s23 }
  0x1e   : > { %s2828_s28 = sshll.u32 %s215_s24, 3  ;;  %p3572_p0 = pnand %p3034_p13, %p3538_p3 }
  0x1f   : > { %s5717_s1 = sld [smem:[#allocation78_spill]]  ;;  %s207_s21 = scalar_lea.sflag [#allocation5], %s3562_s9 }
  0x20   : > { %s3452_s20 = smov 128   ;;  %s3453_s14 = smov 8  }
  0x21   : > { %p2833_p1 = scmp.ge.s32.totalorder %s3450_s22, 1  ;;  %p265_p2 = scmp.lt.s32.totalorder %s3450_s22, 9 }
  0x22   : > { %s241_s13 = scalar_lea.hbm %s5639_s2, %s2828_s28  ;;  %s234_s26 = scalar_lea.vmem [#allocation7], %s2825_s11 }
  0x23   : > { %p266_p3 = pnand %p2833_p1, %p265_p2  ;;  %s242_s24 = sshll.u32 %s241_s13, 4  ;;  %s243_s24 = int_to_ptr.hbm [resolvable:$true] %s242_s24 }
  0x24   : > { %s244_s7 = sshll.u32 %s234_s26, 4  ;;  %s245_s7 = int_to_ptr.vmem [resolvable:$true] %s244_s7 }
  0x25   : > { %s217_s27 = scalar_lea.hbm %s5717_s1, %s2828_s28  ;;  %269 = sbr.rel (%p266_p3) target bundleno = 1160 (0x488), region = 36 }
  0x26   : > { %s218_s25 = sshll.u32 %s217_s27, 4  ;;  %s231_s27 = scalar_lea.sflag [#allocation8], %s3562_s9  ;;  %s219_s25 = int_to_ptr.hbm [resolvable:$true] %s218_s25 }
  0x27   : > { %3026 = dma.hbm_to_vmem [thread:$0]  (!%p3572_p0), %s219_s25, 2048, %s221_s23, %s207_s21, %s3452_s20, %s3452_s20, %s3453_s14  }
  0x28   : > { %3029 = dma.hbm_to_vmem [thread:$0]  (!%p3572_p0), %s243_s24, 2048, %s245_s7, %s231_s27, %s3452_s20, %s3452_s20, %s3453_s14  }
  0x2a   : > { %s3591_s1 = sand.u32 1, %s3426_s16  }
  0x2b   : > { %s2834_s21 = sshll.u32 %s3591_s1, 7  ;;  %s272_s25 = scalar_lea.sflag [#allocation5], %s3591_s1 }
  0x2c   : > { %s3595_s23 = scalar_lea.vmem [#allocation4], %s2834_s21 }
  0x2d   : > { %3409 = dma.done.wait (%p3546_p8), %s272_s25, 2048  }
  0x2e   : > { %3411 = vsyncadd (%p3546_p8), %s272_s25, 4294965248  ;;  %s282_s9 = scalar_lea.sflag [#allocation8], %s3591_s1  ;;  %s3602_s20 = scalar_lea.vmem [#allocation7], %s2834_s21 }
  0x2f   : > { %3413 = dma.done.wait (%p3546_p8), %s282_s9, 2048  }
  0x30   : > { %3415 = vsyncadd (%p3546_p8), %s282_s9, 4294965248  ;;  %s3609_s11 = sshll.u32 %s3434_s18, 4  ;;  %p335_p4 = scmp.lt.s32.totalorder %s3438_s19, 1 }
  0x31   : > { %p337_p5 = scmp.lt.s32.totalorder %s3609_s11, 63  ;;  %s3625_s25 = scalar_lea.vmem [#allocation9], %s2834_s21 }
  0x32   : > { %s336_s28 = scalar_select %p335_p4, %s3438_s19, 1 }
  0x33   : > { %s338_s6 = scalar_select %p337_p5, %s3609_s11, 63 }
  0x34   : > { %s2838_s14 = sshll.u32 %s336_s28, 6  ;;  %p2843_p6 = scmp.ne.s32.totalorder %s3434_s18, 0 }
  0x35   : > { %s340_s29 = sadd.s32 %s2838_s14, %s338_s6 }
  0x36   : > { %s2839_s12 = sshll.u32 %s340_s29, 3  ;;  %360 = sbr.rel (%p2843_p6) target bundleno = 78 (0x4e), region = 48 }
  0x37   : > { %s3618_s26 = scalar_lea.vmem %s5637_s0, %s2839_s12  ;;  %s3623_s27 = scalar_lea.vmem %s5640_s3, %s2839_s12 }
  0x3b   : > { %vm361_vm0 = vcmask 523264   ;;  %v3454_v0 = vmov 0.0   ;;  %vm378_vm1 = vcmask 516096  }
  0x3c   : > { %362 = vst.msk [vmem:[#allocation2] sm:$0xff] %vm361_vm0, %v3454_v0 }
  0x3d   : > { %363 = vst.msk [vmem:[#allocation2 + $0x8] sm:$0xff] %vm361_vm0, %v3454_v0 }
  0x3e   : > { %364 = vst.msk [vmem:[#allocation2 + $0x10] sm:$0xff] %vm361_vm0, %v3454_v0 }
  0x3f   : > { %365 = vst.msk [vmem:[#allocation2 + $0x18] sm:$0xff] %vm361_vm0, %v3454_v0 }
  0x40   : > { %366 = vst.msk [vmem:[#allocation2 + $0x20] sm:$0xff] %vm361_vm0, %v3454_v0 }
  0x41   : > { %367 = vst.msk [vmem:[#allocation2 + $0x28] sm:$0xff] %vm361_vm0, %v3454_v0 }
  0x42   : > { %368 = vst.msk [vmem:[#allocation2 + $0x30] sm:$0xff] %vm361_vm0, %v3454_v0 }
  0x43   : > { %369 = vst.msk [vmem:[#allocation2 + $0x38] sm:$0xff] %vm361_vm0, %v3454_v0 }
  0x44   : > { %370 = vst.msk [vmem:[#allocation2 + $0x40] sm:$0xff] %vm361_vm0, %v3454_v0 }
  0x45   : > { %371 = vst.msk [vmem:[#allocation2 + $0x48] sm:$0xff] %vm361_vm0, %v3454_v0 }
  0x46   : > { %372 = vst.msk [vmem:[#allocation2 + $0x50] sm:$0xff] %vm361_vm0, %v3454_v0 }
  0x47   : > { %373 = vst.msk [vmem:[#allocation2 + $0x58] sm:$0xff] %vm361_vm0, %v3454_v0 }
  0x48   : > { %374 = vst.msk [vmem:[#allocation2 + $0x60] sm:$0xff] %vm361_vm0, %v3454_v0 }
  0x49   : > { %375 = vst.msk [vmem:[#allocation2 + $0x68] sm:$0xff] %vm361_vm0, %v3454_v0 }
  0x4a   : > { %376 = vst.msk [vmem:[#allocation2 + $0x70] sm:$0xff] %vm361_vm0, %v3454_v0 }
  0x4b   : > { %377 = vst.msk [vmem:[#allocation2 + $0x78] sm:$0xff] %vm361_vm0, %v3454_v0 }
  0x4c   : > { %379 = vst.msk [vmem:[#allocation3] sm:$0x1] %vm378_vm1, %v3454_v0 }
  0x4d   : > { %380 = vst.msk [vmem:[#allocation3 + $0x1] sm:$0x1] %vm378_vm1, %v3454_v0 }
  0x4e PF: > { %v577_v1 = vld [vmem:[%s3623_s27 + $0x20] sm:$0xff]  ;;  %v575_v2 = vld [vmem:[%s3623_s27 + $0x10] sm:$0xff]  ;;  %v3455_v4 = vmov 0   ;;  %v588_v5 = vld [vmem:[%s3623_s27 + $0x78] sm:$0xff]  ;;  %vm5681_vm4 = vcmask 523264   ;;  %s3456_s18 = smov 64  }
  0x4f   : > { %v573_v3 = vld [vmem:[%s3623_s27] sm:$0xff]  ;;  %3109 = vset.pattern.permute.xlu2 %v3455_v4  ;;  %3108 = vset.pattern.permute.xlu1 %v3455_v4  ;;  %v576_v6 = vld [vmem:[%s3623_s27 + $0x18] sm:$0xff]  ;;  %v574_v7 = vld [vmem:[%s3623_s27 + $0x8] sm:$0xff]  ;;  %s2974_s21 = sshll.u32 %s3438_s19, 6  ;;  %s2652_s14 = scalar_lea.sflag [#allocation6], %s3591_s1 }
  0x50   : > { %3107 = vset.pattern.permute.xlu0 %v3455_v4  ;;  %611 = vperm.xlu2 %3109, %v577_v1   ;;  %v585_v8 = vld [vmem:[%s3623_s27 + $0x60] sm:$0xff]  ;;  %v586_v9 = vld [vmem:[%s3623_s27 + $0x68] sm:$0xff]  ;;  %v587_v10 = vld [vmem:[%s3623_s27 + $0x70] sm:$0xff] }
  0x51   : > { %601 = vperm.xlu1 %3108, %v575_v2   ;;  %591 = vperm.xlu0 %3107, %v573_v3   ;;  %v582_v11 = vld [vmem:[%s3623_s27 + $0x48] sm:$0xff]  ;;  %v583_v12 = vld [vmem:[%s3623_s27 + $0x50] sm:$0xff]  ;;  %v584_v13 = vld [vmem:[%s3623_s27 + $0x58] sm:$0xff] }
  0x52   : > { %v579_v14 = vld [vmem:[%s3623_s27 + $0x30] sm:$0xff]  ;;  %v580_v15 = vld [vmem:[%s3623_s27 + $0x38] sm:$0xff]  ;;  %v581_v16 = vld [vmem:[%s3623_s27 + $0x40] sm:$0xff] }
  0x53   : > { %v578_v17 = vld [vmem:[%s3623_s27 + $0x28] sm:$0xff]  ;;  %v384_v20 = vld [vmem:[%s3618_s26 + $0x18] sm:$0xff]  ;;  %v381_v21 = vld [vmem:[%s3618_s26] sm:$0xff] }
  0x54   : > { %v382_v18 = vld [vmem:[%s3618_s26 + $0x8] sm:$0xff]  ;;  %v429_v22 = vmul.f32 1.442695, %v381_v21  ;;  %v435_v23 = vmul.f32 1.442695, %v384_v20  ;;  %v413_v28 = vadd.f32 1.0, %v381_v21 }
  0x55   : > { %v431_v19 = vmul.f32 1.442695, %v382_v18  ;;  %v414_v24 = vadd.f32 1.0, %v382_v18  ;;  %vm398_vm2 = vcmp.gt.f32.partialorder %v382_v18, 0.0  ;;  %v3663_v26 = vld [vmem:[#allocation3] ss:$0 sm:$0xff] }
  0x56   : > { %v385_v29 = vld [vmem:[%s3618_s26 + $0x20] sm:$0xff]  ;;  %vm397_vm3 = vcmp.gt.f32.partialorder %v381_v21, 0.0  ;;  %v416_v34 = vadd.f32 1.0, %v384_v20  ;;  %vm400_vm5 = vcmp.gt.f32.partialorder %v384_v20, 0.0  ;;  %v383_v37 = vld [vmem:[%s3618_s26 + $0x10] sm:$0xff] }
  0x57   : > { %3152 = vpow2.f32 %v431_v19  ;;  %v437_v31 = vmul.f32 1.442695, %v385_v29  ;;  %v433_v38 = vmul.f32 1.442695, %v383_v37  ;;  %v417_v41 = vadd.f32 1.0, %v385_v29  ;;  %v492_v52 = vld [vmem:[%s3595_s23 + $0x78] sm:$0xff] }
  0x58   : > { %666 = vperm.xlu2 %3109, %v588_v5   ;;  %3154 = vpow2.f32 %v429_v22  ;;  %vm401_vm6 = vcmp.gt.f32.partialorder %v385_v29, 0.0  ;;  %v415_v47 = vadd.f32 1.0, %v383_v37  ;;  %vm399_vm7 = vcmp.gt.f32.partialorder %v383_v37, 0.0  ;;  %v490_v62 = vld [vmem:[%s3595_s23 + $0x68] sm:$0xff]  ;;  %v491_v63 = vld [vmem:[%s3595_s23 + $0x70] sm:$0xff]  ;;  %v3708_v4 = vld [vmem:[%s3595_s23 + $0x60] sm:$0xff] }
  0x59   : > { %606 = vperm.xlu1 %3108, %v576_v6   ;;  %596 = vperm.xlu0 %3107, %v574_v7   ;;  %3156 = vpow2.f32 %v435_v23  ;;  %v555_v55 = vmul.f32 1.442695, %v492_v52  ;;  %v524_v57 = vadd.f32 1.0, %v492_v52  ;;  %vm508_vm8 = vcmp.gt.f32.partialorder %v492_v52, 0.0  ;;  %v478_v5 = vld [vmem:[%s3595_s23 + $0x8] sm:$0xff]  ;;  %v477_v6 = vld [vmem:[%s3595_s23] sm:$0xff] }
  0x5a   : > { %3158 = vpow2.f32 %v437_v31  ;;  %v551_v2 = vmul.f32 1.442695, %v490_v62  ;;  %v553_v3 = vmul.f32 1.442695, %v491_v63  ;;  %v549_v7 = vmul.f32 1.442695, %v3708_v4 }
  0x5b   : > { %3160 = vpow2.f32 %v433_v38  ;;  %vm506_vm9 = vcmp.gt.f32.partialorder %v490_v62, 0.0  ;;  %vm507_vm10 = vcmp.gt.f32.partialorder %v491_v63, 0.0  ;;  %v3721_v20 = vld [vmem:[%s3595_s23 + $0x18] sm:$0xff]  ;;  %v3724_v23 = vld [vmem:[%s3595_s23 + $0x50] sm:$0xff]  ;;  %v510_v29 = vadd.f32 1.0, %v478_v5  ;;  %v3754_v52 = vld [vmem:[%s3595_s23 + $0x40] sm:$0xff] }
  0x5c   : > { %3162 = vpow2.f32 %v555_v55  ;;  %vm494_vm11 = vcmp.gt.f32.partialorder %v478_v5, 0.0  ;;  %v545_v37 = vmul.f32 1.442695, %v3724_v23  ;;  %vm505_vm12 = vcmp.gt.f32.partialorder %v3708_v4, 0.0 }
  0x5d   : > { %v3153_v25 = vpop.eup %3152  ;;  %3164 = vpow2.f32 %v551_v2  ;;  %vm493_vm13 = vcmp.gt.f32.partialorder %v477_v6, 0.0  ;;  %v541_v2 = vmul.f32 1.442695, %v3754_v52  ;;  %vm496_vm0 = vcmp.gt.f32.partialorder %v3721_v20, 0.0 }
  0x5e   : > { %v3665_v27 = vsel %vm398_vm2, %v414_v24, %v3153_v25  ;;  %v3155_v30 = vpop.eup %3154  ;;  %3166 = vpow2.f32 %v553_v3  ;;  %v3727_v25 = vld [vmem:[%s3595_s23 + $0x20] sm:$0xff]  ;;  %vm503_vm1 = vcmp.gt.f32.partialorder %v3724_v23, 0.0 }
  0x5f   : > { %v3668_v32 = vsel %vm397_vm3, %v413_v28, %v3155_v30  ;;  %v1057_v33 = vmul.f32 %v3663_v26, %v3665_v27  ;;  %v3157_v35 = vpop.eup %3156  ;;  %3168 = vpow2.f32 %v549_v7  ;;  %v531_v28 = vmul.f32 1.442695, %v3721_v20 }
  0x60   : > { %651 = vperm.xlu2 %3109, %v585_v8   ;;  %v1056_v36 = vmul.f32 %v3663_v26, %v3668_v32  ;;  %v3676_v40 = vsel %vm400_vm5, %v416_v34, %v3157_v35  ;;  %v3159_v42 = vpop.eup %3158  ;;  %v488_v8 = vld [vmem:[%s3595_s23 + $0x58] sm:$0xff]  ;;  %v3731_v34 = vld [vmem:[%s3595_s23 + $0x48] sm:$0xff]  ;;  %vm497_vm2 = vcmp.gt.f32.partialorder %v3727_v25, 0.0 }
  0x61   : > { %656 = vperm.xlu1 %3108, %v586_v9   ;;  %661 = vperm.xlu0 %3107, %v587_v10   ;;  %v1075_v39 = vsel %vm5681_vm4, %v1057_v33, 0.0  ;;  %v3679_v44 = vsel %vm401_vm6, %v417_v41, %v3159_v42  ;;  %v1059_v45 = vmul.f32 %v3663_v26, %v3676_v40  ;;  %v3161_v48 = vpop.eup %3160  ;;  %v527_v9 = vmul.f32 1.442695, %v478_v5 }
  0x62   : > { %v1072_v43 = vsel %vm5681_vm4, %v1056_v36, 0.0  ;;  %5718 = vst [vmem:[#allocation17_spill] sm:$0xff] %v3679_v44  ;;  %v1060_v46 = vmul.f32 %v3663_v26, %v3679_v44  ;;  %v3686_v50 = vsel %vm399_vm7, %v415_v47, %v3161_v48  ;;  %v3163_v58 = vpop.eup %3162  ;;  %v525_v10 = vmul.f32 1.442695, %v477_v6  ;;  %v3742_v47 = vld [vmem:[%s3595_s23 + $0x30] sm:$0xff] }
  0x63   : > { %v1081_v49 = vsel %vm5681_vm4, %v1059_v45, 0.0  ;;  %v1058_v51 = vmul.f32 %v3663_v26, %v3686_v50  ;;  %v572_v59 = vsel %vm508_vm8, %v524_v57, %v3163_v58  ;;  %3170 = vpow2.f32 %v527_v9 }
  0x64   : > { %v1084_v53 = vsel %vm5681_vm4, %v1060_v46, 0.0  ;;  %3172 = vpow2.f32 %v525_v10  ;;  %v521_v41 = vadd.f32 1.0, %v3708_v4  ;;  %v509_v42 = vadd.f32 1.0, %v477_v6 }
  0x65   : > { %v1078_v54 = vsel %vm5681_vm4, %v1058_v51, 0.0  ;;  %v533_v46 = vmul.f32 1.442695, %v3727_v25  ;;  %vm504_vm14 = vcmp.gt.f32.partialorder %v488_v8, 0.0  ;;  %v543_v48 = vmul.f32 1.442695, %v3731_v34 }
  0x66   : > { %v537_v57 = vmul.f32 1.442695, %v3742_v47  ;;  %v512_v9 = vadd.f32 1.0, %v3721_v20  ;;  %v519_v10 = vadd.f32 1.0, %v3724_v23  ;;  %vm502_vm3 = vcmp.gt.f32.partialorder %v3731_v34, 0.0 }
  0x67   : > { %v515_v20 = vadd.f32 1.0, %v3742_v47  ;;  %vm499_vm5 = vcmp.gt.f32.partialorder %v3742_v47, 0.0  ;;  %vm501_vm6 = vcmp.gt.f32.partialorder %v3754_v52, 0.0 }
  0x68   : > { %636 = vperm.xlu2 %3109, %v582_v11  }
  0x69   : > { %641 = vperm.xlu1 %3108, %v583_v12   ;;  %646 = vperm.xlu0 %3107, %v584_v13   ;;  %v3717_v13 = vld [vmem:[%s3595_s23 + $0x10] sm:$0xff] }
  0x6a   : > { %v529_v19 = vmul.f32 1.442695, %v3717_v13  ;;  %v511_v51 = vadd.f32 1.0, %v3717_v13  ;;  %vm495_vm15 = vcmp.gt.f32.partialorder %v3717_v13, 0.0 }
  0x70   : > { %621 = vperm.xlu2 %3109, %v579_v14   ;;  %v547_v14 = vmul.f32 1.442695, %v488_v8 }
  0x71   : > { %626 = vperm.xlu1 %3108, %v580_v15   ;;  %631 = vperm.xlu0 %3107, %v581_v16   ;;  %v3165_v15 = vpop.eup %3164  ;;  %v522_v16 = vadd.f32 1.0, %v490_v62 }
  0x72   : > { %v3167_v18 = vpop.eup %3166  ;;  %3174 = vpow2.f32 %v547_v14  ;;  %v513_v14 = vadd.f32 1.0, %v3727_v25 }
  0x73   : > { %v570_v21 = vsel %vm506_vm9, %v522_v16, %v3165_v15  ;;  %v3169_v24 = vpop.eup %3168  ;;  %3176 = vpow2.f32 %v529_v19 }
  0x74   : > { %v3171_v33 = vpop.eup %3170  ;;  %3178 = vpow2.f32 %v531_v28 }
  0x75   : > { %v3173_v38 = vpop.eup %3172  ;;  %3180 = vpow2.f32 %v545_v37 }
  0x76   : > { %v557_v55 = vsel %vm493_vm13, %v509_v42, %v3173_v38  ;;  %3182 = vpow2.f32 %v533_v46 }
  0x77   : > { %3184 = vpow2.f32 %v543_v48 }
  0x78   : > { %v3175_v45 = vpop.eup %3174  ;;  %3186 = vpow2.f32 %v537_v57 }
  0x79   : > { %616 = vperm.xlu0 %3107, %v578_v17   ;;  %v523_v17 = vadd.f32 1.0, %v491_v63  ;;  %v3766_v63 = vld [vmem:[%s3595_s23 + $0x38] sm:$0xff]  ;;  %3188 = vpow2.f32 %v541_v2 }
  0x7a   : > { %vm500_vm8 = vcmp.gt.f32.partialorder %v3766_v63, 0.0 }
  0x7b   : > { %v571_v22 = vsel %vm507_vm10, %v523_v17, %v3167_v18  ;;  %vm5671_vm10 = vcmask 516096  }
  0x99   : > { %1076 = vadd.xlane.f32.xlu2 %v1075_v39 }
  0x9b   : > { %1073 = vadd.xlane.f32.xlu1 %v1072_v43  ;;  %v520_v43 = vadd.f32 1.0, %v488_v8 }
  0x9d   : > { %v568_v58 = vsel %vm504_vm14, %v520_v43, %v3175_v45  ;;  %v516_v43 = vadd.f32 1.0, %v3766_v63  ;;  %v386_v45 = vld [vmem:[%s3618_s26 + $0x28] sm:$0xff] }
  0x9e   : > { %vm402_vm9 = vcmp.gt.f32.partialorder %v386_v45, 0.0 }
  0xa1   : > { %1082 = vadd.xlane.f32.xlu2 %v1081_v49  ;;  %v558_v49 = vsel %vm494_vm11, %v510_v29, %v3171_v33 }
  0xa3   : > { %1085 = vadd.xlane.f32.xlu1 %v1084_v53  ;;  %1079 = vadd.xlane.f32.xlu0 %v1078_v54  ;;  %v3177_v53 = vpop.eup %3176  ;;  %v569_v54 = vsel %vm505_vm12, %v521_v41, %v3169_v24 }
  0xa4   : > { %v3179_v7 = vpop.eup %3178  ;;  %v559_v8 = vsel %vm495_vm15, %v511_v51, %v3177_v53 }
  0xaa   : > { %v3693_v56 = vpop.permute.xlu2 %611 }
  0xb2   : > { %v667_v60 = vpop.permute.xlu2 %666 }
  0xb3   : > { %v3695_v61 = vmul.f32 %v667_v60, %v572_v59  ;;  %v3758_v59 = vld [vmem:[%s3595_s23 + $0x28] sm:$0xff]  ;;  %s2663_s23 = sadd.s32 %s2974_s21, %s3609_s11  ;;  %s2666_s11 = sshll.u32 %s3625_s25, 4  ;;  %s2667_s11 = int_to_ptr.vmem [resolvable:$true] %s2666_s11 }
  0xb4   : > { %v535_v6 = vmul.f32 1.442695, %v3758_v59  ;;  %v514_v41 = vadd.f32 1.0, %v3758_v59  ;;  %vm498_vm7 = vcmp.gt.f32.partialorder %v3758_v59, 0.0  ;;  %v3844_v59 = vld [vmem:[%s3602_s20 + $0x70] sm:$0xff]  ;;  %s2975_s9 = sshll.u32 %s2663_s23, 3 }
  0xb5   : > { %5719 = vst [vmem:[#allocation18_spill] sm:$0xff] %v3695_v61  ;;  %2844 = vmatpush.xpose.msk.msra.mxu0 %vm5681_vm4, %v3695_v61  ;;  %s2665_s19 = scalar_lea.hbm %s5641_s4, %s2975_s9 }
  0xb6   : > { %3190 = vpow2.f32 %v535_v6  ;;  %s2668_s6 = sshll.u32 %s2665_s19, 4  ;;  %s2669_s6 = int_to_ptr.hbm [resolvable:$true] %s2668_s6 }
  0xb7   : > { %s3362_s29 = sshra.s32 %s2669_s6, 4  ;;  %s3363_s29 = int_to_ptr.hbm [resolvable:$true] %s3362_s29 }
  0xb8   : > { %s3364_s12 = scalar_lea.hbm %s3363_s29, 128  ;;  %p3369_p11 = scmp.lt.s32.totalorder %s3363_s29, %s5641_s4 }
  0xb9   : > { %1616 = vrot.lane.b32.xlu2 %v3695_v61, %s3456_s18  ;;  %p3365_p7 = scmp.ne.s32.totalorder %s3363_s29, %s3364_s12 }
  0xba   : > { %v652_v39 = vpop.permute.xlu2 %651 }
  0xbb   : > { %v3769_v3 = vmul.f32 %v652_v39, %v569_v54  ;;  %v517_v39 = vadd.f32 1.0, %v3754_v52  ;;  %p3366_p8 = pnand %p3365_p7, %p3550_p9 }
  0xbd   : > { %5723 = vst [vmem:[#allocation22_spill] sm:$0xff] %v3769_v3  ;;  %p3367_p10 = pneg %p3366_p8 }
  0xc2   : > { %v637_v15 = vpop.permute.xlu2 %636 }
  0xc3   : > { %v3703_v0 = vpop.permute.xlu1 %601  ;;  %v3705_v1 = vpop.permute.xlu0 %591 }
  0xc4   : > { %v3772_v4 = vmul.f32 %v3705_v1, %v557_v55  ;;  %v539_v1 = vmul.f32 1.442695, %v3766_v63  ;;  %v3793_v17 = vmul.f32 %v3703_v0, %v559_v8 }
  0xc6   : > { %5724 = vst [vmem:[#allocation23_spill] sm:$0xff] %v3772_v4  ;;  %v1514_v18 = vsel %vm5681_vm4, %v3772_v4, 0.0  ;;  %3192 = vpow2.f32 %v539_v1 }
  0xc7   : > { %5726 = vst [vmem:[#allocation25_spill] sm:$0xff] %v3793_v17 }
  0xca   : > { %v622_v53 = vpop.permute.xlu2 %621 }
  0xcb   : > { %v3714_v11 = vpop.permute.xlu1 %606  ;;  %v597_v12 = vpop.permute.xlu0 %596 }
  0xcc   : > { %v3761_v60 = vmul.f32 %v597_v12, %v558_v49  ;;  %v3181_v12 = vpop.eup %3180 }
  0xcd   : > { %v3183_v16 = vpop.eup %3182  ;;  %v567_v29 = vsel %vm503_vm1, %v519_v10, %v3181_v12 }
  0xce   : > { %5722 = vst [vmem:[#allocation21_spill] sm:$0xff] %v3761_v60  ;;  %v1515_v13 = vsel %vm5681_vm4, %v3761_v60, 0.0  ;;  %v3185_v19 = vpop.eup %3184  ;;  %v561_v25 = vsel %vm497_vm2, %v513_v14, %v3183_v16  ;;  %v3876_v16 = vld [vmem:[%s3602_s20 + $0x58] sm:$0xff] }
  0xcf   : > { %v1516_v24 = vadd.f32 %v1515_v13, %v1514_v18  ;;  %v3187_v0 = vpop.eup %3186  ;;  %v3830_v48 = vmul.f32 %v3693_v56, %v561_v25  ;;  %v439_v56 = vmul.f32 1.442695, %v386_v45  ;;  %v3868_v13 = vld [vmem:[%s3602_s20 + $0x60] sm:$0xff] }
  0xd0   : > { %v563_v54 = vsel %vm499_vm5, %v515_v20, %v3187_v0  ;;  %v3892_v0 = vld [vmem:[%s3602_s20 + $0x48] sm:$0xff] }
  0xd1   : > { %5729 = vst [vmem:[#allocation28_spill] sm:$0xff] %v3830_v48  ;;  %v1521_v47 = vsel %vm5681_vm4, %v3830_v48, 0.0  ;;  %v3850_v52 = vmul.f32 %v622_v53, %v563_v54  ;;  %3194 = vpow2.f32 %v439_v56  ;;  %v3948_v56 = vld [vmem:[%s3602_s20 + $0x18] sm:$0xff] }
  0xd3   : > { %v657_v30 = vpop.permute.xlu1 %656  ;;  %v662_v31 = vpop.permute.xlu0 %661  ;;  %5731 = vst [vmem:[#allocation30_spill] sm:$0xff] %v3850_v52  ;;  %v1525_v14 = vsel %vm5681_vm4, %v3850_v52, 0.0 }
  0xd4   : > { %v3733_v35 = vmul.f32 %v657_v30, %v570_v21  ;;  %v3735_v36 = vmul.f32 %v662_v31, %v571_v22  ;;  %v518_v21 = vadd.f32 1.0, %v3731_v34  ;;  %v560_v22 = vsel %vm496_vm0, %v512_v9, %v3179_v7  ;;  %v3189_v34 = vpop.eup %3188  ;;  %v3857_v9 = vld [vmem:[%s3602_s20 + $0x68] sm:$0xff] }
  0xd5   : > { %v1517_v31 = vsel %vm5681_vm4, %v3793_v17, 0.0  ;;  %v3809_v33 = vmul.f32 %v3714_v11, %v560_v22  ;;  %v3191_v42 = vpop.eup %3190  ;;  %v3823_v11 = vld [vmem:[%s3602_s20 + $0x78] sm:$0xff]  ;;  %v565_v55 = vsel %vm501_vm6, %v517_v39, %v3189_v34  ;;  %v418_v22 = vadd.f32 1.0, %v386_v45 }
  0xd6   : > { %5720 = vst [vmem:[#allocation19_spill] sm:$0xff] %v3733_v35  ;;  %2845 = vmatpush.xpose.msk.msra.mxu0 %vm5681_vm4, %v3735_v36  ;;  %1614 = vrot.lane.b32.xlu0 %v3735_v36, %s3456_s18  ;;  %v566_v37 = vsel %vm502_vm3, %v518_v21, %v3185_v19  ;;  %v1518_v38 = vadd.f32 %v1517_v31, %v1516_v24  ;;  %v3193_v46 = vpop.eup %3192  ;;  %v3884_v19 = vld [vmem:[%s3602_s20 + $0x50] sm:$0xff]  ;;  %v1537_v45 = vsel %vm5681_vm4, %v3769_v3, 0.0  ;;  %v1539_v53 = vsel %vm5681_vm4, %v3733_v35, 0.0 }
  0xd7   : > { %5721 = vst [vmem:[#allocation20_spill] sm:$0xff] %v3735_v36  ;;  %1612 = vrot.lane.b32.xlu1 %v3733_v35, %s3456_s18  ;;  %1456 = vmatpush.msra.mxu3 %v3823_v11  ;;  %v3832_v49 = vmul.f32 %v637_v15, %v566_v37  ;;  %v1519_v51 = vsel %vm5681_vm4, %v3809_v33, 0.0  ;;  %v562_v57 = vsel %vm498_vm7, %v514_v41, %v3191_v42  ;;  %v3195_v24 = vpop.eup %3194  ;;  %v3911_v37 = vld [vmem:[%s3602_s20 + $0x38] sm:$0xff]  ;;  %v3922_v42 = vld [vmem:[%s3602_s20 + $0x30] sm:$0xff] }
  0xd8   : > { %5727 = vst [vmem:[#allocation26_spill] sm:$0xff] %v3809_v33  ;;  %922 = vmatpush.msra.mxu1 %v3823_v11  ;;  %v564_v2 = vsel %vm500_vm8, %v516_v43, %v3193_v46  ;;  %v3904_v20 = vsel %vm402_vm9, %v418_v22, %v3195_v24  ;;  %v1513_v24 = vld [vmem:[#allocation3] sm:$0x1] }
  0xd9   : > { %5730 = vst [vmem:[#allocation29_spill] sm:$0xff] %v3832_v49  ;;  %1457 = vmatpush.msra.mxu3 %v3844_v59  ;;  %v1531_v25 = vsel %vm5681_vm4, %v3832_v49, 0.0  ;;  %v1061_v41 = vmul.f32 %v3663_v26, %v3904_v20 }
  0xda   : > { %2846 = vmatpush.xpose.msk.msra.mxu0 %vm5681_vm4, %v3733_v35  ;;  %923 = vmatpush.msra.mxu1 %v3844_v59 }
  0xdb   : > { %v647_v62 = vpop.permute.xlu0 %646  ;;  %v642_v28 = vpop.permute.xlu1 %641  ;;  %1458 = vmatpush.msra.mxu3 %v3857_v9  ;;  %v1087_v54 = vsel %vm5681_vm4, %v1061_v41, 0.0 }
  0xdc   : > { %v3774_v5 = vmul.f32 %v647_v62, %v568_v58  ;;  %v3811_v23 = vmul.f32 %v642_v28, %v567_v29  ;;  %v1520_v58 = vadd.f32 %v1519_v51, %v1518_v38  ;;  %924 = vmatpush.msra.mxu1 %v3857_v9  ;;  %v3930_v51 = vld [vmem:[%s3602_s20 + $0x28] sm:$0xff] }
  0xdd   : > { %1459 = vmatpush.msra.mxu3 %v3868_v13 }
  0xde   : > { %5725 = vst [vmem:[#allocation24_spill] sm:$0xff] %v3774_v5  ;;  %2847 = vmatpush.xpose.msk.msra.mxu0 %vm5681_vm4, %v3769_v3  ;;  %1610 = vrot.lane.b32.xlu0 %v3769_v3, %s3456_s18  ;;  %v1522_v8 = vadd.f32 %v1521_v47, %v1520_v58  ;;  %v1533_v34 = vsel %vm5681_vm4, %v3811_v23, 0.0  ;;  %v1535_v39 = vsel %vm5681_vm4, %v3774_v5, 0.0  ;;  %v1541_v58 = vsel %vm5681_vm4, %v3735_v36, 0.0 }
  0xdf   : > { %1608 = vrot.lane.b32.xlu2 %v3774_v5, %s3456_s18  ;;  %5728 = vst [vmem:[#allocation27_spill] sm:$0xff] %v3811_v23  ;;  %925 = vmatpush.msra.mxu1 %v3868_v13 }
  0xe0   : > { %1460 = vmatpush.msra.mxu3 %v3876_v16 }
  0xe1   : > { %926 = vmatpush.msra.mxu1 %v3876_v16 }
  0xe2   : > { %2848 = vmatpush.xpose.msk.msra.mxu0 %vm5681_vm4, %v3774_v5  ;;  %1461 = vmatpush.msra.mxu3 %v3884_v19 }
  0xe3   : > { %v632_v30 = vpop.permute.xlu0 %631  ;;  %v627_v62 = vpop.permute.xlu1 %626  ;;  %927 = vmatpush.msra.mxu1 %v3884_v19 }
  0xe4   : > { %v3852_v6 = vmul.f32 %v632_v30, %v565_v55  ;;  %v3859_v10 = vmul.f32 %v627_v62, %v564_v2  ;;  %v3902_v30 = vld [vmem:[%s3602_s20 + $0x40] sm:$0xff]  ;;  %1462 = vmatpush.msra.mxu3 %v3892_v0  ;;  %v1543_v2 = vsel %vm5681_vm4, %v3695_v61, 0.0 }
  0xe5   : > { %928 = vmatpush.msra.mxu1 %v3892_v0  ;;  %v3941_v55 = vld [vmem:[%s3602_s20 + $0x20] sm:$0xff] }
  0xe6   : > { %2849 = vmatpush.xpose.msk.msra.mxu0 %vm5681_vm4, %v3811_v23  ;;  %1606 = vrot.lane.b32.xlu0 %v3811_v23, %s3456_s18  ;;  %5732 = vst [vmem:[#allocation31_spill] sm:$0xff] %v3852_v6  ;;  %v1527_v18 = vsel %vm5681_vm4, %v3859_v10, 0.0  ;;  %v1529_v28 = vsel %vm5681_vm4, %v3852_v6, 0.0 }
  0xe7   : > { %5734 = vst [vmem:[#allocation33_spill] sm:$0xff] %v3859_v10  ;;  %1463 = vmatpush.msra.mxu3 %v3902_v30  ;;  %929 = vmatpush.msra.mxu1 %v3902_v30 }
  0xe9   : > { %1464 = vmatpush.msra.mxu3 %v3911_v37  ;;  %930 = vmatpush.msra.mxu1 %v3911_v37 }
  0xea   : > { %2850 = vmatpush.xpose.msk.msra.mxu0 %vm5681_vm4, %v3832_v49 }
  0xeb   : > { %v617_v63 = vpop.permute.xlu0 %616  ;;  %1465 = vmatpush.msra.mxu3 %v3922_v42  ;;  %931 = vmatpush.msra.mxu1 %v3922_v42 }
  0xec   : > { %v3854_v7 = vmul.f32 %v617_v63, %v562_v57  ;;  %v3956_v63 = vld [vmem:[%s3602_s20 + $0x10] sm:$0xff] }
  0xed   : > { %1466 = vmatpush.msra.mxu3 %v3930_v51  ;;  %932 = vmatpush.msra.mxu1 %v3930_v51 }
  0xee   : > { %5733 = vst [vmem:[#allocation32_spill] sm:$0xff] %v3854_v7  ;;  %v1523_v12 = vsel %vm5681_vm4, %v3854_v7, 0.0  ;;  %2851 = vmatpush.xpose.msk.msra.mxu0 %vm5681_vm4, %v3852_v6  ;;  %1604 = vrot.lane.b32.xlu0 %v3832_v49, %s3456_s18 }
  0xef   : > { %v1524_v1 = vadd.f32 %v1523_v12, %v1522_v8  ;;  %1467 = vmatpush.msra.mxu3 %v3941_v55  ;;  %933 = vmatpush.msra.mxu1 %v3941_v55  ;;  %v3964_v8 = vld [vmem:[%s3602_s20 + $0x8] sm:$0xff] }
  0xf1   : > { %v1526_v15 = vadd.f32 %v1525_v14, %v1524_v1  ;;  %1468 = vmatpush.msra.mxu3 %v3948_v56  ;;  %934 = vmatpush.msra.mxu1 %v3948_v56  ;;  %v3971_v1 = vld [vmem:[%s3602_s20] sm:$0xff] }
  0xf2   : > { %2852 = vmatpush.xpose.msk.msra.mxu0 %vm5681_vm4, %v3859_v10 }
  0xf3   : > { %v1528_v21 = vadd.f32 %v1527_v18, %v1526_v15  ;;  %1469 = vmatpush.msra.mxu3 %v3956_v63  ;;  %935 = vmatpush.msra.mxu1 %v3956_v63 }
  0xf5   : > { %v1530_v29 = vadd.f32 %v1529_v28, %v1528_v21  ;;  %1470 = vmatpush.msra.mxu3 %v3964_v8  ;;  %936 = vmatpush.msra.mxu1 %v3964_v8 }
  0xf6   : > { %2853 = vmatpush.xpose.msk.msra.mxu0 %vm5681_vm4, %v3850_v52  ;;  %1602 = vrot.lane.b32.xlu0 %v3852_v6, %s3456_s18 }
  0xf7   : > { %v1532_v31 = vadd.f32 %v1531_v25, %v1530_v29  ;;  %1471 = vmatpush.msra.mxu3 %v3971_v1  ;;  %937 = vmatpush.msra.mxu1 %v3971_v1 }
  0xf9   : > { %v1534_v38 = vadd.f32 %v1533_v34, %v1532_v31  ;;  %v387_v34 = vld [vmem:[%s3618_s26 + $0x30] sm:$0xff] }
  0xfa   : > { %2854 = vmatpush.xpose.msk.msra.mxu0 %vm5681_vm4, %v3854_v7  ;;  %vm403_vm11 = vcmp.gt.f32.partialorder %v387_v34, 0.0 }
  0xfb   : > { %v1536_v43 = vadd.f32 %v1535_v39, %v1534_v38  ;;  %v388_v38 = vld [vmem:[%s3618_s26 + $0x38] sm:$0xff]  ;;  %v441_v39 = vmul.f32 1.442695, %v387_v34 }
  0xfc   : > { %v443_v41 = vmul.f32 1.442695, %v388_v38  ;;  %vm404_vm12 = vcmp.gt.f32.partialorder %v388_v38, 0.0 }
  0xfd   : > { %v1538_v46 = vadd.f32 %v1537_v45, %v1536_v43  ;;  %3196 = vpow2.f32 %v441_v39  ;;  %v390_v43 = vld [vmem:[%s3618_s26 + $0x48] sm:$0xff] }
  0xfe   : > { %2855 = vmatpush.xpose.msk.msra.mxu0 %vm5681_vm4, %v3830_v48  ;;  %1600 = vrot.lane.b32.xlu0 %v3859_v10, %s3456_s18  ;;  %3198 = vpow2.f32 %v443_v41  ;;  %vm406_vm13 = vcmp.gt.f32.partialorder %v390_v43, 0.0 }
  0xff   : > { %v1540_v57 = vadd.f32 %v1539_v53, %v1538_v46  ;;  %v419_v46 = vadd.f32 1.0, %v387_v34  ;;  %v447_v53 = vmul.f32 1.442695, %v390_v43 }
 0x101   : > { %1088 = vadd.xlane.f32.xlu1 %v1087_v54  ;;  %v1542_v62 = vadd.f32 %v1541_v58, %v1540_v57  ;;  %v420_v57 = vadd.f32 1.0, %v388_v38  ;;  %v389_v58 = vld [vmem:[%s3618_s26 + $0x40] sm:$0xff]  ;;  %3200 = vpow2.f32 %v447_v53 }
 0x102   : > { %2856 = vmatpush.xpose.msk.msra.mxu0 %vm5681_vm4, %v3809_v33  ;;  %v421_v38 = vadd.f32 1.0, %v389_v58  ;;  %vm405_vm14 = vcmp.gt.f32.partialorder %v389_v58, 0.0 }
 0x103   : > { %v1544_v47 = vadd.f32 %v1543_v2, %v1542_v62  ;;  %v3197_v54 = vpop.eup %3196 }
 0x104   : > { %v3199_v62 = vpop.eup %3198 }
 0x105   : > { %1424 = vxpose.xlu2.b32.start [1/16] (narrow) %v3772_v4, 64  ;;  %v1545_v12 = vrot.slane %v1544_v47, 4 }
 0x106   : > { %2857 = vmatpush.xpose.msk.msra.mxu0 %vm5681_vm4, %v3793_v17  ;;  %1598 = vrot.lane.b32.xlu0 %v3850_v52, %s3456_s18 }
 0x107   : > { %v1546_v14 = vadd.f32 %v1545_v12, %v1544_v47  ;;  %v4039_v47 = vsel %vm403_vm11, %v419_v46, %v3197_v54  ;;  %v445_v12 = vmul.f32 1.442695, %v389_v58  ;;  %v393_v54 = vld [vmem:[%s3618_s26 + $0x60] sm:$0xff] }
 0x108   : > { %v453_v58 = vmul.f32 1.442695, %v393_v54  ;;  %vm409_vm1 = vcmp.gt.f32.partialorder %v393_v54, 0.0 }
 0x109   : > { %v1547_v15 = vrot.slane %v1546_v14, 2  ;;  %3202 = vpow2.f32 %v445_v12 }
 0x10a   : > { %2858 = vmatpush.xpose.msk.msra.mxu0 %vm5681_vm4, %v3761_v60 }
 0x10b   : > { %v1548_v18 = vadd.f32 %v1547_v15, %v1546_v14  ;;  %v4041_v14 = vsel %vm404_vm12, %v420_v57, %v3199_v62  ;;  %v392_v15 = vld [vmem:[%s3618_s26 + $0x58] sm:$0xff] }
 0x10c   : > { %v3980_v21 = vpop.xlane.xlu2 %1076  ;;  %5739 = vst [vmem:[#allocation38_spill] sm:$0xff] %v4041_v14  ;;  %v424_v53 = vadd.f32 1.0, %v392_v15  ;;  %vm408_vm15 = vcmp.gt.f32.partialorder %v392_v15, 0.0 }
 0x10d   : > { %5735 = vst [vmem:[#allocation34_spill] sm:$0xff] %v3980_v21  ;;  %1425 = vxpose.xlu2.b32.cont [2/16] (narrow) %v3761_v60, 64  ;;  %v1549_v22 = vrot.slane %v1548_v18, 1 }
 0x10e   : > { %2859 = vmatpush.xpose.msk.msra.mxu0 %vm5681_vm4, %v3772_v4  ;;  %1594 = vrot.lane.b32.xlu0 %v3830_v48, %s3456_s18  ;;  %v4027_v45 = vpop.xlane.xlu1 %1073 }
 0x10f   : > { %v1550_v28 = vadd.f32 %v1549_v22, %v1548_v18  ;;  %5737 = vst [vmem:[#allocation36_spill] sm:$0xff] %v4027_v45  ;;  %v451_v22 = vmul.f32 1.442695, %v392_v15 }
 0x111   : > { %2860 = vmatmul.msk.f32.vlgmr.msra.gmra.mxu0 %vm5681_vm4, %v3668_v32  ;;  %v1551_v29 = vadd.f32 %v1550_v28, %v1513_v24  ;;  %v422_v24 = vadd.f32 1.0, %v390_v43  ;;  %v391_v28 = vld [vmem:[%s3618_s26 + $0x50] sm:$0xff]  ;;  %3204 = vpow2.f32 %v451_v22 }
 0x112   : > { %v423_v12 = vadd.f32 1.0, %v391_v28  ;;  %vm407_vm0 = vcmp.gt.f32.partialorder %v391_v28, 0.0 }
 0x113   : > { %1553 = vst.msk [vmem:[#allocation3] sm:$0x1] %vm5671_vm10, %v1551_v29  ;;  %v3201_v29 = vpop.eup %3200 }
 0x114   : > { %v3990_v25 = vpop.xlane.xlu2 %1082  ;;  %v4054_v34 = vsel %vm406_vm13, %v422_v24, %v3201_v29  ;;  %v3203_v39 = vpop.eup %3202 }
 0x115   : > { %5736 = vst [vmem:[#allocation35_spill] sm:$0xff] %v3990_v25  ;;  %1426 = vxpose.xlu2.b32.cont [3/16] (narrow) %v3793_v17, 64  ;;  %v4061_v43 = vsel %vm405_vm14, %v421_v38, %v3203_v39  ;;  %v425_v39 = vadd.f32 1.0, %v393_v54  ;;  %v4099_v54 = vld [vmem:[#allocation2 + $0x30] sm:$0xff]  ;;  %v1063_v25 = vmul.f32 %v3663_v26, %v4041_v14 }
 0x116   : > { %1592 = vrot.lane.b32.xlu0 %v3809_v33, %s3456_s18  ;;  %v4037_v2 = vpop.xlane.xlu0 %1079  ;;  %v4046_v18 = vpop.xlane.xlu1 %1085 }
 0x117   : > { %5738 = vst [vmem:[#allocation37_spill] sm:$0xff] %v4037_v2  ;;  %v3205_v57 = vpop.eup %3204  ;;  %v1093_v2 = vsel %vm5681_vm4, %v1063_v25, 0.0 }
 0x118   : > { %5740 = vst [vmem:[#allocation39_spill] sm:$0xff] %v4046_v18  ;;  %v4068_v62 = vsel %vm408_vm15, %v424_v53, %v3205_v57 }
 0x119   : > { %2861 = vmatmul.msk.f32.gmra.mxu0 %vm5681_vm4, %v3665_v27  ;;  %5741 = vst [vmem:[#allocation40_spill] sm:$0xff] %v4068_v62 }
 0x11a   : > { %1596 = vrot.lane.b32.xlu1 %v3854_v7, %s3456_s18 }
 0x11c   : > { %v1617_v31 = vpop.permute.xlu2 %1616 }
 0x11d   : > { %1427 = vxpose.xlu2.b32.cont [4/16] (narrow) %v3809_v33, 64  ;;  %2908 = vmatpush.xpose.msk.msrb.mxu3 %vm5681_vm4, %v1617_v31 }
 0x11e   : > { %1590 = vrot.lane.b32.xlu0 %v3793_v17, %s3456_s18  ;;  %2989 = vmatpush.lsf.msrb.mxu0 %v1617_v31  ;;  %v449_v31 = vmul.f32 1.442695, %v391_v28  ;;  %v3110_v28 = vpack.i.bf16 %v3844_v59, %v3823_v11  ;;  %v4092_v11 = vld [vmem:[#allocation2 + $0x38] sm:$0xff]  ;;  %v3115_v59 = vpack.i.bf16 %v3868_v13, %v3857_v9  ;;  %v4108_v9 = vld [vmem:[#allocation2 + $0x20] sm:$0xff] }
 0x11f   : > { %995 = vmatpush.msra.mxu2 %v4092_v11 }
 0x120   : > { %3206 = vpow2.f32 %v449_v31  ;;  %v394_v31 = vld [vmem:[%s3618_s26 + $0x68] sm:$0xff] }
 0x121   : > { %2862 = vmatmul.msk.f32.gmra.mxu0 %vm5681_vm4, %v3686_v50  ;;  %3208 = vpow2.f32 %v453_v58  ;;  %v455_v38 = vmul.f32 1.442695, %v394_v31  ;;  %vm410_vm2 = vcmp.gt.f32.partialorder %v394_v31, 0.0  ;;  %996 = vmatpush.msra.mxu2 %v4099_v54 }
 0x122   : > { %1586 = vrot.lane.b32.xlu1 %v3772_v4, %s3456_s18 }
 0x123   : > { %3210 = vpow2.f32 %v455_v38  ;;  %v4113_v38 = vld [vmem:[#allocation2 + $0x18] sm:$0xff] }
 0x125   : > { %1428 = vxpose.xlu2.b32.cont [5/16] (narrow) %v3830_v48, 64 }
 0x126   : > { %1588 = vrot.lane.b32.xlu0 %v3761_v60, %s3456_s18  ;;  %v3207_v22 = vpop.eup %3206 }
 0x127   : > { %v4075_v29 = vsel %vm407_vm0, %v423_v12, %v3207_v22  ;;  %v426_v12 = vadd.f32 1.0, %v394_v31 }
 0x128   : > { %5742 = vst [vmem:[#allocation41_spill] sm:$0xff] %v4075_v29  ;;  %v1066_v45 = vmul.f32 %v3663_v26, %v4075_v29 }
 0x129   : > { %2863 = vmatmul.msk.f32.gmra.mxu0 %vm5681_vm4, %v3676_v40 }
 0x12a   : > { %1556 = vrot.lane.b32.xlu1 %v3665_v27, %s3456_s18  ;;  %v1102_v25 = vsel %vm5681_vm4, %v1066_v45, 0.0 }
 0x12d   : > { %1429 = vxpose.xlu2.b32.cont [6/16] (narrow) %v3854_v7, 64 }
 0x12e   : > { %1554 = vrot.lane.b32.xlu0 %v3668_v32, %s3456_s18 }
 0x131   : > { %2864 = vmatmul.msk.f32.gmra.mxu0 %vm5681_vm4, %v3679_v44 }
 0x132   : > { %1560 = vrot.lane.b32.xlu1 %v3676_v40, %s3456_s18 }
 0x135   : > { %1430 = vxpose.xlu2.b32.cont [7/16] (narrow) %v3850_v52, 64 }
 0x136   : > { %1558 = vrot.lane.b32.xlu0 %v3686_v50, %s3456_s18 }
 0x139   : > { %2865 = vmatmul.msk.f32.gmra.mxu0 %vm5681_vm4, %v3904_v20  ;;  %v1609_v15 = vpop.permute.xlu2 %1608 }
 0x13a   : > { %1564 = vrot.lane.b32.xlu1 %v3904_v20, %s3456_s18 }
 0x13d   : > { %1431 = vxpose.xlu2.b32.cont [8/16] (narrow) %v3859_v10, 64 }
 0x13e   : > { %1562 = vrot.lane.b32.xlu0 %v3679_v44, %s3456_s18 }
 0x141   : > { %2866 = vmatmul.msk.f32.gmra.mxu0 %vm5681_vm4, %v4039_v47 }
 0x142   : > { %1568 = vrot.lane.b32.xlu1 %v4041_v14, %s3456_s18 }
 0x145   : > { %1432 = vxpose.xlu2.b32.cont [9/16] (narrow) %v3852_v6, 64 }
 0x146   : > { %1566 = vrot.lane.b32.xlu0 %v4039_v47, %s3456_s18 }
 0x148   : > { %v1615_v41 = vpop.permute.xlu0 %1614 }
 0x149   : > { %2909 = vmatpush.xpose.msk.msrb.mxu3 %vm5681_vm4, %v1615_v41  ;;  %2990 = vmatpush.lsf.msrb.mxu0 %v1615_v41  ;;  %v1613_v46 = vpop.permute.xlu1 %1612  ;;  %v395_v41 = vld [vmem:[%s3618_s26 + $0x70] sm:$0xff] }
 0x14a   : > { %1572 = vrot.lane.b32.xlu1 %v4054_v34, %s3456_s18  ;;  %2867 = vmatmul.msk.f32.gmra.mxu0 %vm5681_vm4, %v4041_v14  ;;  %v457_v57 = vmul.f32 1.442695, %v395_v41  ;;  %vm411_vm3 = vcmp.gt.f32.partialorder %v395_v41, 0.0 }
 0x14b   : > { %2991 = vmatpush.lsf.msrb.mxu0 %v1613_v46 }
 0x14c   : > { %3212 = vpow2.f32 %v457_v57  ;;  %v4131_v57 = vld [vmem:[#allocation2 + $0x8] sm:$0xff] }
 0x14d   : > { %1433 = vxpose.xlu2.b32.cont [10/16] (narrow) %v3832_v49, 64  ;;  %2910 = vmatpush.xpose.msk.msrb.mxu3 %vm5681_vm4, %v1613_v46  ;;  %v3209_v46 = vpop.eup %3208 }
 0x14e   : > { %1570 = vrot.lane.b32.xlu0 %v4061_v43, %s3456_s18  ;;  %v4089_v58 = vsel %vm409_vm1, %v425_v39, %v3209_v46  ;;  %v3211_v22 = vpop.eup %3210 }
 0x14f   : > { %v4110_v13 = vsel %vm410_vm2, %v426_v12, %v3211_v22  ;;  %v4135_v12 = vld [vmem:[#allocation2] sm:$0xff]  ;;  %v3130_v22 = vpack.i.bf16 %v3922_v42, %v3911_v37  ;;  %v3135_v37 = vpack.i.bf16 %v3941_v55, %v3930_v51  ;;  %v3140_v55 = vpack.i.bf16 %v3956_v63, %v3948_v56 }
 0x150   : > { %v1611_v24 = vpop.permute.xlu0 %1610  ;;  %5743 = vst [vmem:[#allocation42_spill] sm:$0xff] %v4110_v13  ;;  %v1069_v10 = vmul.f32 %v3663_v26, %v4110_v13 }
 0x151   : > { %2911 = vmatpush.xpose.msk.msrb.mxu3 %vm5681_vm4, %v1611_v24  ;;  %2992 = vmatpush.lsf.msrb.mxu0 %v1611_v24 }
 0x152   : > { %1576 = vrot.lane.b32.xlu1 %v4068_v62, %s3456_s18  ;;  %2868 = vmatmul.msk.f32.gmra.mxu0 %vm5681_vm4, %v4061_v43  ;;  %v3213_v31 = vpop.eup %3212 }
 0x153   : > { %2993 = vmatpush.lsf.msrb.mxu0 %v1609_v15 }
 0x155   : > { %1434 = vxpose.xlu2.b32.cont [11/16] (narrow) %v3811_v23, 64  ;;  %2912 = vmatpush.xpose.msk.msrb.mxu3 %vm5681_vm4, %v1609_v15  ;;  %v4102_v15 = vld [vmem:[#allocation2 + $0x28] sm:$0xff] }
 0x156   : > { %1574 = vrot.lane.b32.xlu0 %v4075_v29, %s3456_s18  ;;  %997 = vmatpush.msra.mxu2 %v4102_v15 }
 0x158   : > { %v1607_v53 = vpop.permute.xlu0 %1606  ;;  %998 = vmatpush.msra.mxu2 %v4108_v9 }
 0x159   : > { %2913 = vmatpush.xpose.msk.msrb.mxu3 %vm5681_vm4, %v1607_v53  ;;  %2994 = vmatpush.lsf.msrb.mxu0 %v1607_v53  ;;  %v4122_v53 = vld [vmem:[#allocation2 + $0x10] sm:$0xff] }
 0x15a   : > { %3111 = vrot.lane.b32.xlu1 %v3110_v28, %s3456_s18  ;;  %2869 = vmatmul.msk.f32.gmra.mxu0 %vm5681_vm4, %v4054_v34  ;;  %v427_v28 = vadd.f32 1.0, %v395_v41  ;;  %v3120_v41 = vpack.i.bf16 %v3884_v19, %v3876_v16  ;;  %v3125_v19 = vpack.i.bf16 %v3902_v30, %v3892_v0  ;;  %v3145_v30 = vpack.i.bf16 %v3971_v1, %v3964_v8 }
 0x15b   : > { %999 = vmatpush.msra.mxu2 %v4113_v38 }
 0x15c   : > { %v4119_v39 = vsel %vm411_vm3, %v427_v28, %v3213_v31 }
 0x15d   : > { %1435 = vxpose.xlu2.b32.cont [12/16] (narrow) %v3774_v5, 64  ;;  %5744 = vst [vmem:[#allocation43_spill] sm:$0xff] %v4119_v39  ;;  %1000 = vmatpush.msra.mxu2 %v4122_v53  ;;  %v1067_v5 = vmul.f32 %v3663_v26, %v4068_v62  ;;  %v1070_v23 = vmul.f32 %v3663_v26, %v4119_v39 }
 0x15e   : > { %1578 = vrot.lane.b32.xlu0 %v4089_v58, %s3456_s18 }
 0x15f   : > { %1001 = vmatpush.msra.mxu2 %v4131_v57 }
 0x160   : > { %v1605_v24 = vpop.permute.xlu0 %1604 }
 0x161   : > { %2914 = vmatpush.xpose.msk.msrb.mxu3 %vm5681_vm4, %v1605_v24  ;;  %2995 = vmatpush.lsf.msrb.mxu0 %v1605_v24 }
 0x162   : > { %3116 = vrot.lane.b32.xlu1 %v3115_v59, %s3456_s18  ;;  %2870 = vmatmul.msk.f32.gmra.mxu0 %vm5681_vm4, %v4075_v29  ;;  %v396_v59 = vld [vmem:[%s3618_s26 + $0x78] sm:$0xff]  ;;  %s3368_s26 = scalar_lea.hbm %s5641_s4, 1024 }
 0x163   : > { %v459_v24 = vmul.f32 1.442695, %v396_v59  ;;  %1002 = vmatpush.msra.mxu2 %v4135_v12  ;;  %v428_v42 = vadd.f32 1.0, %v396_v59  ;;  %vm412_vm5 = vcmp.gt.f32.partialorder %v396_v59, 0.0  ;;  %p3370_p13 = scmp.lt.s32.totalorder %s3368_s26, %s3364_s12 }
 0x164   : > { %2892 = vmatmul.msk.f32.vlgmr.msra.gmra.mxu2 %vm5681_vm4, %v3668_v32 }
 0x165   : > { %1436 = vxpose.xlu2.b32.cont [13/16] (narrow) %v3769_v3, 64  ;;  %3214 = vpow2.f32 %v459_v24  ;;  %p3371_p0 = por %p3370_p13, %p3369_p11 }
 0x166   : > { %1580 = vrot.lane.b32.xlu0 %v4110_v13, %s3456_s18 }
 0x167   : > { %p3372_p1 = pnand %p3371_p0, %p3367_p10 }
 0x168   : > { %v1603_v46 = vpop.permute.xlu0 %1602 }
 0x169   : > { %2915 = vmatpush.xpose.msk.msrb.mxu3 %vm5681_vm4, %v1603_v46  ;;  %2996 = vmatpush.lsf.msrb.mxu0 %v1603_v46 }
 0x16a   : > { %1582 = vrot.lane.b32.xlu1 %v4119_v39, %s3456_s18  ;;  %2871 = vmatmul.msk.f32.gmra.mxu0 %vm5681_vm4, %v4068_v62 }
 0x16b   : > { %v3215_v28 = vpop.eup %3214 }
 0x16c   : > { %2893 = vmatmul.msk.f32.gmra.mxu2 %vm5681_vm4, %v3665_v27  ;;  %v4161_v0 = vsel %vm412_vm5, %v428_v42, %v3215_v28 }
 0x16d   : > { %1437 = vxpose.xlu2.b32.cont [14/16] (narrow) %v3733_v35, 64  ;;  %5745 = vst [vmem:[#allocation44_spill] sm:$0xff] %v4161_v0 }
 0x16e   : > { %3121 = vrot.lane.b32.xlu0 %v3120_v41, %s3456_s18  ;;  %v701_v41 = vlaneseq }
 0x170   : > { %v1601_v16 = vpop.permute.xlu0 %1600  ;;  %v4180_v8 = vand.u32 127, %v701_v41 }
 0x171   : > { %2916 = vmatpush.xpose.msk.msrb.mxu3 %vm5681_vm4, %v1601_v16  ;;  %2997 = vmatpush.lsf.msrb.mxu0 %v1601_v16 }
 0x172   : > { %3131 = vrot.lane.b32.xlu1 %v3130_v22, %s3456_s18  ;;  %2872 = vmatmul.msk.f32.gmra.mxu0 %vm5681_vm4, %v4089_v58  ;;  %v4178_v22 = vshrl.u32 %v701_v41, 7 }
 0x174   : > { %2894 = vmatmul.msk.f32.gmra.mxu2 %vm5681_vm4, %v3686_v50  ;;  %v4175_v46 = vpop.xlane.xlu1 %1088  ;;  %5746 = vst [vmem:[#allocation45_spill] sm:$0xff] %v4178_v22  ;;  %vm5677_vm6 = vcmp.ge.s32.totalorder %v4178_v22, %v4180_v8  ;;  %v4196_v24 = vadd.s32 8, %v4178_v22  ;;  %v4211_v42 = vadd.s32 16, %v4178_v22 }
 0x175   : > { %1438 = vxpose.xlu2.b32.cont [15/16] (narrow) %v3735_v36, 64  ;;  %v1068_v36 = vmul.f32 %v3663_v26, %v4089_v58 }
 0x176   : > { %3126 = vrot.lane.b32.xlu0 %v3125_v19, %s3456_s18  ;;  %5747 = vst [vmem:[#allocation46_spill] sm:$0xff] %v4196_v24  ;;  %vm5678_vm7 = vcmp.ge.s32.totalorder %v4196_v24, %v4180_v8  ;;  %vm5690_vm8 = vcmp.ge.s32.totalorder %v4211_v42, %v4180_v8 }
 0x177   : > { %5748 = vst [vmem:[#allocation47_spill] sm:$0xff] %v4211_v42 }
 0x178   : > { %v1599_v31 = vpop.permute.xlu0 %1598 }
 0x179   : > { %2917 = vmatpush.xpose.msk.msrb.mxu3 %vm5681_vm4, %v1599_v31  ;;  %2998 = vmatpush.lsf.msrb.mxu0 %v1599_v31 }
 0x17a   : > { %3136 = vrot.lane.b32.xlu1 %v3135_v37, %s3456_s18  ;;  %2873 = vmatmul.msk.f32.gmra.mxu0 %vm5681_vm4, %v4110_v13 }
 0x17c   : > { %2895 = vmatmul.msk.f32.gmra.mxu2 %vm5681_vm4, %v3676_v40 }
 0x17d   : > { %1439 = vxpose.xlu2.b32.end [16/16] (narrow) %v3695_v61, 64  ;;  %v1065_v61 = vmul.f32 %v3663_v26, %v4054_v34 }
 0x17e   : > { %1584 = vrot.lane.b32.xlu0 %v4161_v0, %s3456_s18 }
 0x180   : > { %v1595_v51 = vpop.permute.xlu0 %1594 }
 0x182   : > { %3146 = vrot.lane.b32.xlu1 %v3145_v30, %s3456_s18  ;;  %2874 = vmatmul.msk.f32.gmra.mxu0 %vm5681_vm4, %v4119_v39 }
 0x184   : > { %2896 = vmatmul.msk.f32.gmra.mxu2 %vm5681_vm4, %v3679_v44 }
 0x186   : > { %3141 = vrot.lane.b32.xlu0 %v3140_v55, %s3456_s18  ;;  %v4230_v55 = vadd.s32 24, %v4178_v22 }
 0x188   : > { %v1593_v59 = vpop.permute.xlu0 %1592  ;;  %5749 = vst [vmem:[#allocation48_spill] sm:$0xff] %v4230_v55  ;;  %vm723_vm9 = vcmp.ge.s32.totalorder %v4230_v55, %v4180_v8 }
 0x18a   : > { %2875 = vmatmul.msk.f32.gmra.mxu0 %vm5681_vm4, %v4161_v0 }
 0x18c   : > { %v1597_v1 = vpop.permute.xlu1 %1596  ;;  %2897 = vmatmul.msk.f32.gmra.mxu2 %vm5681_vm4, %v3904_v20 }
 0x18d   : > { %2918 = vmatpush.xpose.msk.msrb.mxu3 %vm5681_vm4, %v1597_v1  ;;  %2999 = vmatpush.lsf.msrb.mxu0 %v1597_v1 }
 0x18e   : > { %v4189_v56 = vpop.f32.mrf.mxu0 }
 0x18f   : > { %3000 = vmatpush.lsf.msrb.mxu0 %v1595_v51  ;;  %2876 = vmatmul.msk.f32.vlgmr.msra.gmra.mxu1 %vm5677_vm6, %v4189_v56 }
 0x190   : > { %v1591_v63 = vpop.permute.xlu0 %1590 }
 0x191   : > { %2919 = vmatpush.xpose.msk.msrb.mxu3 %vm5681_vm4, %v1595_v51  ;;  %3001 = vmatpush.lsf.msrb.mxu0 %v1593_v59 }
 0x193   : > { %3002 = vmatpush.lsf.msrb.mxu0 %v1591_v63 }
 0x194   : > { %v1587_v16 = vpop.permute.xlu1 %1586  ;;  %2898 = vmatmul.msk.f32.gmra.mxu2 %vm5681_vm4, %v4039_v47 }
 0x195   : > { %2920 = vmatpush.xpose.msk.msrb.mxu3 %vm5681_vm4, %v1593_v59  ;;  %v1064_v59 = vmul.f32 %v3663_v26, %v4061_v43 }
 0x196   : > { %v4204_v19 = vpop.f32.mrf.mxu0 }
 0x197   : > { %2877 = vmatmul.msk.f32.gmra.mxu1 %vm5678_vm7, %v4204_v19 }
 0x198   : > { %v1589_v37 = vpop.permute.xlu0 %1588 }
 0x199   : > { %2921 = vmatpush.xpose.msk.msrb.mxu3 %vm5681_vm4, %v1591_v63  ;;  %3003 = vmatpush.lsf.msrb.mxu0 %v1589_v37 }
 0x19b   : > { %3004 = vmatpush.lsf.msrb.mxu0 %v1587_v16 }
 0x19c   : > { %v4216_v28 = vpop.permute.xlu1 %1556  ;;  %3005 = vllmr.8.mxu0  ;;  %2899 = vmatmul.msk.f32.gmra.mxu2 %vm5681_vm4, %v4041_v14  ;;  %v1770_v14 = vld [vmem:[#allocation2 + $0x70] sm:$0xff] }
 0x19d   : > { %2922 = vmatpush.xpose.msk.msrb.mxu3 %vm5681_vm4, %v1589_v37 }
 0x19e   : > { %v1440_v31 = vpop.trf.xlu2  ;;  %v4221_v30 = vpop.f32.mrf.mxu0 }
 0x19f   : > { %1472 = vmatmul.f32.vlgmr.msra.gmra.mxu3 %v1440_v31  ;;  %2878 = vmatmul.msk.f32.gmra.mxu1 %vm5690_vm8, %v4221_v30  ;;  %v1096_v31 = vsel %vm5681_vm4, %v1064_v59, 0.0 }
 0x1a0   : > { %v4227_v51 = vpop.permute.xlu0 %1554 }
 0x1a1   : > { %2923 = vmatpush.xpose.msk.msrb.mxu3 %vm5681_vm4, %v1587_v16  ;;  %v4250_v16 = vadd.s32 32, %v4178_v22 }
 0x1a3   : > { %vm724_vm11 = vcmp.ge.s32.totalorder %v4250_v16, %v4180_v8 }
 0x1a4   : > { %v4235_v41 = vpop.permute.xlu1 %1560  ;;  %2900 = vmatmul.msk.f32.gmra.mxu2 %vm5681_vm4, %v4061_v43 }
 0x1a6   : > { %v1441_v1 = vpop.trf.xlu2  ;;  %v4241_v63 = vpop.f32.mrf.mxu0 }
 0x1a7   : > { %1475 = vmatmul.f32.gmra.mxu3 %v1441_v1  ;;  %2879 = vmatmul.msk.f32.gmra.mxu1 %vm723_vm9, %v4241_v63 }
 0x1a8   : > { %v4247_v37 = vpop.permute.xlu0 %1558 }
 0x1ac   : > { %1097 = vadd.xlane.f32.xlu1 %v1096_v31  ;;  %v4257_v1 = vpop.permute.xlu1 %1564  ;;  %v4273_v31 = vadd.s32 40, %v4178_v22  ;;  %2901 = vmatmul.msk.f32.gmra.mxu2 %vm5681_vm4, %v4054_v34 }
 0x1ae   : > { %v1442_v18 = vpop.trf.xlu2  ;;  %v4264_v21 = vpop.f32.mrf.mxu0  ;;  %vm5705_vm12 = vcmp.ge.s32.totalorder %v4273_v31, %v4180_v8 }
 0x1af   : > { %1478 = vmatmul.f32.gmra.mxu3 %v1442_v18  ;;  %2880 = vmatmul.msk.f32.gmra.mxu1 %vm724_vm11, %v4264_v21 }
 0x1b0   : > { %1094 = vadd.xlane.f32.xlu0 %v1093_v2  ;;  %v4270_v59 = vpop.permute.xlu0 %1562  ;;  %v1099_v2 = vsel %vm5681_vm4, %v1065_v61, 0.0  ;;  %v1108_v61 = vsel %vm5681_vm4, %v1068_v36, 0.0 }
 0x1b4   : > { %1103 = vadd.xlane.f32.xlu1 %v1102_v25  ;;  %v4280_v18 = vpop.permute.xlu1 %1568  ;;  %v4296_v25 = vadd.s32 48, %v4178_v22  ;;  %2902 = vmatmul.msk.f32.gmra.mxu2 %vm5681_vm4, %v4075_v29 }
 0x1b6   : > { %v1443_v35 = vpop.trf.xlu2  ;;  %v4287_v3 = vpop.f32.mrf.mxu0  ;;  %vm5704_vm13 = vcmp.ge.s32.totalorder %v4296_v25, %v4180_v8 }
 0x1b7   : > { %1481 = vmatmul.f32.gmra.mxu3 %v1443_v35  ;;  %2881 = vmatmul.msk.f32.gmra.mxu1 %vm5705_vm12, %v4287_v3 }
 0x1b8   : > { %1100 = vadd.xlane.f32.xlu0 %v1099_v2  ;;  %v4293_v45 = vpop.permute.xlu0 %1566  ;;  %v1105_v2 = vsel %vm5681_vm4, %v1067_v5, 0.0  ;;  %v1114_v5 = vsel %vm5681_vm4, %v1070_v23, 0.0 }
 0x1bc   : > { %1109 = vadd.xlane.f32.xlu1 %v1108_v61  ;;  %v4303_v35 = vpop.permute.xlu1 %1572  ;;  %v4322_v61 = vadd.s32 56, %v4178_v22  ;;  %2903 = vmatmul.msk.f32.gmra.mxu2 %vm5681_vm4, %v4068_v62  ;;  %v1765_v62 = vld [vmem:[#allocation2 + $0x48] sm:$0xff] }
 0x1be   : > { %v1444_v49 = vpop.trf.xlu2  ;;  %v4310_v6 = vpop.f32.mrf.mxu0  ;;  %vm5703_vm14 = vcmp.ge.s32.totalorder %v4322_v61, %v4180_v8 }
 0x1bf   : > { %1484 = vmatmul.f32.gmra.mxu3 %v1444_v49  ;;  %2882 = vmatmul.msk.f32.gmra.mxu1 %vm5704_vm13, %v4310_v6  ;;  %v904_v44 = vsel %vm5704_vm13, %v4310_v6, 0.0  ;;  %v1062_v6 = vmul.f32 %v3663_v26, %v4039_v47 }
 0x1c0   : > { %1106 = vadd.xlane.f32.xlu0 %v1105_v2  ;;  %v4316_v36 = vpop.permute.xlu0 %1570  ;;  %v1111_v2 = vsel %vm5681_vm4, %v1069_v10, 0.0  ;;  %v1071_v10 = vmul.f32 %v3663_v26, %v4161_v0  ;;  %v1767_v26 = vld [vmem:[#allocation2 + $0x58] sm:$0xff] }
 0x1c2   : > { %v1117_v17 = vsel %vm5681_vm4, %v1071_v10, 0.0 }
 0x1c4   : > { %1115 = vadd.xlane.f32.xlu1 %v1114_v5  ;;  %v4326_v49 = vpop.permute.xlu1 %1576  ;;  %v4340_v5 = vadd.s32 64, %v4178_v22  ;;  %2904 = vmatmul.msk.f32.gmra.mxu2 %vm5681_vm4, %v4089_v58 }
 0x1c6   : > { %v1445_v52 = vpop.trf.xlu2  ;;  %5750 = vst [vmem:[#allocation49_spill] sm:$0xff] %v4340_v5  ;;  %vm5702_vm15 = vcmp.ge.s32.totalorder %v4340_v5, %v4180_v8 }
 0x1c7   : > { %v4331_v7 = vpop.f32.mrf.mxu0  ;;  %1487 = vmatmul.f32.gmra.mxu3 %v1445_v52  ;;  %v898_v52 = vsel %vm5677_vm6, %v4189_v56, 0.0 }
 0x1c8   : > { %2883 = vmatmul.msk.f32.gmra.mxu1 %vm5703_vm14, %v4331_v7  ;;  %1112 = vadd.xlane.f32.xlu0 %v1111_v2  ;;  %v4337_v23 = vpop.permute.xlu0 %1574 }
 0x1cc   : > { %v3112_v48 = vpop.permute.xlu1 %3111  ;;  %1120 = vadd.xlane.f32.xlu1 %v898_v52  ;;  %v4362_v52 = vadd.s32 72, %v4178_v22  ;;  %2905 = vmatmul.msk.f32.gmra.mxu2 %vm5681_vm4, %v4110_v13 }
 0x1cd   : > { %v3113_v33 = vunpack.i.l.bf16 %v3112_v48  ;;  %v3114_v60 = vunpack.i.h.bf16 %v3112_v48 }
 0x1ce   : > { %v1446_v2 = vpop.trf.xlu2  ;;  %vm5698_vm0 = vcmp.ge.s32.totalorder %v4362_v52, %v4180_v8 }
 0x1cf   : > { %v4353_v4 = vpop.f32.mrf.mxu0  ;;  %1490 = vmatmul.f32.gmra.mxu3 %v1446_v2  ;;  %1836 = vmatpush.msrb.mxu2 %v3113_v33 }
 0x1d0   : > { %2453 = vmatpush.msra.mxu0 %v3113_v33  ;;  %2884 = vmatmul.msk.f32.gmra.mxu1 %vm5702_vm15, %v4353_v4  ;;  %v4359_v56 = vpop.permute.xlu0 %1578  ;;  %v900_v33 = vsel %vm5690_vm8, %v4221_v30, 0.0  ;;  %v899_v30 = vsel %vm5678_vm7, %v4204_v19, 0.0 }
 0x1d1   : > { %1118 = vadd.xlane.f32.xlu0 %v1117_v17  ;;  %1837 = vmatpush.msrb.mxu2 %v3114_v60 }
 0x1d2   : > { %2454 = vmatpush.msra.mxu0 %v3114_v60 }
 0x1d4   : > { %v3117_v48 = vpop.permute.xlu1 %3116  ;;  %1124 = vadd.xlane.f32.xlu1 %v900_v33  ;;  %v4385_v33 = vadd.s32 80, %v4178_v22  ;;  %2906 = vmatmul.msk.f32.gmra.mxu2 %vm5681_vm4, %v4119_v39  ;;  %v4432_v39 = vadd.s32 96, %v4178_v22 }
 0x1d5   : > { %v3118_v10 = vunpack.i.l.bf16 %v3117_v48  ;;  %v3119_v60 = vunpack.i.h.bf16 %v3117_v48  ;;  %v902_v48 = vsel %vm724_vm11, %v4264_v21, 0.0  ;;  %v901_v21 = vsel %vm723_vm9, %v4241_v63, 0.0  ;;  %v1769_v63 = vld [vmem:[#allocation2 + $0x68] sm:$0xff] }
 0x1d6   : > { %v1447_v17 = vpop.trf.xlu2  ;;  %5751 = vst [vmem:[#allocation50_spill] sm:$0xff] %v4385_v33  ;;  %vm5687_vm1 = vcmp.ge.s32.totalorder %v4385_v33, %v4180_v8  ;;  %vm5680_vm3 = vcmp.ge.s32.totalorder %v4432_v39, %v4180_v8 }
 0x1d7   : > { %v4372_v2 = vpop.f32.mrf.mxu0  ;;  %1493 = vmatmul.f32.gmra.mxu3 %v1447_v17  ;;  %1838 = vmatpush.msrb.mxu2 %v3118_v10  ;;  %5753 = vst [vmem:[#allocation52_spill] sm:$0xff] %v4432_v39 }
 0x1d8   : > { %2455 = vmatpush.msra.mxu0 %v3118_v10  ;;  %2885 = vmatmul.msk.f32.gmra.mxu1 %vm5698_vm0, %v4372_v2  ;;  %v4378_v29 = vpop.permute.xlu0 %1580 }
 0x1d9   : > { %1839 = vmatpush.msrb.mxu2 %v3119_v60  ;;  %1122 = vadd.xlane.f32.xlu0 %v899_v30  ;;  %v4410_v30 = vadd.s32 88, %v4178_v22 }
 0x1da   : > { %2456 = vmatpush.msra.mxu0 %v3119_v60  ;;  %v1771_v60 = vld [vmem:[#allocation2 + $0x78] sm:$0xff] }
 0x1db   : > { %5752 = vst [vmem:[#allocation51_spill] sm:$0xff] %v4410_v30  ;;  %1909 = vmatpush.msrb.mxu1 %v1771_v60  ;;  %2978 = vmatpush.msra.mxu3 %v1771_v60  ;;  %vm5682_vm2 = vcmp.ge.s32.totalorder %v4410_v30, %v4180_v8  ;;  %v1768_v60 = vld [vmem:[#allocation2 + $0x60] sm:$0xff] }
 0x1dc   : > { %v4393_v10 = vpop.permute.xlu1 %1582  ;;  %1128 = vadd.xlane.f32.xlu1 %v902_v48  ;;  %2907 = vmatmul.msk.f32.gmra.mxu2 %vm5681_vm4, %v4161_v0 }
 0x1dd   : > { %1910 = vmatpush.msrb.mxu1 %v1770_v14  ;;  %2979 = vmatpush.msra.mxu3 %v1770_v14 }
 0x1df   : > { %v4397_v19 = vpop.f32.mrf.mxu0  ;;  %2924 = vmatmul.msk.f32.vlgmr.msrb.gmra.mxu3 %vm5681_vm4, %v4227_v51  ;;  %1911 = vmatpush.msrb.mxu1 %v1769_v63 }
 0x1e0   : > { %2886 = vmatmul.msk.f32.gmra.mxu1 %vm5687_vm1, %v4397_v19  ;;  %v3122_v17 = vpop.permute.xlu0 %3121  ;;  %2980 = vmatpush.msra.mxu3 %v1769_v63  ;;  %v1090_v63 = vsel %vm5681_vm4, %v1062_v6, 0.0 }
 0x1e1   : > { %1126 = vadd.xlane.f32.xlu0 %v901_v21  ;;  %v3123_v48 = vunpack.i.l.bf16 %v3122_v17  ;;  %v3124_v13 = vunpack.i.h.bf16 %v3122_v17  ;;  %1912 = vmatpush.msrb.mxu1 %v1768_v60 }
 0x1e2   : > { %2981 = vmatpush.msra.mxu3 %v1768_v60 }
 0x1e3   : > { %1840 = vmatpush.msrb.mxu2 %v3123_v48  ;;  %2457 = vmatpush.msra.mxu0 %v3123_v48 }
 0x1e4   : > { %v3132_v21 = vpop.permute.xlu1 %3131  ;;  %1132 = vadd.xlane.f32.xlu1 %v904_v44  ;;  %1913 = vmatpush.msrb.mxu1 %v1767_v26 }
 0x1e5   : > { %1841 = vmatpush.msrb.mxu2 %v3124_v13  ;;  %2458 = vmatpush.msra.mxu0 %v3124_v13  ;;  %v903_v13 = vsel %vm5705_vm12, %v4287_v3, 0.0  ;;  %v906_v3 = vsel %vm5702_vm15, %v4353_v4, 0.0  ;;  %v3133_v60 = vunpack.i.l.bf16 %v3132_v21  ;;  %v3134_v4 = vunpack.i.h.bf16 %v3132_v21  ;;  %v1764_v21 = vld [vmem:[#allocation2 + $0x40] sm:$0xff] }
 0x1e6   : > { %2982 = vmatpush.msra.mxu3 %v1767_v26 }
 0x1e7   : > { %v883_v17 = vpop.f32.mrf.mxu0  ;;  %2925 = vmatmul.msk.f32.gmra.mxu3 %vm5681_vm4, %v4216_v28  ;;  %v4461_v5 = vpop.f32.mrf.mxu2 }
 0x1e8   : > { %2887 = vmatmul.msk.f32.gmra.mxu1 %vm5682_vm2, %v883_v17  ;;  %v3127_v44 = vpop.permute.xlu0 %3126  ;;  %5755 = vst [vmem:[#allocation54_spill] sm:$0xff] %v4461_v5 }
 0x1e9   : > { %1130 = vadd.xlane.f32.xlu0 %v903_v13  ;;  %v3128_v14 = vunpack.i.l.bf16 %v3127_v44  ;;  %v3129_v48 = vunpack.i.h.bf16 %v3127_v44  ;;  %v1766_v13 = vld [vmem:[#allocation2 + $0x50] sm:$0xff] }
 0x1ea   : > { %1914 = vmatpush.msrb.mxu1 %v1766_v13  ;;  %2983 = vmatpush.msra.mxu3 %v1766_v13 }
 0x1eb   : > { %1842 = vmatpush.msrb.mxu2 %v3128_v14  ;;  %2459 = vmatpush.msra.mxu0 %v3128_v14 }
 0x1ec   : > { %1136 = vadd.xlane.f32.xlu1 %v906_v3  ;;  %v3137_v44 = vpop.permute.xlu1 %3136  ;;  %1915 = vmatpush.msrb.mxu1 %v1765_v62 }
 0x1ed   : > { %1843 = vmatpush.msrb.mxu2 %v3129_v48  ;;  %2460 = vmatpush.msra.mxu0 %v3129_v48  ;;  %v905_v48 = vsel %vm5703_vm14, %v4331_v7, 0.0  ;;  %v3138_v3 = vunpack.i.l.bf16 %v3137_v44  ;;  %v3139_v0 = vunpack.i.h.bf16 %v3137_v44  ;;  %v909_v7 = vsel %vm5682_vm2, %v883_v17, 0.0 }
 0x1ee   : > { %1091 = vadd.xlane.f32.xlu2 %v1090_v63  ;;  %v4455_v63 = vadd.s32 104, %v4178_v22  ;;  %1916 = vmatpush.msrb.mxu1 %v1764_v21  ;;  %v907_v17 = vsel %vm5698_vm0, %v4372_v2, 0.0 }
 0x1ef   : > { %v886_v14 = vpop.f32.mrf.mxu0  ;;  %2926 = vmatmul.msk.f32.gmra.mxu3 %vm5681_vm4, %v4247_v37  ;;  %1844 = vmatpush.msrb.mxu2 %v3133_v60 }
 0x1f0   : > { %2888 = vmatmul.msk.f32.gmra.mxu1 %vm5680_vm3, %v886_v14  ;;  %2461 = vmatpush.msra.mxu0 %v3133_v60  ;;  %v4448_v6 = vpop.permute.xlu0 %1584  ;;  %5754 = vst [vmem:[#allocation53_spill] sm:$0xff] %v4455_v63  ;;  %v908_v60 = vsel %vm5687_vm1, %v4397_v19, 0.0  ;;  %vm5672_vm5 = vcmp.ge.s32.totalorder %v4455_v63, %v4180_v8 }
 0x1f1   : > { %1134 = vadd.xlane.f32.xlu0 %v905_v48  ;;  %1845 = vmatpush.msrb.mxu2 %v3134_v4  ;;  %v4481_v48 = vadd.s32 112, %v4178_v22 }
 0x1f2   : > { %2462 = vmatpush.msra.mxu0 %v3134_v4  ;;  %2984 = vmatpush.msra.mxu3 %v1765_v62  ;;  %v910_v62 = vsel %vm5680_vm3, %v886_v14, 0.0 }
 0x1f3   : > { %1846 = vmatpush.msrb.mxu2 %v3138_v3  ;;  %5756 = vst [vmem:[#allocation55_spill] sm:$0xff] %v4481_v48  ;;  %vm5679_vm10 = vcmp.ge.s32.totalorder %v4481_v48, %v4180_v8 }
 0x1f4   : > { %2463 = vmatpush.msra.mxu0 %v3138_v3  ;;  %1140 = vadd.xlane.f32.xlu1 %v908_v60  ;;  %v3147_v3 = vpop.permute.xlu1 %3146  ;;  %v4483_v60 = vpop.f32.mrf.mxu2 }
 0x1f5   : > { %1847 = vmatpush.msrb.mxu2 %v3139_v0  ;;  %5757 = vst [vmem:[#allocation56_spill] sm:$0xff] %v4483_v60  ;;  %2985 = vmatpush.msra.mxu3 %v1764_v21  ;;  %v3148_v2 = vunpack.i.l.bf16 %v3147_v3 }
 0x1f6   : > { %2464 = vmatpush.msra.mxu0 %v3139_v0  ;;  %1142 = vadd.xlane.f32.xlu2 %v909_v7  ;;  %v3149_v7 = vunpack.i.h.bf16 %v3147_v3 }
 0x1f7   : > { %v889_v4 = vpop.f32.mrf.mxu0  ;;  %2927 = vmatmul.msk.f32.gmra.mxu3 %vm5681_vm4, %v4235_v41 }
 0x1f8   : > { %2889 = vmatmul.msk.f32.gmra.mxu1 %vm5672_vm5, %v889_v4  ;;  %v3142_v19 = vpop.permute.xlu0 %3141  ;;  %v911_v0 = vsel %vm5672_vm5, %v889_v4, 0.0  ;;  %v4499_v4 = vadd.s32 120, %v4178_v22 }
 0x1f9   : > { %1138 = vadd.xlane.f32.xlu0 %v907_v17  ;;  %v3143_v26 = vunpack.i.l.bf16 %v3142_v19  ;;  %v3144_v44 = vunpack.i.h.bf16 %v3142_v19 }
 0x1fa   : > { %5758 = vst [vmem:[#allocation57_spill] sm:$0xff] %v4499_v4  ;;  %vm5695_vm5 = vcmp.ge.s32.totalorder %v4499_v4, %v4180_v8 }
 0x1fb   : > { %1848 = vmatpush.msrb.mxu2 %v3143_v26  ;;  %2465 = vmatpush.msra.mxu0 %v3143_v26 }
 0x1fc   : > { %1146 = vadd.xlane.f32.xlu1 %v911_v0  ;;  %v4503_v19 = vpop.f32.mrf.mxu2  ;;  %v3151_v0 = vld [vmem:[#allocation3 + $0x1] ss:$0 sm:$0xff] }
 0x1fd   : > { %1849 = vmatpush.msrb.mxu2 %v3144_v44  ;;  %2466 = vmatpush.msra.mxu0 %v3144_v44  ;;  %5759 = vst [vmem:[#allocation58_spill] sm:$0xff] %v4503_v19 }
 0x1ff   : > { %v892_v13 = vpop.f32.mrf.mxu0  ;;  %2928 = vmatmul.msk.f32.gmra.mxu3 %vm5681_vm4, %v4270_v59  ;;  %1850 = vmatpush.msrb.mxu2 %v3148_v2 }
 0x200   : > { %2890 = vmatmul.msk.f32.gmra.mxu1 %vm5679_vm10, %v892_v13  ;;  %2467 = vmatpush.msra.mxu0 %v3148_v2  ;;  %v912_v21 = vsel %vm5679_vm10, %v892_v13, 0.0 }
 0x201   : > { %1144 = vadd.xlane.f32.xlu0 %v910_v62  ;;  %1148 = vadd.xlane.f32.xlu2 %v912_v21 }
 0x202   : > { %1851 = vmatpush.msrb.mxu2 %v3149_v7  ;;  %2468 = vmatpush.msra.mxu0 %v3149_v7 }
 0x203   : > { %3006 = vmatmul.lmr.bf16.vlgmr.msra.gmra.8.mxu0 }
 0x204   : > { %v4517_v26 = vpop.f32.mrf.mxu2 }
 0x205   : > { %5762 = vst [vmem:[#allocation61_spill] sm:$0xff] %v4517_v26 }
 0x207   : > { %v4505_v17 = vpop.f32.mrf.mxu0  ;;  %2929 = vmatmul.msk.f32.gmra.mxu3 %vm5681_vm4, %v4257_v1 }
 0x208   : > { %5760 = vst [vmem:[#allocation59_spill] sm:$0xff] %v4505_v17  ;;  %2891 = vmatmul.msk.f32.gmra.mxu1 %vm5695_vm5, %v4505_v17 }
 0x20b   : > { %3007 = vmatmul.lmr.bf16.gmra.8.mxu0 }
 0x20c   : > { %v4513_v14 = vpop.f32.mrf.mxu1  ;;  %v4528_v3 = vpop.f32.mrf.mxu2 }
 0x20d   : > { %5761 = vst [vmem:[#allocation60_spill] sm:$0xff] %v4513_v14 }
 0x20e   : > { %5764 = vst [vmem:[#allocation63_spill] sm:$0xff] %v4528_v3 }
 0x20f   : > { %2930 = vmatmul.msk.f32.gmra.mxu3 %vm5681_vm4, %v4293_v45 }
 0x210   : > { %2956 = vmatmul.msk.f32.vlgmr.msrb.gmra.mxu1 %vm5681_vm4, %v4227_v51 }
 0x213   : > { %3008 = vmatmul.lmr.bf16.gmra.8.mxu0 }
 0x214   : > { %v4521_v44 = vpop.f32.mrf.mxu1  ;;  %v4541_v7 = vpop.f32.mrf.mxu2 }
 0x215   : > { %5763 = vst [vmem:[#allocation62_spill] sm:$0xff] %v4521_v44  ;;  %1970 = vrot.lane.b32.xlu1 %v3151_v0, %s3456_s18 }
 0x217   : > { %2931 = vmatmul.msk.f32.gmra.mxu3 %vm5681_vm4, %v4280_v18 }
 0x218   : > { %2957 = vmatmul.msk.f32.gmra.mxu1 %vm5681_vm4, %v4216_v28 }
 0x21b   : > { %3009 = vmatmul.lmr.bf16.gmra.8.mxu0 }
 0x21c   : > { %v4530_v2 = vpop.f32.mrf.mxu1 }
 0x21d   : > { %5765 = vst [vmem:[#allocation64_spill] sm:$0xff] %v4530_v2 }
 0x21f   : > { %2932 = vmatmul.msk.f32.gmra.mxu3 %vm5681_vm4, %v4316_v36  ;;  %v4534_v51 = vpop.xlane.xlu1 %1097 }
 0x220   : > { %2958 = vmatmul.msk.f32.gmra.mxu1 %vm5681_vm4, %v4247_v37 }
 0x222   : > { %v1473_v13 = vpop.f32.mrf.mxu3 }
 0x223   : > { %v1497_v62 = vadd.f32 %v1473_v13, %v4135_v12  ;;  %v4539_v21 = vpop.xlane.xlu0 %1094  ;;  %3010 = vmatmul.lmr.bf16.gmra.8.mxu0 }
 0x224   : > { %v4543_v28 = vpop.f32.mrf.mxu1 }
 0x225   : > { %5766 = vst [vmem:[#allocation65_spill] sm:$0xff] %v4543_v28  ;;  %v4558_v28 = vpop.f32.mrf.mxu2 }
 0x226   : > { %1505 = vst.msk [vmem:[#allocation2] sm:$0xff] %vm5681_vm4, %v1497_v62 }
 0x227   : > { %2933 = vmatmul.msk.f32.gmra.mxu3 %vm5681_vm4, %v4303_v35  ;;  %v4548_v0 = vpop.xlane.xlu1 %1103 }
 0x228   : > { %2959 = vmatmul.msk.f32.gmra.mxu1 %vm5681_vm4, %v4235_v41 }
 0x22a   : > { %v1476_v37 = vpop.f32.mrf.mxu3 }
 0x22b   : > { %v1498_v12 = vadd.f32 %v1476_v37, %v4131_v57  ;;  %v4553_v13 = vpop.xlane.xlu0 %1100  ;;  %3011 = vmatmul.lmr.bf16.gmra.8.mxu0 }
 0x22c   : > { %v4555_v26 = vpop.f32.mrf.mxu1 }
 0x22d   : > { %5767 = vst [vmem:[#allocation66_spill] sm:$0xff] %v4555_v26  ;;  %v4576_v2 = vpop.f32.mrf.mxu2 }
 0x22e   : > { %1506 = vst.msk [vmem:[#allocation2 + $0x8] sm:$0xff] %vm5681_vm4, %v1498_v12 }
 0x22f   : > { %2934 = vmatmul.msk.f32.gmra.mxu3 %vm5681_vm4, %v4337_v23  ;;  %v4562_v62 = vpop.xlane.xlu1 %1109 }
 0x230   : > { %2960 = vmatmul.msk.f32.gmra.mxu1 %vm5681_vm4, %v4270_v59 }
 0x232   : > { %v1479_v41 = vpop.f32.mrf.mxu3 }
 0x233   : > { %v1499_v57 = vadd.f32 %v1479_v41, %v4122_v53  ;;  %v4567_v37 = vpop.xlane.xlu0 %1106  ;;  %3012 = vmatmul.lmr.bf16.gmra.8.mxu0 }
 0x234   : > { %v4569_v19 = vpop.f32.mrf.mxu1 }
 0x235   : > { %1507 = vst.msk [vmem:[#allocation2 + $0x10] sm:$0xff] %vm5681_vm4, %v1499_v57  ;;  %v1028_v14 = vpop.f32.mrf.mxu2 }
 0x237   : > { %2935 = vmatmul.msk.f32.gmra.mxu3 %vm5681_vm4, %v4326_v49  ;;  %v4574_v12 = vpop.xlane.xlu1 %1115 }
 0x238   : > { %2961 = vmatmul.msk.f32.gmra.mxu1 %vm5681_vm4, %v4257_v1 }
 0x23a   : > { %v1482_v59 = vpop.f32.mrf.mxu3 }
 0x23b   : > { %v1500_v53 = vadd.f32 %v1482_v59, %v4113_v38  ;;  %v4581_v41 = vpop.xlane.xlu0 %1112  ;;  %3013 = vmatmul.lmr.bf16.gmra.8.mxu0 }
 0x23c   : > { %v4583_v5 = vpop.f32.mrf.mxu1 }
 0x23d   : > { %1508 = vst.msk [vmem:[#allocation2 + $0x18] sm:$0xff] %vm5681_vm4, %v1500_v53  ;;  %v1031_v26 = vpop.f32.mrf.mxu2 }
 0x23f   : > { %2936 = vmatmul.msk.f32.gmra.mxu3 %vm5681_vm4, %v4359_v56  ;;  %v4588_v57 = vpop.xlane.xlu1 %1120 }
 0x240   : > { %5768 = vst [vmem:[#allocation67_spill] sm:$0xff] %v4588_v57  ;;  %2962 = vmatmul.msk.f32.gmra.mxu1 %vm5681_vm4, %v4293_v45 }
 0x242   : > { %v1485_v1 = vpop.f32.mrf.mxu3 }
 0x243   : > { %v1501_v3 = vadd.f32 %v1485_v1, %v4108_v9 }
 0x244   : > { %v4593_v38 = vpop.xlane.xlu0 %1118 }
 0x245   : > { %5769 = vst [vmem:[#allocation68_spill] sm:$0xff] %v4593_v38  ;;  %v4596_v59 = vpop.f32.mrf.mxu1 }
 0x246   : > { %1509 = vst.msk [vmem:[#allocation2 + $0x20] sm:$0xff] %vm5681_vm4, %v1501_v3 }
 0x247   : > { %2937 = vmatmul.msk.f32.gmra.mxu3 %vm5681_vm4, %v4378_v29  ;;  %v4600_v53 = vpop.xlane.xlu1 %1124 }
 0x248   : > { %5770 = vst [vmem:[#allocation69_spill] sm:$0xff] %v4600_v53  ;;  %2963 = vmatmul.msk.f32.gmra.mxu1 %vm5681_vm4, %v4280_v18 }
 0x24a   : > { %v1488_v57 = vpop.f32.mrf.mxu3 }
 0x24b   : > { %v1502_v45 = vadd.f32 %v1488_v57, %v4102_v15 }
 0x24c   : > { %v4605_v60 = vpop.xlane.xlu0 %1122 }
 0x24d   : > { %5771 = vst [vmem:[#allocation70_spill] sm:$0xff] %v4605_v60  ;;  %v963_v9 = vpop.f32.mrf.mxu1 }
 0x24e   : > { %1510 = vst.msk [vmem:[#allocation2 + $0x28] sm:$0xff] %vm5681_vm4, %v1502_v45  ;;  %v4608_v3 = vadd.f32 %v1028_v14, %v963_v9  ;;  %v1034_v45 = vpop.f32.mrf.mxu2 }
 0x24f   : > { %2938 = vmatmul.msk.f32.gmra.mxu3 %vm5681_vm4, %v4393_v10  ;;  %v4612_v1 = vpop.xlane.xlu1 %1128 }
 0x250   : > { %5772 = vst [vmem:[#allocation71_spill] sm:$0xff] %v4612_v1  ;;  %2964 = vmatmul.msk.f32.gmra.mxu1 %vm5681_vm4, %v4316_v36 }
 0x252   : > { %v1491_v18 = vpop.f32.mrf.mxu3 }
 0x253   : > { %v1503_v53 = vadd.f32 %v1491_v18, %v4099_v54 }
 0x254   : > { %v4617_v15 = vpop.xlane.xlu0 %1126 }
 0x255   : > { %5773 = vst [vmem:[#allocation72_spill] sm:$0xff] %v4617_v15  ;;  %v966_v57 = vpop.f32.mrf.mxu1 }
 0x256   : > { %1511 = vst.msk [vmem:[#allocation2 + $0x30] sm:$0xff] %vm5681_vm4, %v1503_v53  ;;  %v4620_v44 = vadd.f32 %v1031_v26, %v966_v57  ;;  %v1037_v15 = vpop.f32.mrf.mxu2 }
 0x257   : > { %2939 = vmatmul.msk.f32.gmra.mxu3 %vm5681_vm4, %v4448_v6  ;;  %v1133_v14 = vpop.xlane.xlu1 %1132 }
 0x258   : > { %2965 = vmatmul.msk.f32.gmra.mxu1 %vm5681_vm4, %v4303_v35 }
 0x25a   : > { %v1494_v9 = vpop.f32.mrf.mxu3 }
 0x25b   : > { %v1504_v36 = vadd.f32 %v1494_v9, %v4092_v11 }
 0x25c   : > { %v1131_v1 = vpop.xlane.xlu0 %1130 }
 0x25d   : > { %1512 = vst.msk [vmem:[#allocation2 + $0x38] sm:$0xff] %vm5681_vm4, %v1504_v36  ;;  %v1157_v54 = vadd.f32 %v1131_v1, %v4175_v46  ;;  %v969_v53 = vpop.f32.mrf.mxu1 }
 0x25e   : > { %v4629_v18 = vadd.f32 %v1034_v45, %v969_v53 }
 0x25f   : > { %v4631_v26 = vadd.f32 1e-06, %v1157_v54  ;;  %2969 = vmatmul.msk.f32.vlgmr.msra.gmra.mxu3 %vm5681_vm4, %v4378_v29  ;;  %v1137_v57 = vpop.xlane.xlu1 %1136 }
 0x260   : > { %v1160_v35 = vadd.f32 %v1137_v57, %v4534_v51  ;;  %2966 = vmatmul.msk.f32.gmra.mxu1 %vm5681_vm4, %v4337_v23 }
 0x261   : > { %v1092_v11 = vpop.xlane.xlu2 %1091  ;;  %3216 = vrcp.f32 %v4631_v26  ;;  %vm1259_vm10 = vweird.f32 %v4631_v26 }
 0x262   : > { %v1158_v9 = vadd.f32 %v1133_v14, %v1092_v11  ;;  %v4639_v46 = vpop.f32.mrf.mxu3  ;;  %v4641_v1 = vadd.f32 1e-06, %v1160_v35  ;;  %v1265_v35 = vand.u32 2147483648, %v4631_v26 }
 0x263   : > { %5774 = vst [vmem:[#allocation73_spill] sm:$0xff] %v4639_v46  ;;  %2940 = vmatmul.msk.f32.vlgmr.msrb.gmra.mxu2 %vm5677_vm6, %v4639_v46 }
 0x264   : > { %v4647_v29 = vadd.f32 1e-06, %v1158_v9  ;;  %v1135_v45 = vpop.xlane.xlu0 %1134 }
 0x265   : > { %v1159_v51 = vadd.f32 %v1135_v45, %v4539_v21  ;;  %v972_v36 = vpop.f32.mrf.mxu1 }
 0x266   : > { %3218 = vrcp.f32 %v4647_v29  ;;  %v4651_v23 = vadd.f32 %v1037_v15, %v972_v36  ;;  %v1040_v15 = vpop.f32.mrf.mxu2  ;;  %vm1273_vm6 = vweird.f32 %v4647_v29 }
 0x267   : > { %3220 = vrcp.f32 %v4641_v1  ;;  %v4654_v14 = vadd.f32 1e-06, %v1159_v51  ;;  %2970 = vmatmul.msk.f32.gmra.mxu3 %vm5681_vm4, %v4393_v10  ;;  %v1141_v54 = vpop.xlane.xlu1 %1140  ;;  %v4658_v53 = vpop.eup %3216  ;;  %v4672_v10 = vadd.f32 %v4541_v7, %v4569_v19  ;;  %v4684_v51 = vadd.f32 %v4558_v28, %v4583_v5 }
 0x268   : > { %v1162_v57 = vadd.f32 %v1141_v54, %v4548_v0  ;;  %2967 = vmatmul.msk.f32.gmra.mxu1 %vm5681_vm4, %v4326_v49  ;;  %v1255_v0 = vmul.f32 %v4658_v53, %v4631_v26  ;;  %v1263_v7 = vand.u32 2147483647, %v4631_v26  ;;  %v1277_v5 = vand.u32 2147483647, %v4647_v29 }
 0x269   : > { %3222 = vrcp.f32 %v4654_v14  ;;  %v1143_v21 = vpop.xlane.xlu2 %1142  ;;  %v4698_v28 = vor.u32 1.1754944e-38, %v1265_v35  ;;  %vm1260_vm3 = vweird.f32 %v4658_v53 }
 0x26a   : > { %v4665_v11 = vadd.f32 1e-06, %v1162_v57  ;;  %v1163_v9 = vadd.f32 %v1143_v21, %v4567_v37  ;;  %v4668_v45 = vpop.f32.mrf.mxu3  ;;  %v4688_v37 = vadd.f32 %v4576_v2, %v4596_v59  ;;  %v1291_v2 = vand.u32 2147483647, %v4654_v14 }
 0x26b   : > { %5775 = vst [vmem:[#allocation74_spill] sm:$0xff] %v4668_v45  ;;  %2941 = vmatmul.msk.f32.gmra.mxu2 %vm5678_vm7, %v4668_v45  ;;  %v1293_v59 = vand.u32 2147483648, %v4654_v14  ;;  %v1256_v38 = vsub.f32 1.0, %v1255_v0  ;;  %vm1287_vm7 = vweird.f32 %v4654_v14  ;;  %vm4759_vm5 = vcmp.eq.f32.partialorder %v1263_v7, 8.507059e+37 }
 0x26c   : > { %v4680_v49 = vpop.eup %3218  ;;  %3224 = vrcp.f32 %v4665_v11  ;;  %v1139_v19 = vpop.xlane.xlu0 %1138  ;;  %v4707_v45 = vadd.f32 1e-06, %v1163_v9  ;;  %v1333_v9 = vand.u32 2147483647, %v4665_v11  ;;  %vm1329_vm2 = vweird.f32 %v4665_v11 }
 0x26d   : > { %v4692_v36 = vpop.eup %3220  ;;  %v1269_v54 = vmul.f32 %v4680_v49, %v4647_v29  ;;  %v1161_v57 = vadd.f32 %v1139_v19, %v4553_v13  ;;  %v975_v21 = vpop.f32.mrf.mxu1  ;;  %vm4787_vm13 = vcmp.eq.f32.partialorder %v1277_v5, 8.507059e+37 }
 0x26e   : > { %v4700_v60 = vadd.f32 %v1040_v15, %v975_v21  ;;  %v4716_v15 = vmul.f32 %v4692_v36, %v4641_v1  ;;  %vm4751_vm1 = vcmp.eq.f32.partialorder %v1333_v9, 8.507059e+37 }
 0x26f   : > { %v4705_v46 = vpop.eup %3222  ;;  %v1270_v24 = vsub.f32 1.0, %v1269_v54  ;;  %v4709_v13 = vadd.f32 1e-06, %v1161_v57  ;;  %2971 = vmatmul.msk.f32.gmra.mxu3 %vm5681_vm4, %v4448_v6  ;;  %v1147_v35 = vpop.xlane.xlu1 %1146 }
 0x270   : > { %v1283_v19 = vmul.f32 %v4705_v46, %v4654_v14  ;;  %v1165_v0 = vadd.f32 %v1147_v35, %v4581_v41  ;;  %2968 = vmatmul.msk.f32.gmra.mxu1 %vm5681_vm4, %v4359_v56  ;;  %v1294_v56 = vor.u32 1.1754944e-38, %v1293_v59  ;;  %v1335_v35 = vand.u32 2147483648, %v4665_v11 }
 0x271   : > { %3226 = vrcp.f32 %v4709_v13  ;;  %v1271_v6 = vmul.f32 %v4680_v49, %v1270_v24  ;;  %v1043_v24 = vpop.f32.mrf.mxu2  ;;  %vm4743_vm4 = vcmp.eq.f32.partialorder %v1291_v2, 8.507059e+37  ;;  %v1257_v59 = vmul.f32 %v4658_v53, %v1256_v38 }
 0x272   : > { %v4729_v54 = vpop.eup %3224  ;;  %v1284_v57 = vsub.f32 1.0, %v1283_v19  ;;  %v4731_v21 = vadd.f32 1e-06, %v1165_v0  ;;  %v4733_v41 = vpop.f32.mrf.mxu3  ;;  %3228 = vrcp.f32 %v4707_v45  ;;  %vm1288_vm0 = vweird.f32 %v4705_v46 }
 0x273   : > { %5776 = vst [vmem:[#allocation75_spill] sm:$0xff] %v4733_v41  ;;  %v1325_v22 = vmul.f32 %v4729_v54, %v4665_v11  ;;  %2942 = vmatmul.msk.f32.gmra.mxu2 %vm5690_vm8, %v4733_v41  ;;  %vm1274_vm8 = vweird.f32 %v4680_v49  ;;  %v1272_v38 = vadd.f32 %v4680_v49, %v1271_v6  ;;  %v1336_v4 = vor.u32 1.1754944e-38, %v1335_v35  ;;  %vm4796_vm12 = vmor %vm1287_vm7, %vm1288_vm0 }
 0x274   : > { %3230 = vrcp.f32 %v4731_v21  ;;  %v1145_v48 = vpop.xlane.xlu0 %1144  ;;  %v1149_v63 = vpop.xlane.xlu2 %1148  ;;  %v1285_v9 = vmul.f32 %v4705_v46, %v1284_v57  ;;  %vm1330_vm15 = vweird.f32 %v4729_v54  ;;  %vm4783_vm14 = vmor %vm1273_vm6, %vm1274_vm8  ;;  %v5789_v35 = vand.u32 2147483648, %v4647_v29 }
 0x275   : > { %v1326_v2 = vsub.f32 1.0, %v1325_v22  ;;  %v1164_v42 = vadd.f32 %v1145_v48, %v4562_v62  ;;  %v1166_v41 = vadd.f32 %v1149_v63, %v4574_v12  ;;  %v978_v30 = vpop.f32.mrf.mxu1  ;;  %v1258_v62 = vadd.f32 %v4658_v53, %v1257_v59  ;;  %vm4817_vm7 = vmor %vm1259_vm10, %vm1260_vm3 }
 0x276   : > { %v4763_v33 = vadd.f32 %v1043_v24, %v978_v30  ;;  %v1286_v30 = vadd.f32 %v4705_v46, %v1285_v9  ;;  %v1280_v5 = vor.u32 1.1754944e-38, %v5789_v35  ;;  %vm1315_vm6 = vweird.f32 %v4709_v13  ;;  %vm1331_vm8 = vmor %vm1329_vm2, %vm1330_vm15 }
 0x277   : > { %v4767_v17 = vpop.eup %3226  ;;  %v4769_v22 = vadd.f32 1e-06, %v1164_v42  ;;  %v4771_v48 = vadd.f32 1e-06, %v1166_v41  ;;  %v1327_v63 = vmul.f32 %v4729_v54, %v1326_v2  ;;  %v1276_v41 = vsel %vm4783_vm14, %v4680_v49, %v1272_v38 }
 0x278   : > { %v1311_v12 = vmul.f32 %v4767_v17, %v4709_v13  ;;  %v4791_v6 = vpop.eup %3228  ;;  %v1290_v14 = vsel %vm4796_vm12, %v4705_v46, %v1286_v30  ;;  %v1375_v38 = vand.u32 2147483647, %v4731_v21  ;;  %v1262_v26 = vsel %vm4817_vm7, %v4658_v53, %v1258_v62 }
 0x279   : > { %3232 = vrcp.f32 %v4769_v22  ;;  %v1328_v9 = vadd.f32 %v4729_v54, %v1327_v63  ;;  %v1046_v46 = vpop.f32.mrf.mxu2  ;;  %v1319_v63 = vand.u32 2147483647, %v4709_v13  ;;  %v1295_v30 = vsel %vm4743_vm4, %v1294_v56, %v1290_v14 }
 0x27a   : > { %v3231_v24 = vpop.eup %3230  ;;  %v1312_v59 = vsub.f32 1.0, %v1311_v12  ;;  %3234 = vrcp.f32 %v4771_v48  ;;  %v4807_v2 = vpop.f32.mrf.mxu3  ;;  %v1377_v12 = vand.u32 2147483648, %v4731_v21  ;;  %v1281_v57 = vsel %vm4787_vm13, %v1280_v5, %v1276_v41 }
 0x27b   : > { %v1367_v49 = vmul.f32 %v3231_v24, %v4731_v21  ;;  %2943 = vmatmul.msk.f32.gmra.mxu2 %vm723_vm9, %v4807_v2  ;;  %v1332_v42 = vsel %vm1331_vm8, %v4729_v54, %v1328_v9  ;;  %v4842_v11 = vmul.f32 %v1295_v30, %v4688_v37  ;;  %v4847_v62 = vmul.f32 %v1281_v57, %v4684_v51 }
 0x27c   : > { %v1337_v53 = vsel %vm4751_vm1, %v1336_v4, %v1332_v42  ;;  %v1267_v54 = vsel %vm4759_vm5, %v4698_v28, %v1262_v26  ;;  %v1313_v19 = vmul.f32 %v4767_v17, %v1312_v59  ;;  %vm1372_vm4 = vweird.f32 %v3231_v24 }
 0x27d   : > { %v1368_v35 = vsub.f32 1.0, %v1367_v49  ;;  %v981_v55 = vpop.f32.mrf.mxu1  ;;  %v4852_v56 = vmul.f32 %v1337_v53, %v4629_v18  ;;  %v4861_v39 = vmul.f32 %v1267_v54, %v4672_v10  ;;  %vm1316_vm10 = vweird.f32 %v4767_v17 }
 0x27e   : > { %v4849_v29 = vadd.f32 %v1046_v46, %v981_v55  ;;  %vm1371_vm12 = vweird.f32 %v4731_v21  ;;  %v1314_v18 = vadd.f32 %v4767_v17, %v1313_v19  ;;  %v1321_v51 = vand.u32 2147483648, %v4709_v13  ;;  %vm4872_vm14 = vmor %vm1315_vm6, %vm1316_vm10 }
 0x27f   : > { %v4858_v7 = vpop.eup %3232  ;;  %v1369_v37 = vmul.f32 %v3231_v24, %v1368_v35  ;;  %vm1376_vm13 = vcmp.eq.f32.partialorder %v1375_v38, 8.507059e+37  ;;  %v1378_v41 = vor.u32 1.1754944e-38, %v1377_v12  ;;  %vm1373_vm15 = vmor %vm1371_vm12, %vm1372_vm4  ;;  %v5794_v9 = vsub.f32 1.0, %v4716_v15 }
 0x280   : > { %v3235_v55 = vpop.eup %3234  ;;  %v1353_v4 = vmul.f32 %v4858_v7, %v4769_v22  ;;  %v1318_v21 = vsel %vm4872_vm14, %v4767_v17, %v1314_v18  ;;  %v1322_v14 = vor.u32 1.1754944e-38, %v1321_v51  ;;  %v1391_v13 = vand.u32 2147483648, %v4771_v48 }
 0x281   : > { %v1381_v28 = vmul.f32 %v3235_v55, %v4771_v48  ;;  %v1370_v0 = vadd.f32 %v3231_v24, %v1369_v37  ;;  %v1299_v49 = vmul.f32 %v4692_v36, %v5794_v9  ;;  %vm1320_vm0 = vcmp.eq.f32.partialorder %v1319_v63, 8.507059e+37 }
 0x282   : > { %v1354_v5 = vsub.f32 1.0, %v1353_v4  ;;  %v4876_v59 = vpop.f32.mrf.mxu3  ;;  %vm1386_vm1 = vweird.f32 %v3235_v55  ;;  %v1389_v12 = vand.u32 2147483647, %v4771_v48  ;;  %v1323_v17 = vsel %vm1320_vm0, %v1322_v14, %v1318_v21 }
 0x283   : > { %v1382_v38 = vsub.f32 1.0, %v1381_v28  ;;  %v1374_v46 = vsel %vm1373_vm15, %v3231_v24, %v1370_v0  ;;  %2944 = vmatmul.msk.f32.gmra.mxu2 %vm724_vm11, %v4876_v59  ;;  %v4894_v42 = vmul.f32 %v1323_v17, %v4620_v44  ;;  %v1339_v57 = vmul.f32 %v4791_v6, %v4707_v45  ;;  %v5804_v17 = vld [vmem:[#allocation44_spill] sm:$0xff] }
 0x284   : > { %v1379_v26 = vsel %vm1376_vm13, %v1378_v41, %v1374_v46  ;;  %v1355_v24 = vmul.f32 %v4858_v7, %v1354_v5  ;;  %v1300_v35 = vadd.f32 %v4692_v36, %v1299_v49  ;;  %vm1301_vm2 = vweird.f32 %v4641_v1 }
 0x285   : > { %v4891_v30 = vmul.f32 %v1379_v26, %v4763_v33  ;;  %v1383_v15 = vmul.f32 %v3235_v55, %v1382_v38  ;;  %vm1302_vm3 = vweird.f32 %v4692_v36  ;;  %vm1385_vm5 = vweird.f32 %v4771_v48  ;;  %v1049_v48 = vpop.f32.mrf.mxu2 }
 0x286   : > { %v1392_v33 = vor.u32 1.1754944e-38, %v1391_v13  ;;  %v1307_v44 = vand.u32 2147483648, %v4641_v1  ;;  %vm1387_vm6 = vmor %vm1385_vm5, %vm1386_vm1  ;;  %v1305_v4 = vand.u32 2147483647, %v4641_v1  ;;  %vm1390_vm7 = vcmp.eq.f32.partialorder %v1389_v12, 8.507059e+37 }
 0x287   : > { %v1384_v63 = vadd.f32 %v3235_v55, %v1383_v15  ;;  %v4903_v53 = vpop.permute.xlu1 %1970  ;;  %vm4914_vm8 = vmor %vm1301_vm2, %vm1302_vm3  ;;  %v1356_v51 = vadd.f32 %v4858_v7, %v1355_v24  ;;  %vm1358_vm4 = vweird.f32 %v4858_v7  ;;  %v1340_v28 = vsub.f32 1.0, %v1339_v57  ;;  %v5805_v24 = vld [vmem:[#allocation40_spill] sm:$0xff] }
 0x288   : > { %v1976_v54 = vmul.f32 %v4903_v53, %v3676_v40  ;;  %v1974_v19 = vmul.f32 %v4903_v53, %v3665_v27  ;;  %v1973_v37 = vmul.f32 %v4903_v53, %v3668_v32  ;;  %v1304_v27 = vsel %vm4914_vm8, %v4692_v36, %v1300_v35 }
 0x289   : > { %v1388_v18 = vsel %vm1387_vm6, %v3235_v55, %v1384_v63  ;;  %v1363_v32 = vand.u32 2147483648, %v4769_v22  ;;  %vm5798_vm10 = vcmp.ge.s32.totalorder %v4273_v31, %v4180_v8  ;;  %v1308_v55 = vor.u32 1.1754944e-38, %v1307_v44  ;;  %v5808_v63 = vld [vmem:[#allocation59_spill] sm:$0xff] }
 0x28a   : > { %v1393_v40 = vsel %vm1390_vm7, %v1392_v33, %v1388_v18  ;;  %v4920_v0 = vpop.f32.mrf.mxu3  ;;  %2011 = vrot.lane.b32.xlu1 %v1976_v54, %s3456_s18  ;;  %2007 = vrot.lane.b32.xlu0 %v1974_v19, %s3456_s18  ;;  %vm1357_vm12 = vweird.f32 %v4769_v22  ;;  %v1361_v41 = vand.u32 2147483647, %v4769_v22  ;;  %vm1306_vm13 = vcmp.eq.f32.partialorder %v1305_v4, 8.507059e+37  ;;  %v5809_v33 = vld [vmem:[#allocation57_spill] sm:$0xff]  ;;  %v5811_v19 = vld [vmem:[#allocation50_spill] sm:$0xff]  ;;  %v5813_v4 = vld [vmem:[#allocation51_spill] sm:$0xff]  ;;  %v984_v18 = vpop.f32.mrf.mxu1 }
 0x28b   : > { %v4929_v1 = vmul.f32 %v1393_v40, %v4849_v29  ;;  %2005 = vrot.lane.b32.xlu2 %v1973_v37, %s3456_s18  ;;  %2945 = vmatmul.msk.f32.gmra.mxu2 %vm5798_vm10, %v4920_v0  ;;  %vm1359_vm14 = vmor %vm1357_vm12, %vm1358_vm4  ;;  %v1309_v36 = vsel %vm1306_vm13, %v1308_v55, %v1304_v27  ;;  %v1364_v5 = vor.u32 1.1754944e-38, %v1363_v32  ;;  %v1341_v21 = vmul.f32 %v4791_v6, %v1340_v28  ;;  %v5815_v40 = vld [vmem:[#allocation52_spill] sm:$0xff]  ;;  %v5817_v27 = vld [vmem:[#allocation17_spill] sm:$0xff] }
 0x28c   : > { %v1360_v29 = vsel %vm1359_vm14, %v4858_v7, %v1356_v51  ;;  %v4942_v10 = vmul.f32 %v1309_v36, %v4608_v3  ;;  %vm1362_vm15 = vcmp.eq.f32.partialorder %v1361_v41, 8.507059e+37  ;;  %vm1344_vm0 = vweird.f32 %v4791_v6  ;;  %v5818_v41 = vld [vmem:[#allocation53_spill] sm:$0xff]  ;;  %v5820_v36 = vld [vmem:[#allocation38_spill] sm:$0xff] }
 0x28d   : > { %5797 = vst [vmem:[#allocation76_spill] sm:$0xff] %v4929_v1  ;;  %v1347_v14 = vand.u32 2147483647, %v4707_v45  ;;  %v1349_v22 = vand.u32 2147483648, %v4707_v45  ;;  %v1979_v9 = vmul.f32 %v4903_v53, %v4039_v47  ;;  %v1365_v49 = vsel %vm1362_vm15, %v1364_v5, %v1360_v29 }
 0x28e   : > { %v1342_v38 = vadd.f32 %v4791_v6, %v1341_v21  ;;  %vm1343_vm1 = vweird.f32 %v4707_v45  ;;  %v1975_v3 = vmul.f32 %v4903_v53, %v3686_v50  ;;  %v4955_v7 = vmul.f32 %v1365_v49, %v4700_v60  ;;  %v5821_v21 = vld [vmem:[#allocation55_spill] sm:$0xff] }
 0x28f   : > { %vm1345_vm2 = vmor %vm1343_vm1, %vm1344_vm0  ;;  %v1350_v46 = vor.u32 1.1754944e-38, %v1349_v22  ;;  %vm1348_vm3 = vcmp.eq.f32.partialorder %v1347_v14, 8.507059e+37  ;;  %vm5799_vm5 = vcmp.ge.s32.totalorder %v4296_v25, %v4180_v8  ;;  %v1982_v60 = vmul.f32 %v4903_v53, %v4054_v34  ;;  %v5823_v14 = vld [vmem:[#allocation41_spill] sm:$0xff] }
 0x290   : > { %v1346_v26 = vsel %vm1345_vm2, %v4791_v6, %v1342_v38  ;;  %v1978_v45 = vmul.f32 %v4903_v53, %v3904_v20  ;;  %vm5801_vm6 = vcmp.ge.s32.totalorder %v4322_v61, %v4180_v8  ;;  %v1981_v34 = vmul.f32 %v4903_v53, %v4061_v43  ;;  %v5802_v20 = vld [vmem:[#allocation49_spill] sm:$0xff]  ;;  %v5807_v43 = vld [vmem:[#allocation43_spill] sm:$0xff]  ;;  %v5825_v38 = vld [vmem:[#allocation42_spill] sm:$0xff] }
 0x291   : > { %v1351_v50 = vsel %vm1348_vm3, %v1350_v46, %v1346_v26  ;;  %vm5803_vm7 = vcmp.ge.s32.totalorder %v5802_v20, %v4180_v8  ;;  %v1988_v15 = vmul.f32 %v4903_v53, %v5804_v17  ;;  %vm5806_vm8 = vcmp.ge.s32.totalorder %v4362_v52, %v4180_v8 }
 0x292   : > { %v4957_v13 = vpop.f32.mrf.mxu3  ;;  %2017 = vrot.lane.b32.xlu1 %v1979_v9, %s3456_s18  ;;  %v4967_v47 = vmul.f32 %v1351_v50, %v4651_v23  ;;  %v1985_v23 = vmul.f32 %v4903_v53, %v4089_v58  ;;  %v1984_v58 = vmul.f32 %v4903_v53, %v5805_v24  ;;  %v1987_v35 = vmul.f32 %v4903_v53, %v5807_v43  ;;  %v5053_v9 = vpop.f32.mrf.mxu1  ;;  %v5828_v43 = vld [vmem:[#allocation21_spill] sm:$0xff] }
 0x293   : > { %2009 = vrot.lane.b32.xlu2 %v1975_v3, %s3456_s18  ;;  %2946 = vmatmul.msk.f32.gmra.mxu2 %vm5799_vm5, %v4957_v13  ;;  %vm5810_vm4 = vcmp.ge.s32.totalorder %v5809_v33, %v4180_v8  ;;  %vm5812_vm10 = vcmp.ge.s32.totalorder %v5811_v19, %v4180_v8  ;;  %vm5814_vm12 = vcmp.ge.s32.totalorder %v5813_v4, %v4180_v8  ;;  %vm5826_vm1 = vcmask 523264  }
 0x294   : > { %5800 = vst [vmem:[#allocation77_spill] sm:$0xff] %v4967_v47  ;;  %v913_v44 = vsel %vm5810_vm4, %v5808_v63, 0.0  ;;  %v5024_v51 = vadd.f32 %v1049_v48, %v984_v18  ;;  %vm5816_vm13 = vcmp.ge.s32.totalorder %v5815_v40, %v4180_v8  ;;  %v1977_v32 = vmul.f32 %v4903_v53, %v5817_v27  ;;  %vm5824_vm0 = vmmov %vm5810_vm4  ;;  %v5831_v27 = vld [vmem:[#allocation23_spill] sm:$0xff] }
 0x295   : > { %vm5819_vm14 = vcmp.ge.s32.totalorder %v5818_v41, %v4180_v8  ;;  %v1980_v29 = vmul.f32 %v4903_v53, %v5820_v36  ;;  %vm5822_vm15 = vcmp.ge.s32.totalorder %v5821_v21, %v4180_v8  ;;  %v1983_v22 = vmul.f32 %v4903_v53, %v5823_v14  ;;  %vm5827_vm2 = vmmov %vm5826_vm1  ;;  %v5832_v14 = vld [vmem:[#allocation25_spill] sm:$0xff]  ;;  %v5845_v47 = vld [vmem:[#allocation31_spill] sm:$0xff] }
 0x296   : > { %v1986_v3 = vmul.f32 %v4903_v53, %v5825_v38  ;;  %vm2511_vm3 = vcmask 1048064   ;;  %vm5829_vm5 = vmmov %vm5826_vm1 }
 0x297   : > { %vm5838_vm4 = vmmov %vm5826_vm1 }
 0x29a   : > { %v4973_v12 = vpop.f32.mrf.mxu3  ;;  %2023 = vrot.lane.b32.xlu1 %v1982_v60, %s3456_s18  ;;  %v5064_v46 = vpop.f32.mrf.mxu1 }
 0x29b   : > { %2015 = vrot.lane.b32.xlu2 %v1978_v45, %s3456_s18  ;;  %2947 = vmatmul.msk.f32.gmra.mxu2 %vm5801_vm6, %v4973_v12  ;;  %vm5830_vm6 = vmmov %vm5826_vm1 }
 0x2a2   : > { %v4985_v6 = vpop.f32.mrf.mxu3  ;;  %2029 = vrot.lane.b32.xlu1 %v1985_v23, %s3456_s18  ;;  %v5068_v45 = vpop.f32.mrf.mxu1 }
 0x2a3   : > { %2021 = vrot.lane.b32.xlu2 %v1981_v34, %s3456_s18  ;;  %2948 = vmatmul.msk.f32.gmra.mxu2 %vm5803_vm7, %v4985_v6  ;;  %vm5833_vm7 = vmmov %vm5826_vm1 }
 0x2aa   : > { %v4997_v57 = vpop.f32.mrf.mxu3  ;;  %2035 = vrot.lane.b32.xlu1 %v1988_v15, %s3456_s18  ;;  %v5076_v24 = vpop.f32.mrf.mxu1 }
 0x2ab   : > { %2027 = vrot.lane.b32.xlu2 %v1984_v58, %s3456_s18  ;;  %2949 = vmatmul.msk.f32.gmra.mxu2 %vm5806_vm8, %v4997_v57  ;;  %vm5835_vm8 = vmmov %vm5826_vm1 }
 0x2b2   : > { %v5011_v54 = vpop.f32.mrf.mxu3 }
 0x2b3   : > { %2033 = vrot.lane.b32.xlu2 %v1987_v35, %s3456_s18  ;;  %2950 = vmatmul.msk.f32.gmra.mxu2 %vm5812_vm10, %v5011_v54  ;;  %v2513_v35 = vsel %vm2511_vm3, %v5828_v43, 0.0  ;;  %vm5840_vm10 = vmmov %vm5826_vm1 }
 0x2b4   : > { %1150 = vadd.xlane.f32.xlu0 %v913_v44 }
 0x2ba   : > { %v5018_v37 = vpop.f32.mrf.mxu3 }
 0x2bb   : > { %2951 = vmatmul.msk.f32.gmra.mxu2 %vm5814_vm12, %v5018_v37 }
 0x2c2   : > { %v5026_v28 = vpop.f32.mrf.mxu3 }
 0x2c3   : > { %2952 = vmatmul.msk.f32.gmra.mxu2 %vm5816_vm13, %v5026_v28  ;;  %vm5846_vm13 = vmmov %vm5826_vm1 }
 0x2c8   : > { %2013 = vrot.lane.b32.xlu0 %v1977_v32, %s3456_s18  ;;  %v2512_v32 = vsel %vm2511_vm3, %v5831_v27, 0.0 }
 0x2c9   : > { %v2514_v36 = vadd.f32 %v2513_v35, %v2512_v32  ;;  %v5836_v35 = vld [vmem:[#allocation28_spill] sm:$0xff] }
 0x2ca   : > { %v5035_v55 = vpop.f32.mrf.mxu3 }
 0x2cb   : > { %2953 = vmatmul.msk.f32.gmra.mxu2 %vm5819_vm14, %v5035_v55  ;;  %vm5849_vm14 = vmmov %vm5826_vm1 }
 0x2d0   : > { %2019 = vrot.lane.b32.xlu0 %v1980_v29, %s3456_s18  ;;  %v5086_v29 = vpop.f32.mrf.mxu1 }
 0x2d2   : > { %v5044_v5 = vpop.f32.mrf.mxu3 }
 0x2d3   : > { %2954 = vmatmul.msk.f32.gmra.mxu2 %vm5822_vm15, %v5044_v5  ;;  %vm5851_vm15 = vcmp.ge.s32.totalorder %v4322_v61, %v4180_v8 }
 0x2d8   : > { %2025 = vrot.lane.b32.xlu0 %v1983_v22, %s3456_s18  ;;  %v2515_v22 = vsel %vm2511_vm3, %v5832_v14, 0.0 }
 0x2d9   : > { %v2516_v38 = vadd.f32 %v2515_v22, %v2514_v36  ;;  %v5100_v36 = vpop.f32.mrf.mxu1 }
 0x2da   : > { %v5055_v49 = vpop.f32.mrf.mxu3 }
 0x2db   : > { %2955 = vmatmul.msk.f32.gmra.mxu2 %vm5824_vm0, %v5055_v49  ;;  %vm5856_vm0 = vcmp.ge.s32.totalorder %v5811_v19, %v4180_v8 }
 0x2dc   : > { %v1757_v61 = vsel %vm5856_vm0, %v5011_v54, 0.0  ;;  %vm5870_vm0 = vcmp.ge.s32.totalorder %v5821_v21, %v4180_v8 }
 0x2e0   : > { %2031 = vrot.lane.b32.xlu0 %v1986_v3, %s3456_s18 }
 0x2e5   : > { %v2006_v26 = vpop.permute.xlu2 %2005 }
 0x2e6   : > { %v5066_v50 = vpop.f32.mrf.mxu2 }
 0x2ed   : > { %v2010_v60 = vpop.permute.xlu2 %2009 }
 0x2ee   : > { %v5070_v23 = vpop.f32.mrf.mxu2  ;;  %v2059_v34 = vsel %vm5826_vm1, %v2010_v60, 0.0 }
 0x2ef   : > { %2060 = vadd.xlane.f32.xlu1 %v2059_v34 }
 0x2f5   : > { %v2016_v17 = vpop.permute.xlu2 %2015 }
 0x2f6   : > { %v5073_v15 = vpop.f32.mrf.mxu2  ;;  %v2068_v53 = vsel %vm5827_vm2, %v2016_v17, 0.0  ;;  %vm5859_vm2 = vcmp.ge.s32.totalorder %v5818_v41, %v4180_v8 }
 0x2f7   : > { %2069 = vadd.xlane.f32.xlu1 %v2068_v53  ;;  %v5834_v53 = vld [vmem:[#allocation26_spill] sm:$0xff]  ;;  %v1760_v54 = vsel %vm5859_vm2, %v5035_v55, 0.0  ;;  %vm5875_vm2 = vcmp.ge.s32.totalorder %v4296_v25, %v4180_v8 }
 0x2fc   : > { %v2008_v58 = vpop.permute.xlu0 %2007  ;;  %v2012_v60 = vpop.permute.xlu1 %2011 }
 0x2fd   : > { %v2022_v63 = vpop.permute.xlu2 %2021  ;;  %v2056_v44 = vsel %vm5829_vm5, %v2008_v58, 0.0  ;;  %v2517_v58 = vsel %vm2511_vm3, %v5834_v53, 0.0 }
 0x2fe   : > { %v5081_v18 = vpop.f32.mrf.mxu2  ;;  %2057 = vadd.xlane.f32.xlu2 %v2056_v44  ;;  %v2077_v48 = vsel %vm5830_vm6, %v2022_v63, 0.0  ;;  %v2518_v43 = vadd.f32 %v2517_v58, %v2516_v38  ;;  %v2053_v63 = vsel %vm5835_vm8, %v2006_v26, 0.0  ;;  %v2519_v44 = vsel %vm2511_vm3, %v5836_v35, 0.0  ;;  %v5841_v35 = vld [vmem:[#allocation33_spill] sm:$0xff] }
 0x2ff   : > { %2078 = vadd.xlane.f32.xlu1 %v2077_v48  ;;  %v5837_v48 = vld [vmem:[#allocation32_spill] sm:$0xff]  ;;  %v2062_v58 = vsel %vm5840_vm10, %v2012_v60, 0.0  ;;  %vm5864_vm10 = vcmp.ge.s32.totalorder %v4273_v31, %v4180_v8 }
 0x300   : > { %v2521_v27 = vsel %vm2511_vm3, %v5837_v48, 0.0  ;;  %v2520_v32 = vadd.f32 %v2519_v44, %v2518_v43  ;;  %v2525_v43 = vsel %vm2511_vm3, %v5841_v35, 0.0  ;;  %v1936_v48 = vpop.f32.mrf.mxu1 }
 0x302   : > { %v2522_v22 = vadd.f32 %v2521_v27, %v2520_v32  ;;  %v5842_v27 = vld [vmem:[#allocation74_spill] sm:$0xff] }
 0x303   : > { %v5843_v32 = vld [vmem:[#allocation46_spill] sm:$0xff] }
 0x304   : > { %v2018_v38 = vpop.permute.xlu1 %2017  ;;  %vm5844_vm12 = vcmp.ge.s32.totalorder %v5843_v32, %v4180_v8 }
 0x305   : > { %v2028_v3 = vpop.permute.xlu2 %2027  ;;  %v2071_v60 = vsel %vm5846_vm13, %v2018_v38, 0.0  ;;  %vm5866_vm13 = vcmp.ge.s32.totalorder %v5802_v20, %v4180_v8  ;;  %v5871_v20 = vld [vmem:[#allocation73_spill] sm:$0xff] }
 0x306   : > { %v5090_v34 = vpop.f32.mrf.mxu2  ;;  %v2086_v17 = vsel %vm5833_vm7, %v2028_v3, 0.0  ;;  %vm5863_vm7 = vmmov %vm5826_vm1 }
 0x307   : > { %2087 = vadd.xlane.f32.xlu1 %v2086_v17  ;;  %v5839_v17 = vld [vmem:[#allocation30_spill] sm:$0xff] }
 0x308   : > { %v2523_v26 = vsel %vm2511_vm3, %v5839_v17, 0.0  ;;  %v2527_v17 = vsel %vm2511_vm3, %v5845_v47, 0.0 }
 0x30a   : > { %2054 = vadd.xlane.f32.xlu0 %v2053_v63  ;;  %v2524_v63 = vadd.f32 %v2523_v26, %v2522_v22 }
 0x30c   : > { %v2526_v44 = vadd.f32 %v2525_v43, %v2524_v63  ;;  %v2024_v26 = vpop.permute.xlu1 %2023  ;;  %v1751_v43 = vsel %vm724_vm11, %v4876_v59, 0.0  ;;  %v5852_v59 = vld [vmem:[#allocation68_spill] sm:$0xff]  ;;  %vm5854_vm11 = vmmov %vm5826_vm1 }
 0x30d   : > { %v2034_v14 = vpop.permute.xlu2 %2033  ;;  %v2080_v47 = vsel %vm5849_vm14, %v2024_v26, 0.0  ;;  %vm5867_vm14 = vmmov %vm5826_vm1 }
 0x30e   : > { %v5102_v3 = vpop.f32.mrf.mxu2  ;;  %v2095_v53 = vsel %vm5838_vm4, %v2034_v14, 0.0  ;;  %v1748_v14 = vsel %vm5844_vm12, %v5842_v27, 0.0  ;;  %v2528_v22 = vadd.f32 %v2527_v17, %v2526_v44  ;;  %v5850_v27 = vld [vmem:[#allocation24_spill] sm:$0xff]  ;;  %vm5865_vm12 = vmmov %vm5826_vm1 }
 0x30f   : > { %2096 = vadd.xlane.f32.xlu1 %v2095_v53  ;;  %v2533_v32 = vsel %vm2511_vm3, %v5850_v27, 0.0 }
 0x312   : > { %2063 = vadd.xlane.f32.xlu0 %v2062_v58  ;;  %v5847_v58 = vld [vmem:[#allocation29_spill] sm:$0xff] }
 0x313   : > { %v2529_v63 = vsel %vm2511_vm3, %v5847_v58, 0.0 }
 0x314   : > { %v2530_v35 = vadd.f32 %v2529_v63, %v2528_v22  ;;  %v2030_v44 = vpop.permute.xlu1 %2029  ;;  %v5853_v22 = vld [vmem:[#allocation22_spill] sm:$0xff] }
 0x315   : > { %v2535_v58 = vsel %vm2511_vm3, %v5853_v22, 0.0  ;;  %v2089_v26 = vsel %vm5854_vm11, %v2030_v44, 0.0  ;;  %vm5869_vm11 = vmmov %vm5826_vm1 }
 0x316   : > { %v1871_v1 = vpop.f32.mrf.mxu2 }
 0x317   : > { %v5114_v53 = vadd.f32 %v1936_v48, %v1871_v1  ;;  %2103 = vadd.xlane.f32.xlu1 %v1748_v14  ;;  %v5848_v1 = vld [vmem:[#allocation27_spill] sm:$0xff]  ;;  %v1754_v14 = vsel %vm5851_vm15, %v4973_v12, 0.0  ;;  %vm5868_vm15 = vcmp.ge.s32.totalorder %v5813_v4, %v4180_v8  ;;  %v1750_v4 = vsel %vm723_vm9, %v4807_v2, 0.0 }
 0x318   : > { %v2531_v48 = vsel %vm2511_vm3, %v5848_v1, 0.0  ;;  %vm5877_vm9 = vcmp.ge.s32.totalorder %v5815_v40, %v4180_v8 }
 0x319   : > { %v2532_v38 = vadd.f32 %v2531_v48, %v2530_v35  ;;  %v1759_v2 = vsel %vm5877_vm9, %v5026_v28, 0.0 }
 0x31a   : > { %2072 = vadd.xlane.f32.xlu0 %v2071_v60 }
 0x31b   : > { %v2534_v17 = vadd.f32 %v2533_v32, %v2532_v38 }
 0x31c   : > { %v2036_v48 = vpop.permute.xlu1 %2035 }
 0x31d   : > { %v2536_v35 = vadd.f32 %v2535_v58, %v2534_v17  ;;  %v2098_v44 = vsel %vm5826_vm1, %v2036_v48, 0.0  ;;  %v5858_v17 = vld [vmem:[#allocation18_spill] sm:$0xff] }
 0x31f   : > { %2109 = vadd.xlane.f32.xlu1 %v1751_v43  ;;  %v5855_v43 = vld [vmem:[#allocation19_spill] sm:$0xff] }
 0x320   : > { %v2537_v1 = vsel %vm2511_vm3, %v5855_v43, 0.0 }
 0x321   : > { %v2538_v12 = vadd.f32 %v2537_v1, %v2536_v35  ;;  %v5861_v35 = vld [vmem:[#allocation47_spill] sm:$0xff] }
 0x322   : > { %2081 = vadd.xlane.f32.xlu0 %v2080_v47  ;;  %v5857_v47 = vld [vmem:[#allocation20_spill] sm:$0xff]  ;;  %vm5862_vm6 = vcmp.ge.s32.totalorder %v5861_v35, %v4180_v8 }
 0x323   : > { %v2539_v38 = vsel %vm2511_vm3, %v5857_v47, 0.0 }
 0x324   : > { %v2540_v32 = vadd.f32 %v2539_v38, %v2538_v12 }
 0x327   : > { %2115 = vadd.xlane.f32.xlu1 %v1754_v14  ;;  %v1151_v16 = vpop.xlane.xlu0 %1150 }
 0x328   : > { %v1167_v60 = vadd.f32 %v1151_v16, %v5852_v59  ;;  %v2541_v16 = vsel %vm2511_vm3, %v5858_v17, 0.0 }
 0x329   : > { %v2542_v19 = vadd.f32 %v2541_v16, %v2540_v32  ;;  %v1752_v32 = vsel %vm5864_vm10, %v4920_v0, 0.0  ;;  %v1758_v0 = vsel %vm5868_vm15, %v5018_v37, 0.0  ;;  %vm5881_vm15 = vcmask 516096  }
 0x32a   : > { %v1183_v63 = vadd.f32 1e-06, %v1167_v60  ;;  %2090 = vadd.xlane.f32.xlu0 %v2089_v26  ;;  %v5860_v26 = vld [vmem:[#allocation75_spill] sm:$0xff] }
 0x32b   : > { %v1749_v43 = vsel %vm5862_vm6, %v5860_v26, 0.0  ;;  %v2543_v48 = vrot.slane %v2542_v19, 4  ;;  %vm5878_vm6 = vcmp.ge.s32.totalorder %v5809_v33, %v4180_v8 }
 0x32c   : > { %3236 = vrcp.f32 %v1183_v63  ;;  %v1405_v60 = vand.u32 2147483648, %v1183_v63  ;;  %v1403_v58 = vand.u32 2147483647, %v1183_v63  ;;  %vm1399_vm3 = vweird.f32 %v1183_v63 }
 0x32d   : > { %v2544_v38 = vadd.f32 %v2543_v48, %v2542_v19 }
 0x32e   : > { %v1406_v55 = vor.u32 1.1754944e-38, %v1405_v60  ;;  %vm1404_vm4 = vcmp.eq.f32.partialorder %v1403_v58, 8.507059e+37 }
 0x32f   : > { %2121 = vadd.xlane.f32.xlu1 %v1757_v61 }
 0x332   : > { %v3237_v27 = vpop.eup %3236  ;;  %2099 = vadd.xlane.f32.xlu0 %v2098_v44 }
 0x333   : > { %v1395_v14 = vmul.f32 %v3237_v27, %v1183_v63  ;;  %vm1400_vm5 = vweird.f32 %v3237_v27  ;;  %v2545_v63 = vrot.slane %v2544_v38, 2 }
 0x334   : > { %vm1401_vm8 = vmor %vm1399_vm3, %vm1400_vm5  ;;  %vm5876_vm5 = vcmp.ge.s32.totalorder %v4362_v52, %v4180_v8 }
 0x335   : > { %v1396_v59 = vsub.f32 1.0, %v1395_v14  ;;  %v2546_v16 = vadd.f32 %v2545_v63, %v2544_v38  ;;  %v5221_v63 = vpop.f32.mrf.mxu2 }
 0x337   : > { %2127 = vadd.xlane.f32.xlu1 %v1760_v54  ;;  %v1397_v22 = vmul.f32 %v3237_v27, %v1396_v59  ;;  %v2547_v59 = vrot.slane %v2546_v16, 1 }
 0x339   : > { %v1398_v61 = vadd.f32 %v3237_v27, %v1397_v22  ;;  %v2548_v31 = vadd.f32 %v2547_v59, %v2546_v16  ;;  %v5872_v22 = vld [vmem:[#allocation45_spill] sm:$0xff]  ;;  %v1922_v16 = vadd.f32 %v5064_v46, %v5070_v23  ;;  %v1939_v46 = vpop.f32.mrf.mxu1 }
 0x33a   : > { %2105 = vadd.xlane.f32.xlu0 %v1749_v43  ;;  %v2014_v1 = vpop.permute.xlu0 %2013  ;;  %vm5873_vm1 = vcmp.ge.s32.totalorder %v5872_v22, %v4180_v8  ;;  %v1756_v43 = vsel %vm5876_vm5, %v4997_v57, 0.0 }
 0x33b   : > { %v2065_v12 = vsel %vm5863_vm7, %v2014_v1, 0.0  ;;  %v1402_v41 = vsel %vm1401_vm8, %v3237_v27, %v1398_v61  ;;  %v1755_v27 = vsel %vm5866_vm13, %v4985_v6, 0.0  ;;  %v1761_v6 = vsel %vm5870_vm0, %v5044_v5, 0.0 }
 0x33c   : > { %2066 = vadd.xlane.f32.xlu2 %v2065_v12  ;;  %v1407_v47 = vsel %vm1404_vm4, %v1406_v55, %v1402_v41  ;;  %v1747_v58 = vsel %vm5873_vm1, %v5871_v20, 0.0  ;;  %v1753_v5 = vsel %vm5875_vm2, %v4957_v13, 0.0  ;;  %v1762_v13 = vsel %vm5878_vm6, %v5055_v49, 0.0 }
 0x33d   : > { %v5159_v44 = vmul.f32 %v1407_v47, %v5024_v51 }
 0x342   : > { %2111 = vadd.xlane.f32.xlu0 %v1752_v32  ;;  %v2020_v14 = vpop.permute.xlu0 %2019 }
 0x343   : > { %v2074_v17 = vsel %vm5865_vm12, %v2020_v14, 0.0 }
 0x344   : > { %2075 = vadd.xlane.f32.xlu2 %v2074_v17 }
 0x34a   : > { %2117 = vadd.xlane.f32.xlu0 %v1755_v27  ;;  %v2026_v51 = vpop.permute.xlu0 %2025 }
 0x34b   : > { %v2083_v54 = vsel %vm5867_vm14, %v2026_v51, 0.0 }
 0x34c   : > { %2084 = vadd.xlane.f32.xlu2 %v2083_v54  ;;  %v5228_v54 = vpop.f32.mrf.mxu2 }
 0x350   : > { %2550 = vrot.lane.b32.xlu1 %v2548_v31, %s3456_s18 }
 0x352   : > { %2123 = vadd.xlane.f32.xlu0 %v1758_v0  ;;  %v2032_v19 = vpop.permute.xlu0 %2031 }
 0x353   : > { %v2092_v60 = vsel %vm5869_vm11, %v2032_v19, 0.0 }
 0x354   : > { %2093 = vadd.xlane.f32.xlu2 %v2092_v60  ;;  %v5232_v60 = vpop.f32.mrf.mxu2 }
 0x35a   : > { %2129 = vadd.xlane.f32.xlu0 %v1761_v6 }
 0x35c   : > { %2101 = vadd.xlane.f32.xlu2 %v1747_v58 }
 0x362   : > { %v5185_v26 = vpop.xlane.xlu1 %2060 }
 0x364   : > { %2107 = vadd.xlane.f32.xlu2 %v1750_v4 }
 0x36a   : > { %v5191_v35 = vpop.xlane.xlu1 %2069 }
 0x36c   : > { %2113 = vadd.xlane.f32.xlu2 %v1753_v5  ;;  %v5236_v5 = vpop.f32.mrf.mxu2 }
 0x371   : > { %v2058_v57 = vpop.xlane.xlu2 %2057 }
 0x372   : > { %v5197_v21 = vpop.xlane.xlu1 %2078 }
 0x374   : > { %2119 = vadd.xlane.f32.xlu2 %v1756_v43 }
 0x37a   : > { %v5203_v1 = vpop.xlane.xlu1 %2087 }
 0x37c   : > { %2125 = vadd.xlane.f32.xlu2 %v1759_v2 }
 0x37d   : > { %v5209_v48 = vpop.xlane.xlu0 %2054 }
 0x382   : > { %v5211_v25 = vpop.xlane.xlu1 %2096 }
 0x384   : > { %2131 = vadd.xlane.f32.xlu2 %v1762_v13 }
 0x385   : > { %v5217_v52 = vpop.xlane.xlu0 %2063 }
 0x38a   : > { %v2104_v61 = vpop.xlane.xlu1 %2103 }
 0x38b   : > { %v2134_v12 = vadd.f32 %v2104_v61, %v2058_v57  ;;  %v5238_v61 = vpop.f32.mrf.mxu1 }
 0x38d   : > { %v2150_v55 = vadd.f32 1e-06, %v2134_v12  ;;  %v5219_v40 = vpop.xlane.xlu0 %2072 }
 0x38f   : > { %3238 = vrcp.f32 %v2150_v55  ;;  %v2190_v38 = vand.u32 2147483648, %v2150_v55  ;;  %v2188_v14 = vand.u32 2147483647, %v2150_v55  ;;  %vm2184_vm7 = vweird.f32 %v2150_v55 }
 0x391   : > { %v2191_v17 = vor.u32 1.1754944e-38, %v2190_v38  ;;  %vm2189_vm4 = vcmp.eq.f32.partialorder %v2188_v14, 8.507059e+37 }
 0x392   : > { %v2110_v8 = vpop.xlane.xlu1 %2109 }
 0x395   : > { %v3239_v28 = vpop.eup %3238  ;;  %v5223_v49 = vpop.xlane.xlu0 %2081 }
 0x396   : > { %v2180_v41 = vmul.f32 %v3239_v28, %v2150_v55  ;;  %vm2185_vm3 = vweird.f32 %v3239_v28 }
 0x397   : > { %vm2186_vm8 = vmor %vm2184_vm7, %vm2185_vm3 }
 0x398   : > { %v2181_v47 = vsub.f32 1.0, %v2180_v41 }
 0x39a   : > { %v2182_v32 = vmul.f32 %v3239_v28, %v2181_v47  ;;  %v2116_v31 = vpop.xlane.xlu1 %2115 }
 0x39c   : > { %v2183_v33 = vadd.f32 %v3239_v28, %v2182_v32  ;;  %v2510_v32 = vld [vmem:[#allocation3 + $0x1] sm:$0x1] }
 0x39d   : > { %v5230_v0 = vpop.xlane.xlu0 %2090 }
 0x39e   : > { %v2187_v27 = vsel %vm2186_vm8, %v3239_v28, %v2183_v33  ;;  %v5879_v33 = vld [vmem:[#allocation34_spill] sm:$0xff] }
 0x39f   : > { %v2192_v51 = vsel %vm2189_vm4, %v2191_v17, %v2187_v27  ;;  %v5880_v17 = vld [vmem:[#allocation70_spill] sm:$0xff]  ;;  %v1931_v27 = vadd.f32 %v5086_v29, %v5090_v34 }
 0x3a0   : > { %v2390_v59 = vmul.f32 %v2192_v51, %v1922_v16  ;;  %v1153_v16 = vadd.f32 %v5880_v17, %v5879_v33 }
 0x3a2   : > { %2573 = vrot.lane.b32.xlu2 %v2390_v59, %s3456_s18  ;;  %v2122_v6 = vpop.xlane.xlu1 %2121  ;;  %v5251_v34 = vadd.f32 1e-06, %v1153_v16 }
 0x3a5   : > { %v5234_v22 = vpop.xlane.xlu0 %2099 }
 0x3aa   : > { %v2128_v43 = vpop.xlane.xlu1 %2127 }
 0x3ad   : > { %v2106_v13 = vpop.xlane.xlu0 %2105 }
 0x3af   : > { %v2067_v19 = vpop.xlane.xlu2 %2066 }
 0x3b0   : > { %v2137_v20 = vadd.f32 %v2110_v8, %v2067_v19 }
 0x3b2   : > { %v2153_v58 = vadd.f32 1e-06, %v2137_v20 }
 0x3b4   : > { %3240 = vrcp.f32 %v2153_v58  ;;  %v2232_v55 = vand.u32 2147483648, %v2153_v58  ;;  %v2230_v47 = vand.u32 2147483647, %v2153_v58  ;;  %vm2226_vm12 = vweird.f32 %v2153_v58 }
 0x3b6   : > { %vm2231_vm14 = vcmp.eq.f32.partialorder %v2230_v47, 8.507059e+37 }
 0x3b7   : > { %v2076_v23 = vpop.xlane.xlu2 %2075 }
 0x3b8   : > { %v2140_v37 = vadd.f32 %v2116_v31, %v2076_v23  ;;  %v2233_v31 = vor.u32 1.1754944e-38, %v2232_v55  ;;  %v5253_v55 = vpop.f32.mrf.mxu1 }
 0x3ba   : > { %v3241_v4 = vpop.eup %3240  ;;  %v2156_v2 = vadd.f32 1e-06, %v2140_v37  ;;  %v2135_v37 = vadd.f32 %v2106_v13, %v5185_v26 }
 0x3bb   : > { %v2222_v57 = vmul.f32 %v3241_v4, %v2153_v58  ;;  %vm2227_vm10 = vweird.f32 %v3241_v4 }
 0x3bc   : > { %3242 = vrcp.f32 %v2156_v2  ;;  %vm2228_vm13 = vmor %vm2226_vm12, %vm2227_vm10  ;;  %v2272_v47 = vand.u32 2147483647, %v2156_v2  ;;  %vm2268_vm0 = vweird.f32 %v2156_v2 }
 0x3bd   : > { %v2223_v12 = vsub.f32 1.0, %v2222_v57  ;;  %v2112_v57 = vpop.xlane.xlu0 %2111 }
 0x3be   : > { %v2138_v16 = vadd.f32 %v2112_v57, %v5191_v35  ;;  %vm2273_vm2 = vcmp.eq.f32.partialorder %v2272_v47, 8.507059e+37 }
 0x3bf   : > { %v2085_v28 = vpop.xlane.xlu2 %2084  ;;  %v2224_v41 = vmul.f32 %v3241_v4, %v2223_v12 }
 0x3c0   : > { %v2143_v38 = vadd.f32 %v2122_v6, %v2085_v28  ;;  %v5246_v6 = vpop.f32.mrf.mxu2  ;;  %v2274_v28 = vand.u32 2147483648, %v2156_v2  ;;  %v1948_v57 = vpop.f32.mrf.mxu1 }
 0x3c1   : > { %v2225_v14 = vadd.f32 %v3241_v4, %v2224_v41 }
 0x3c2   : > { %v3243_v8 = vpop.eup %3242  ;;  %v5244_v51 = vadd.f32 1e-06, %v2143_v38  ;;  %v2551_v59 = vpop.permute.xlu1 %2550  ;;  %v2275_v17 = vor.u32 1.1754944e-38, %v2274_v28  ;;  %v1949_v28 = vadd.f32 %v1948_v57, %v5236_v5 }
 0x3c3   : > { %v2264_v19 = vmul.f32 %v3243_v8, %v2156_v2  ;;  %v2553_v20 = vadd.f32 %v2551_v59, %v2510_v32  ;;  %v2229_v23 = vsel %vm2228_vm13, %v3241_v4, %v2225_v14  ;;  %vm2269_vm11 = vweird.f32 %v3243_v8 }
 0x3c4   : > { %3244 = vrcp.f32 %v5244_v51  ;;  %v2234_v58 = vsel %vm2231_vm14, %v2233_v31, %v2229_v23  ;;  %v5256_v32 = vadd.f32 1e-06, %v2135_v37  ;;  %v1940_v14 = vadd.f32 %v1939_v46, %v5221_v63  ;;  %vm2270_vm1 = vmor %vm2268_vm0, %vm2269_vm11 }
 0x3c5   : > { %v2265_v12 = vsub.f32 1.0, %v2264_v19  ;;  %2554 = vst.msk [vmem:[#allocation3 + $0x1] sm:$0x1] %vm5881_vm15, %v2553_v20  ;;  %v2393_v29 = vmul.f32 %v2234_v58, %v1931_v27  ;;  %3246 = vrcp.f32 %v5251_v34  ;;  %v2316_v63 = vand.u32 2147483648, %v5244_v51  ;;  %v2118_v20 = vpop.xlane.xlu0 %2117 }
 0x3c6   : > { %v5269_v46 = vadd.f32 1e-06, %v2138_v16  ;;  %vm2310_vm9 = vweird.f32 %v5244_v51  ;;  %vm2198_vm0 = vweird.f32 %v5256_v32 }
 0x3c7   : > { %2579 = vrot.lane.b32.xlu2 %v2393_v29, %s3456_s18  ;;  %v2094_v4 = vpop.xlane.xlu2 %2093  ;;  %v2266_v41 = vmul.f32 %v3243_v8, %v2265_v12 }
 0x3c8   : > { %v2146_v38 = vadd.f32 %v2128_v43, %v2094_v4  ;;  %v5266_v19 = vpop.f32.mrf.mxu2 }
 0x3c9   : > { %v2267_v26 = vadd.f32 %v3243_v8, %v2266_v41  ;;  %v2317_v41 = vor.u32 1.1754944e-38, %v2316_v63 }
 0x3ca   : > { %v3245_v13 = vpop.eup %3244  ;;  %v5260_v33 = vadd.f32 1e-06, %v2146_v38 }
 0x3cb   : > { %v2306_v27 = vmul.f32 %v3245_v13, %v5244_v51  ;;  %v2271_v59 = vsel %vm2270_vm1, %v3243_v8, %v2267_v26  ;;  %vm2311_vm5 = vweird.f32 %v3245_v13  ;;  %v2314_v8 = vand.u32 2147483647, %v5244_v51  ;;  %v5273_v58 = vpop.eup %3246 }
 0x3cc   : > { %3248 = vrcp.f32 %v5260_v33  ;;  %v2276_v43 = vsel %vm2273_vm2, %v2275_v17, %v2271_v59  ;;  %vm2312_vm6 = vmor %vm2310_vm9, %vm2311_vm5  ;;  %v2141_v51 = vadd.f32 %v2118_v20, %v5197_v21  ;;  %v1199_v5 = vmul.f32 %v5273_v58, %v5251_v34 }
 0x3cd   : > { %3250 = vrcp.f32 %v5256_v32  ;;  %v2307_v2 = vsub.f32 1.0, %v2306_v27  ;;  %v2396_v31 = vmul.f32 %v2276_v43, %v1940_v14  ;;  %vm2315_vm3 = vcmp.eq.f32.partialorder %v2314_v8, 8.507059e+37  ;;  %v5885_v8 = vld [vmem:[#allocation71_spill] sm:$0xff] }
 0x3ce   : > { %3252 = vrcp.f32 %v5269_v46  ;;  %v2358_v27 = vand.u32 2147483648, %v5260_v33  ;;  %v2356_v43 = vand.u32 2147483647, %v5260_v33  ;;  %v5302_v57 = vadd.f32 1e-06, %v2141_v51 }
 0x3cf   : > { %2585 = vrot.lane.b32.xlu2 %v2396_v31, %s3456_s18  ;;  %v2102_v35 = vpop.xlane.xlu2 %2101  ;;  %v2308_v23 = vmul.f32 %v3245_v13, %v2307_v2  ;;  %v5882_v2 = vld [vmem:[#allocation62_spill] sm:$0xff]  ;;  %v5883_v31 = vld [vmem:[#allocation56_spill] sm:$0xff]  ;;  %vm2352_vm8 = vweird.f32 %v5260_v33  ;;  %vm1204_vm1 = vweird.f32 %v5273_v58  ;;  %vm1203_vm5 = vweird.f32 %v5251_v34 }
 0x3d0   : > { %v2133_v37 = vadd.f32 %v2102_v35, %v5209_v48  ;;  %v5295_v21 = vadd.f32 %v5883_v31, %v5882_v2  ;;  %v1892_v63 = vpop.f32.mrf.mxu2  ;;  %vm2357_vm10 = vcmp.eq.f32.partialorder %v2356_v43, 8.507059e+37  ;;  %v1209_v43 = vand.u32 2147483648, %v5251_v34 }
 0x3d1   : > { %v2309_v12 = vadd.f32 %v3245_v13, %v2308_v23  ;;  %v5884_v23 = vld [vmem:[#allocation39_spill] sm:$0xff] }
 0x3d2   : > { %v3249_v29 = vpop.eup %3248  ;;  %v5278_v4 = vadd.f32 1e-06, %v2133_v37  ;;  %v1156_v37 = vadd.f32 %v5885_v8, %v5884_v23 }
 0x3d3   : > { %v5280_v47 = vpop.eup %3250  ;;  %v2348_v38 = vmul.f32 %v3249_v29, %v5260_v33  ;;  %v2313_v26 = vsel %vm2312_vm6, %v3245_v13, %v2309_v12  ;;  %vm2353_vm7 = vweird.f32 %v3249_v29  ;;  %v2124_v12 = vpop.xlane.xlu0 %2123  ;;  %vm2240_vm6 = vweird.f32 %v5269_v46 }
 0x3d4   : > { %3254 = vrcp.f32 %v5278_v4  ;;  %v2318_v48 = vsel %vm2315_vm3, %v2317_v41, %v2313_v26  ;;  %v2194_v16 = vmul.f32 %v5280_v47, %v5256_v32  ;;  %v5298_v35 = vpop.eup %3252  ;;  %v1957_v26 = vpop.f32.mrf.mxu3  ;;  %vm2354_vm4 = vmor %vm2352_vm8, %vm2353_vm7  ;;  %v2174_v8 = vand.u32 2147483647, %v5278_v4 }
 0x3d5   : > { %v2349_v14 = vsub.f32 1.0, %v2348_v38  ;;  %v2399_v17 = vmul.f32 %v2318_v48, %v1949_v28  ;;  %v1200_v38 = vsub.f32 1.0, %v1199_v5  ;;  %v2236_v51 = vmul.f32 %v5298_v35, %v5269_v46 }
 0x3d6   : > { %v2195_v48 = vsub.f32 1.0, %v2194_v16  ;;  %v1207_v5 = vand.u32 2147483647, %v5251_v34  ;;  %v2144_v16 = vadd.f32 %v2124_v12, %v5203_v1  ;;  %v1919_v1 = vadd.f32 %v5053_v9, %v5066_v50 }
 0x3d7   : > { %2591 = vrot.lane.b32.xlu2 %v2399_v17, %s3456_s18  ;;  %v2108_v59 = vpop.xlane.xlu2 %2107  ;;  %v2350_v13 = vmul.f32 %v3249_v29, %v2349_v14  ;;  %v1958_v17 = vadd.f32 %v1957_v26, %v1892_v63  ;;  %v5333_v12 = vadd.f32 %v5076_v24, %v5081_v18  ;;  %vm2170_vm13 = vweird.f32 %v5278_v4 }
 0x3d8   : > { %v2136_v20 = vadd.f32 %v2108_v59, %v5217_v52  ;;  %v2359_v52 = vor.u32 1.1754944e-38, %v2358_v27  ;;  %v5315_v27 = vadd.f32 1e-06, %v1156_v37  ;;  %v2196_v63 = vmul.f32 %v5280_v47, %v2195_v48 }
 0x3d9   : > { %v2351_v28 = vadd.f32 %v3249_v29, %v2350_v13  ;;  %v5329_v37 = vadd.f32 %v5068_v45, %v5073_v15  ;;  %v2237_v48 = vsub.f32 1.0, %v2236_v51  ;;  %vm2199_vm15 = vweird.f32 %v5280_v47 }
 0x3da   : > { %v3255_v41 = vpop.eup %3254  ;;  %v5305_v14 = vadd.f32 1e-06, %v2136_v20  ;;  %v2197_v50 = vadd.f32 %v5280_v47, %v2196_v63  ;;  %vm2175_vm11 = vcmp.eq.f32.partialorder %v2174_v8, 8.507059e+37  ;;  %vm5355_vm2 = vmor %vm2198_vm0, %vm2199_vm15  ;;  %vm2241_vm7 = vweird.f32 %v5298_v35 }
 0x3db   : > { %v2166_v59 = vmul.f32 %v3255_v41, %v5278_v4  ;;  %v2355_v2 = vsel %vm2354_vm4, %v3249_v29, %v2351_v28  ;;  %v2176_v29 = vand.u32 2147483648, %v5278_v4  ;;  %vm2171_vm12 = vweird.f32 %v3255_v41  ;;  %v2130_v15 = vpop.xlane.xlu0 %2129  ;;  %vm5418_vm15 = vmor %vm1203_vm5, %vm1204_vm1 }
 0x3dc   : > { %3256 = vrcp.f32 %v5305_v14  ;;  %v2360_v33 = vsel %vm2357_vm10, %v2359_v52, %v2355_v2  ;;  %v5323_v28 = vmul.f32 %v5273_v58, %v1200_v38  ;;  %v5336_v52 = vadd.f32 1e-06, %v2144_v16  ;;  %vm2172_vm14 = vmor %vm2170_vm13, %vm2171_vm12 }
 0x3dd   : > { %3258 = vrcp.f32 %v5302_v57  ;;  %v2167_v13 = vsub.f32 1.0, %v2166_v59  ;;  %v2402_v31 = vmul.f32 %v2360_v33, %v1958_v17  ;;  %v2177_v9 = vor.u32 1.1754944e-38, %v2176_v29  ;;  %vm5388_vm12 = vmor %vm2240_vm6, %vm2241_vm7 }
 0x3de   : > { %v2202_v2 = vand.u32 2147483647, %v5256_v32  ;;  %v2238_v51 = vmul.f32 %v5298_v35, %v2237_v48  ;;  %v2201_v63 = vsel %vm5355_vm2, %v5280_v47, %v2197_v50  ;;  %vm2212_vm8 = vweird.f32 %v5305_v14 }
 0x3df   : > { %v2168_v20 = vmul.f32 %v3255_v41, %v2167_v13  ;;  %2597 = vrot.lane.b32.xlu2 %v2402_v31, %s3456_s18  ;;  %v2114_v23 = vpop.xlane.xlu2 %2113  ;;  %v2147_v31 = vadd.f32 %v2130_v15, %v5211_v25  ;;  %vm5402_vm13 = vcmp.eq.f32.partialorder %v1207_v5, 8.507059e+37 }
 0x3e0   : > { %v2139_v26 = vadd.f32 %v2114_v23, %v5219_v40  ;;  %v2204_v40 = vand.u32 2147483648, %v5256_v32  ;;  %v2218_v32 = vand.u32 2147483648, %v5305_v14  ;;  %v2216_v23 = vand.u32 2147483647, %v5305_v14 }
 0x3e1   : > { %v2169_v38 = vadd.f32 %v3255_v41, %v2168_v20  ;;  %vm2203_vm3 = vcmp.eq.f32.partialorder %v2202_v2, 8.507059e+37  ;;  %v2244_v2 = vand.u32 2147483647, %v5269_v46 }
 0x3e2   : > { %v3257_v17 = vpop.eup %3256  ;;  %v5339_v59 = vadd.f32 1e-06, %v2139_v26  ;;  %v2205_v8 = vor.u32 1.1754944e-38, %v2204_v40  ;;  %v2239_v26 = vadd.f32 %v5298_v35, %v2238_v51  ;;  %v2219_v15 = vor.u32 1.1754944e-38, %v2218_v32 }
 0x3e3   : > { %v5343_v45 = vpop.eup %3258  ;;  %v2208_v24 = vmul.f32 %v3257_v17, %v5305_v14  ;;  %v2173_v18 = vsel %vm2172_vm14, %v3255_v41, %v2169_v38  ;;  %vm2213_vm9 = vweird.f32 %v3257_v17  ;;  %vm2217_vm10 = vcmp.eq.f32.partialorder %v2216_v23, 8.507059e+37 }
 0x3e4   : > { %3260 = vrcp.f32 %v5339_v59  ;;  %v2178_v4 = vsel %vm2175_vm11, %v2177_v9, %v2173_v18  ;;  %v2278_v13 = vmul.f32 %v5343_v45, %v5302_v57  ;;  %v5374_v9 = vadd.f32 1e-06, %v2147_v31  ;;  %vm2214_vm4 = vmor %vm2212_vm8, %vm2213_vm9 }
 0x3e5   : > { %3262 = vrcp.f32 %v5336_v52  ;;  %v2209_v33 = vsub.f32 1.0, %v2208_v24  ;;  %v2389_v16 = vmul.f32 %v2178_v4, %v1919_v1  ;;  %v2206_v1 = vsel %vm2203_vm3, %v2205_v8, %v2201_v63 }
 0x3e6   : > { %v2279_v38 = vsub.f32 1.0, %v2278_v13  ;;  %v2246_v14 = vand.u32 2147483648, %v5269_v46  ;;  %v1202_v51 = vadd.f32 %v5273_v58, %v5323_v28  ;;  %v2243_v41 = vsel %vm5388_vm12, %v5298_v35, %v2239_v26 }
 0x3e7   : > { %v2210_v29 = vmul.f32 %v3257_v17, %v2209_v33  ;;  %v2120_v20 = vpop.xlane.xlu2 %2119  ;;  %2571 = vrot.lane.b32.xlu0 %v2389_v16, %s3456_s18  ;;  %v2391_v16 = vmul.f32 %v2206_v1, %v5329_v37  ;;  %v2258_v35 = vand.u32 2147483647, %v5339_v59  ;;  %vm2245_vm11 = vcmp.eq.f32.partialorder %v2244_v2, 8.507059e+37  ;;  %v1951_v2 = vpop.f32.mrf.mxu1 }
 0x3e8   : > { %v2142_v25 = vadd.f32 %v2120_v20, %v5223_v49  ;;  %v2280_v46 = vmul.f32 %v5343_v45, %v2279_v38  ;;  %v2247_v5 = vor.u32 1.1754944e-38, %v2246_v14  ;;  %v1210_v20 = vor.u32 1.1754944e-38, %v1209_v43 }
 0x3e9   : > { %v2211_v47 = vadd.f32 %v3257_v17, %v2210_v29  ;;  %v1206_v29 = vsel %vm5418_vm15, %v5273_v58, %v1202_v51  ;;  %vm2254_vm0 = vweird.f32 %v5339_v59  ;;  %vm2283_vm2 = vweird.f32 %v5343_v45 }
 0x3ea   : > { %v3261_v48 = vpop.eup %3260  ;;  %v5376_v50 = vadd.f32 1e-06, %v2142_v25  ;;  %v2248_v8 = vsel %vm2245_vm11, %v2247_v5, %v2243_v41  ;;  %v2281_v26 = vadd.f32 %v5343_v45, %v2280_v46  ;;  %v1934_v58 = vadd.f32 %v5100_v36, %v5102_v3 }
 0x3eb   : > { %v5379_v24 = vpop.eup %3262  ;;  %v2250_v49 = vmul.f32 %v3261_v48, %v5339_v59  ;;  %v2215_v18 = vsel %vm2214_vm4, %v3257_v17, %v2211_v47  ;;  %vm2255_vm14 = vweird.f32 %v3261_v48  ;;  %vm2259_vm5 = vcmp.eq.f32.partialorder %v2258_v35, 8.507059e+37 }
 0x3ec   : > { %3264 = vrcp.f32 %v5376_v50  ;;  %v2220_v40 = vsel %vm2217_vm10, %v2219_v15, %v2215_v18  ;;  %v2320_v28 = vmul.f32 %v5379_v24, %v5336_v52  ;;  %vm2256_vm1 = vmor %vm2254_vm0, %vm2255_vm14  ;;  %vm2282_vm9 = vweird.f32 %v5302_v57 }
 0x3ed   : > { %v2251_v17 = vsub.f32 1.0, %v2250_v49  ;;  %v2392_v33 = vmul.f32 %v2220_v40, %v5333_v12  ;;  %3266 = vrcp.f32 %v5374_v9  ;;  %v2260_v12 = vand.u32 2147483648, %v5339_v59  ;;  %vm5445_vm6 = vmor %vm2282_vm9, %vm2283_vm2 }
 0x3ee   : > { %v2321_v47 = vsub.f32 1.0, %v2320_v28  ;;  %v2288_v15 = vand.u32 2147483648, %v5302_v57  ;;  %v2394_v14 = vmul.f32 %v2248_v8, %v1934_v58  ;;  %v2286_v3 = vand.u32 2147483647, %v5302_v57 }
 0x3ef   : > { %v2252_v37 = vmul.f32 %v3261_v48, %v2251_v17  ;;  %v2126_v31 = vpop.xlane.xlu2 %2125  ;;  %2577 = vrot.lane.b32.xlu1 %v2392_v33, %s3456_s18  ;;  %2575 = vrot.lane.b32.xlu0 %v2391_v16, %s3456_s18  ;;  %v1211_v40 = vsel %vm5402_vm13, %v1210_v20, %v1206_v29  ;;  %v2302_v4 = vand.u32 2147483648, %v5376_v50  ;;  %v2300_v57 = vand.u32 2147483647, %v5376_v50  ;;  %v1895_v20 = vpop.f32.mrf.mxu2 }
 0x3f0   : > { %v2145_v63 = vadd.f32 %v2126_v31, %v5230_v0  ;;  %v2261_v0 = vor.u32 1.1754944e-38, %v2260_v12  ;;  %v1943_v16 = vadd.f32 %v5238_v61, %v5228_v54  ;;  %v1946_v41 = vadd.f32 %v5253_v55, %v5232_v60 }
 0x3f1   : > { %v2253_v23 = vadd.f32 %v3261_v48, %v2252_v37  ;;  %v2289_v13 = vor.u32 1.1754944e-38, %v2288_v15  ;;  %vm2296_vm7 = vweird.f32 %v5376_v50  ;;  %vm2287_vm8 = vcmp.eq.f32.partialorder %v2286_v3, 8.507059e+37 }
 0x3f2   : > { %v3265_v25 = vpop.eup %3264  ;;  %v5430_v1 = vadd.f32 1e-06, %v2145_v63  ;;  %vm2325_vm4 = vweird.f32 %v5379_v24  ;;  %v2303_v37 = vor.u32 1.1754944e-38, %v2302_v4  ;;  %vm2301_vm12 = vcmp.eq.f32.partialorder %v2300_v57, 8.507059e+37 }
 0x3f3   : > { %v2292_v34 = vmul.f32 %v3265_v25, %v5376_v50  ;;  %v2257_v43 = vsel %vm2256_vm1, %v3261_v48, %v2253_v23  ;;  %v5437_v59 = vpop.eup %3266  ;;  %v2322_v48 = vmul.f32 %v5379_v24, %v2321_v47  ;;  %vm2297_vm3 = vweird.f32 %v3265_v25 }
 0x3f4   : > { %3268 = vrcp.f32 %v5430_v1  ;;  %v2262_v38 = vsel %vm2259_vm5, %v2261_v0, %v2257_v43  ;;  %v2362_v51 = vmul.f32 %v5437_v59, %v5374_v9  ;;  %vm2298_vm10 = vmor %vm2296_vm7, %vm2297_vm3  ;;  %vm2324_vm13 = vweird.f32 %v5336_v52  ;;  %v1954_v43 = vpop.f32.mrf.mxu1 }
 0x3f5   : > { %v2293_v49 = vsub.f32 1.0, %v2292_v34  ;;  %v2395_v18 = vmul.f32 %v2262_v38, %v5114_v53  ;;  %v2285_v53 = vsel %vm5445_vm6, %v5343_v45, %v2281_v26  ;;  %v2323_v54 = vadd.f32 %v5379_v24, %v2322_v48  ;;  %vm5478_vm14 = vmor %vm2324_vm13, %vm2325_vm4 }
 0x3f6   : > { %v2290_v31 = vsel %vm2287_vm8, %v2289_v13, %v2285_v53  ;;  %v2363_v61 = vsub.f32 1.0, %v2362_v51  ;;  %v2330_v50 = vand.u32 2147483648, %v5336_v52  ;;  %v2328_v29 = vand.u32 2147483647, %v5336_v52 }
 0x3f7   : > { %v2294_v17 = vmul.f32 %v3265_v25, %v2293_v49  ;;  %v2132_v33 = vpop.xlane.xlu2 %2131  ;;  %2583 = vrot.lane.b32.xlu1 %v2395_v18, %s3456_s18  ;;  %2581 = vrot.lane.b32.xlu0 %v2394_v14, %s3456_s18  ;;  %v2397_v32 = vmul.f32 %v2290_v31, %v1943_v16  ;;  %v1409_v23 = vmul.f32 %v1211_v40, %v5295_v21  ;;  %v2344_v8 = vand.u32 2147483648, %v5430_v1  ;;  %v1960_v21 = vpop.f32.mrf.mxu3 }
 0x3f8   : > { %v2148_v45 = vadd.f32 %v2132_v33, %v5234_v22  ;;  %v2364_v47 = vmul.f32 %v5437_v59, %v2363_v61  ;;  %v2342_v52 = vand.u32 2147483647, %v5430_v1  ;;  %vm5898_vm11 = vcmask 523264  }
 0x3f9   : > { %v2295_v46 = vadd.f32 %v3265_v25, %v2294_v17  ;;  %v2331_v34 = vor.u32 1.1754944e-38, %v2330_v50  ;;  %vm2338_vm0 = vweird.f32 %v5430_v1  ;;  %vm2329_vm2 = vcmp.eq.f32.partialorder %v2328_v29, 8.507059e+37  ;;  %v2470_v29 = vpop.f32.mrf.mxu0 }
 0x3fa   : > { %v3269_v28 = vpop.eup %3268  ;;  %v5469_v12 = vadd.f32 1e-06, %v2148_v45  ;;  %v1955_v49 = vadd.f32 %v1954_v43, %v5266_v19  ;;  %v2345_v18 = vor.u32 1.1754944e-38, %v2344_v8  ;;  %vm2367_vm5 = vweird.f32 %v5437_v59 }
 0x3fb   : > { %v2334_v60 = vmul.f32 %v3269_v28, %v5430_v1  ;;  %v2299_v55 = vsel %vm2298_vm10, %v3265_v25, %v2295_v46  ;;  %v2327_v25 = vsel %vm5478_vm14, %v5379_v24, %v2323_v54  ;;  %vm2339_vm15 = vweird.f32 %v3269_v28 }
 0x3fc   : > { %3270 = vrcp.f32 %v5469_v12  ;;  %v2304_v22 = vsel %vm2301_vm12, %v2303_v37, %v2299_v55  ;;  %v1952_v24 = vadd.f32 %v1951_v2, %v5246_v6  ;;  %vm2340_vm1 = vmor %vm2338_vm0, %vm2339_vm15  ;;  %v2332_v14 = vsel %vm2329_vm2, %v2331_v34, %v2327_v25  ;;  %v5901_v25 = vld [vmem:[#allocation66_spill] sm:$0xff] }
 0x3fd   : > { %v2335_v35 = vsub.f32 1.0, %v2334_v60  ;;  %v2398_v5 = vmul.f32 %v2304_v22, %v1946_v41  ;;  %3272 = vrcp.f32 %v5315_v27  ;;  %vm2343_vm9 = vcmp.eq.f32.partialorder %v2342_v52, 8.507059e+37 }
 0x3fe   : > { %v2365_v48 = vadd.f32 %v5437_v59, %v2364_v47  ;;  %vm2366_vm6 = vweird.f32 %v5374_v9  ;;  %v2372_v1 = vand.u32 2147483648, %v5374_v9  ;;  %v2400_v53 = vmul.f32 %v2332_v14, %v1952_v24  ;;  %v5902_v47 = vld [vmem:[#allocation63_spill] sm:$0xff] }
 0x3ff   : > { %v2336_v0 = vmul.f32 %v3269_v28, %v2335_v35  ;;  %v2574_v26 = vpop.permute.xlu2 %2573  ;;  %2589 = vrot.lane.b32.xlu1 %v2398_v5, %s3456_s18  ;;  %2587 = vrot.lane.b32.xlu0 %v2397_v32, %s3456_s18  ;;  %v2370_v19 = vand.u32 2147483647, %v5374_v9  ;;  %v2386_v51 = vand.u32 2147483648, %v5469_v12  ;;  %vm5505_vm3 = vmor %vm2366_vm6, %vm2367_vm5  ;;  %v2384_v57 = vand.u32 2147483647, %v5469_v12  ;;  %v1898_v9 = vpop.f32.mrf.mxu2  ;;  %v5909_v14 = vld [vmem:[#allocation67_spill] sm:$0xff] }
 0x400   : > { %v2620_v58 = vsel %vm5898_vm11, %v1409_v23, %v2574_v26  ;;  %v2369_v16 = vsel %vm5505_vm3, %v5437_v59, %v2365_v48  ;;  %v2373_v41 = vor.u32 1.1754944e-38, %v2372_v1  ;;  %vm2380_vm8 = vweird.f32 %v5469_v12  ;;  %v1963_v46 = vpop.f32.mrf.mxu3  ;;  %v5911_v1 = vld [vmem:[#allocation37_spill] sm:$0xff] }
 0x401   : > { %2636 = vst [vmem:[%s3625_s25 + $0x8] sm:$0xff] %v2620_v58  ;;  %v2337_v38 = vadd.f32 %v3269_v28, %v2336_v0  ;;  %vm2371_vm4 = vcmp.eq.f32.partialorder %v2370_v19, 8.507059e+37  ;;  %v1961_v31 = vadd.f32 %v1960_v21, %v1895_v20  ;;  %v1964_v54 = vadd.f32 %v1963_v46, %v1898_v9  ;;  %v3280_v20 = vld [vmem:[#allocation2 + $0x40] sm:$0xff]  ;;  %v3281_v58 = vld [vmem:[#allocation2 + $0x48] sm:$0xff] }
 0x402   : > { %v3271_v15 = vpop.eup %3270  ;;  %v2374_v37 = vsel %vm2371_vm4, %v2373_v41, %v2369_v16  ;;  %vm2385_vm12 = vcmp.eq.f32.partialorder %v2384_v57, 8.507059e+37  ;;  %v1251_v35 = vand.u32 2147483648, %v5315_v27  ;;  %vm1245_vm14 = vweird.f32 %v5315_v27  ;;  %v3283_v57 = vld [vmem:[#allocation2 + $0x58] sm:$0xff] }
 0x403   : > { %v2376_v36 = vmul.f32 %v3271_v15, %v5469_v12  ;;  %v2341_v3 = vsel %vm2340_vm1, %v3269_v28, %v2337_v38  ;;  %v3273_v2 = vpop.eup %3272  ;;  %vm2381_vm7 = vweird.f32 %v3271_v15  ;;  %v2387_v28 = vor.u32 1.1754944e-38, %v2386_v51 }
 0x404   : > { %v2346_v6 = vsel %vm2343_vm9, %v2345_v18, %v2341_v3  ;;  %v1241_v13 = vmul.f32 %v3273_v2, %v5315_v27  ;;  %vm2382_vm10 = vmor %vm2380_vm8, %vm2381_vm7  ;;  %v2403_v22 = vmul.f32 %v2374_v37, %v1961_v31  ;;  %vm1246_vm13 = vweird.f32 %v3273_v2  ;;  %v5908_v18 = vld [vmem:[#allocation36_spill] sm:$0xff] }
 0x405   : > { %v2377_v40 = vsub.f32 1.0, %v2376_v36  ;;  %v2401_v4 = vmul.f32 %v2346_v6, %v1955_v49  ;;  %v1249_v5 = vand.u32 2147483647, %v5315_v27  ;;  %vm1247_vm15 = vmor %vm1245_vm14, %vm1246_vm13  ;;  %v1252_v63 = vor.u32 1.1754944e-38, %v1251_v35  ;;  %v2473_v27 = vpop.f32.mrf.mxu0 }
 0x406   : > { %v1242_v59 = vsub.f32 1.0, %v1241_v13  ;;  %v2494_v23 = vadd.f32 %v3280_v20, %v2470_v29  ;;  %v1017_v0 = vadd.f32 %v5902_v47, %v5901_v25  ;;  %vm5903_vm0 = vcmask 523264   ;;  %v3284_v13 = vld [vmem:[#allocation2 + $0x60] sm:$0xff]  ;;  %v3286_v25 = vld [vmem:[#allocation2 + $0x70] sm:$0xff] }
 0x407   : > { %v2378_v33 = vmul.f32 %v3271_v15, %v2377_v40  ;;  %2595 = vrot.lane.b32.xlu1 %v2401_v4, %s3456_s18  ;;  %2593 = vrot.lane.b32.xlu0 %v2400_v53, %s3456_s18  ;;  %vm1250_vm11 = vcmp.eq.f32.partialorder %v1249_v5, 8.507059e+37  ;;  %vm5904_vm2 = vmmov %vm5903_vm0  ;;  %v2495_v34 = vadd.f32 %v3281_v58, %v2473_v27  ;;  %v1152_v36 = vadd.f32 %v5909_v14, %v5908_v18  ;;  %v5912_v40 = vld [vmem:[#allocation69_spill] sm:$0xff]  ;;  %v5914_v53 = vld [vmem:[#allocation72_spill] sm:$0xff] }
 0x408   : > { %v1243_v12 = vmul.f32 %v3273_v2, %v1242_v59  ;;  %2502 = vst.msk [vmem:[#allocation2 + $0x40] sm:$0xff] %vm5903_vm0, %v2494_v23  ;;  %vm5905_vm1 = vmmov %vm5903_vm0  ;;  %v1154_v4 = vadd.f32 %v5912_v40, %v5911_v1  ;;  %v3287_v40 = vld [vmem:[#allocation2 + $0x78] sm:$0xff] }
 0x409   : > { %v2379_v45 = vadd.f32 %v3271_v15, %v2378_v33  ;;  %2503 = vst.msk [vmem:[#allocation2 + $0x48] sm:$0xff] %vm5905_vm1, %v2495_v34  ;;  %vm5906_vm5 = vmmov %vm5903_vm0  ;;  %v1168_v6 = vadd.f32 1e-06, %v1152_v36 }
 0x40a   : > { %v1244_v50 = vadd.f32 %v3273_v2, %v1243_v12  ;;  %vm5907_vm9 = vmmov %vm5903_vm0  ;;  %v5544_v33 = vadd.f32 1e-06, %v1154_v4 }
 0x40b   : > { %v2383_v61 = vsel %vm2382_vm10, %v3271_v15, %v2379_v45  ;;  %v3282_v15 = vld [vmem:[#allocation2 + $0x50] sm:$0xff]  ;;  %vm5910_vm6 = vmmov %vm5903_vm0  ;;  %3274 = vrcp.f32 %v1168_v6  ;;  %v1195_v35 = vand.u32 2147483648, %v1168_v6  ;;  %v1193_v5 = vand.u32 2147483647, %v1168_v6 }
 0x40c   : > { %v2388_v60 = vsel %vm2385_vm12, %v2387_v28, %v2383_v61  ;;  %v1248_v32 = vsel %vm1247_vm15, %v3273_v2, %v1244_v50  ;;  %vm5915_vm3 = vmmov %vm5903_vm0  ;;  %3276 = vrcp.f32 %v5544_v33  ;;  %vm1189_vm12 = vweird.f32 %v1168_v6 }
 0x40d   : > { %v2404_v55 = vmul.f32 %v2388_v60, %v1964_v54  ;;  %v1253_v8 = vsel %vm1250_vm11, %v1252_v63, %v1248_v32  ;;  %v2476_v38 = vpop.f32.mrf.mxu0  ;;  %vm5916_vm7 = vmmov %vm5903_vm0  ;;  %v1196_v20 = vor.u32 1.1754944e-38, %v1195_v35  ;;  %vm1194_vm14 = vcmp.eq.f32.partialorder %v1193_v5, 8.507059e+37 }
 0x40e   : > { %v1412_v26 = vmul.f32 %v1253_v8, %v1017_v0  ;;  %v2496_v49 = vadd.f32 %v3282_v15, %v2476_v38  ;;  %vm5917_vm8 = vmmov %vm5903_vm0  ;;  %v5919_v0 = vld [vmem:[#allocation60_spill] sm:$0xff]  ;;  %v1223_v34 = vand.u32 2147483648, %v5544_v33  ;;  %v1221_v38 = vand.u32 2147483647, %v5544_v33 }
 0x40f   : > { %2601 = vrot.lane.b32.xlu1 %v2404_v55, %s3456_s18  ;;  %2599 = vrot.lane.b32.xlu0 %v2403_v22, %s3456_s18  ;;  %v3285_v55 = vld [vmem:[#allocation2 + $0x68] sm:$0xff]  ;;  %vm5918_vm10 = vmmov %vm5903_vm0  ;;  %vm1217_vm0 = vweird.f32 %v5544_v33 }
 0x410   : > { %2504 = vst.msk [vmem:[#allocation2 + $0x50] sm:$0xff] %vm5907_vm9, %v2496_v49 }
 0x411   : > { %v3275_v9 = vpop.eup %3274 }
 0x412   : > { %v1185_v41 = vmul.f32 %v3275_v9, %v1168_v6  ;;  %v3277_v28 = vpop.eup %3276  ;;  %vm1190_vm4 = vweird.f32 %v3275_v9 }
 0x413   : > { %v1213_v31 = vmul.f32 %v3277_v28, %v5544_v33  ;;  %vm1191_vm13 = vmor %vm1189_vm12, %vm1190_vm4  ;;  %vm1218_vm15 = vweird.f32 %v3277_v28 }
 0x414   : > { %v1186_v37 = vsub.f32 1.0, %v1185_v41 }
 0x415   : > { %v2479_v17 = vpop.f32.mrf.mxu0  ;;  %v1214_v59 = vsub.f32 1.0, %v1213_v31 }
 0x416   : > { %v2497_v16 = vadd.f32 %v3283_v57, %v2479_v17  ;;  %v1187_v61 = vmul.f32 %v3275_v9, %v1186_v37 }
 0x417   : > { %v1215_v29 = vmul.f32 %v3277_v28, %v1214_v59  ;;  %v5938_v59 = vld [vmem:[#allocation76_spill] sm:$0xff] }
 0x418   : > { %2505 = vst.msk [vmem:[#allocation2 + $0x58] sm:$0xff] %vm5916_vm7, %v2497_v16  ;;  %v1188_v50 = vadd.f32 %v3275_v9, %v1187_v61  ;;  %vm1222_vm7 = vcmp.eq.f32.partialorder %v1221_v38, 8.507059e+37 }
 0x419   : > { %v1216_v27 = vadd.f32 %v3277_v28, %v1215_v29 }
 0x41a   : > { %v1192_v32 = vsel %vm1191_vm13, %v3275_v9, %v1188_v50 }
 0x41b   : > { %v1197_v8 = vsel %vm1194_vm14, %v1196_v20, %v1192_v32 }
 0x41d   : > { %v2482_v45 = vpop.f32.mrf.mxu0 }
 0x41e   : > { %v2498_v46 = vadd.f32 %v3284_v13, %v2482_v45 }
 0x420   : > { %2506 = vst.msk [vmem:[#allocation2 + $0x60] sm:$0xff] %vm5917_vm8, %v2498_v46 }
 0x421   : > { %v2580_v52 = vpop.permute.xlu2 %2579 }
 0x422   : > { %v2623_v21 = vsel %vm5904_vm2, %v1412_v26, %v2580_v52  ;;  %v5920_v26 = vld [vmem:[#allocation54_spill] sm:$0xff]  ;;  %vm5921_vm2 = vmmov %vm5905_vm1 }
 0x423   : > { %2639 = vst [vmem:[%s3625_s25 + $0x20] sm:$0xff] %v2623_v21  ;;  %v1005_v52 = vadd.f32 %v5920_v26, %v5919_v0  ;;  %vm5927_vm8 = vmmov %vm5921_vm2 }
 0x424   : > { %vm5928_vm4 = vmmov %vm5921_vm2 }
 0x425   : > { %v2485_v60 = vpop.f32.mrf.mxu0  ;;  %vm5930_vm12 = vmmov %vm5921_vm2 }
 0x426   : > { %v2499_v22 = vadd.f32 %v3285_v55, %v2485_v60  ;;  %vm5931_vm13 = vmmov %vm5921_vm2  ;;  %v5935_v60 = vld [vmem:[#allocation77_spill] sm:$0xff] }
 0x427   : > { %vm5932_vm14 = vmmov %vm5921_vm2 }
 0x428   : > { %2507 = vst.msk [vmem:[#allocation2 + $0x68] sm:$0xff] %vm5918_vm10, %v2499_v22  ;;  %vm5929_vm10 = vmmov %vm5921_vm2 }
 0x429   : > { %v2586_v43 = vpop.permute.xlu2 %2585 }
 0x42a   : > { %v2626_v24 = vsel %vm5906_vm5, %v4842_v11, %v2586_v43  ;;  %v5913_v11 = vld [vmem:[#allocation35_spill] sm:$0xff]  ;;  %v1408_v43 = vmul.f32 %v1197_v8, %v1005_v52  ;;  %vm1219_vm5 = vmor %vm1217_vm0, %vm1218_vm15 }
 0x42b   : > { %2642 = vst [vmem:[%s3625_s25 + $0x38] sm:$0xff] %v2626_v24  ;;  %v1155_v19 = vadd.f32 %v5914_v53, %v5913_v11  ;;  %v1220_v14 = vsel %vm1219_vm5, %v3277_v28, %v1216_v27  ;;  %v5923_v11 = vld [vmem:[#allocation64_spill] sm:$0xff]  ;;  %v5924_v53 = vld [vmem:[#allocation58_spill] sm:$0xff]  ;;  %vm5933_vm15 = vmmov %vm5921_vm2 }
 0x42c   : > { %vm5936_vm0 = vmmov %vm5921_vm2 }
 0x42d   : > { %v2488_v23 = vpop.f32.mrf.mxu0 }
 0x42e   : > { %v2500_v47 = vadd.f32 %v3286_v25, %v2488_v23 }
 0x430   : > { %2508 = vst.msk [vmem:[#allocation2 + $0x70] sm:$0xff] %vm5921_vm2, %v2500_v47 }
 0x431   : > { %v2592_v3 = vpop.permute.xlu2 %2591 }
 0x432   : > { %v2629_v48 = vsel %vm5910_vm6, %v4852_v56, %v2592_v3  ;;  %v1171_v56 = vadd.f32 1e-06, %v1155_v19  ;;  %vm5922_vm6 = vmmov %vm5921_vm2  ;;  %v1224_v3 = vor.u32 1.1754944e-38, %v1223_v34  ;;  %v1011_v19 = vadd.f32 %v5924_v53, %v5923_v11 }
 0x433   : > { %2645 = vst [vmem:[%s3625_s25 + $0x50] sm:$0xff] %v2629_v48 }
 0x434   : > { %3278 = vrcp.f32 %v1171_v56  ;;  %v1237_v58 = vand.u32 2147483648, %v1171_v56  ;;  %vm1231_vm1 = vweird.f32 %v1171_v56  ;;  %v1235_v24 = vand.u32 2147483647, %v1171_v56 }
 0x435   : > { %v2491_v48 = vpop.f32.mrf.mxu0  ;;  %v1225_v1 = vsel %vm1222_vm7, %v1224_v3, %v1220_v14 }
 0x436   : > { %v1238_v36 = vor.u32 1.1754944e-38, %v1237_v58  ;;  %v2501_v4 = vadd.f32 %v3287_v40, %v2491_v48  ;;  %v1410_v57 = vmul.f32 %v1225_v1, %v1011_v19 }
 0x438   : > { %2509 = vst.msk [vmem:[#allocation2 + $0x78] sm:$0xff] %vm5927_vm8, %v2501_v4 }
 0x439   : > { %v2598_v2 = vpop.permute.xlu2 %2597 }
 0x43a   : > { %v2632_v51 = vsel %vm5915_vm3, %v4891_v30, %v2598_v2  ;;  %v3279_v30 = vpop.eup %3278  ;;  %vm1236_vm3 = vcmp.eq.f32.partialorder %v1235_v24, 8.507059e+37  ;;  %v5925_v2 = vld [vmem:[#allocation65_spill] sm:$0xff] }
 0x43b   : > { %2648 = vst [vmem:[%s3625_s25 + $0x68] sm:$0xff] %v2632_v51  ;;  %v1227_v54 = vmul.f32 %v3279_v30, %v1171_v56  ;;  %vm1232_vm11 = vweird.f32 %v3279_v30  ;;  %v5926_v51 = vld [vmem:[#allocation61_spill] sm:$0xff] }
 0x43c   : > { %vm1233_vm9 = vmor %vm1231_vm1, %vm1232_vm11  ;;  %v1014_v17 = vadd.f32 %v5926_v51, %v5925_v2 }
 0x43d   : > { %v1228_v12 = vsub.f32 1.0, %v1227_v54  ;;  %vm5934_vm11 = vmmov %vm5921_vm2 }
 0x43e   : > { %vm5937_vm2 = vmmov %vm5936_vm0 }
 0x43f   : > { %v1229_v63 = vmul.f32 %v3279_v30, %v1228_v12  ;;  %vm5939_vm1 = vmmov %vm5936_vm0 }
 0x441   : > { %v1230_v21 = vadd.f32 %v3279_v30, %v1229_v63 }
 0x443   : > { %v1234_v18 = vsel %vm1233_vm9, %v3279_v30, %v1230_v21 }
 0x444   : > { %v1239_v6 = vsel %vm1236_vm3, %v1238_v36, %v1234_v18 }
 0x445   : > { %v1411_v33 = vmul.f32 %v1239_v6, %v1014_v17 }
 0x459   : > { %v2572_v15 = vpop.permute.xlu0 %2571 }
 0x45a   : > { %v2619_v49 = vsel %vm5922_vm6, %v1408_v43, %v2572_v15 }
 0x45b   : > { %2635 = vst [vmem:[%s3625_s25] sm:$0xff] %v2619_v49 }
 0x461   : > { %v2578_v16 = vpop.permute.xlu1 %2577  ;;  %v2576_v56 = vpop.permute.xlu0 %2575 }
 0x462   : > { %v2622_v9 = vsel %vm5928_vm4, %v1411_v33, %v2578_v16  ;;  %v2621_v41 = vsel %vm5929_vm10, %v1410_v57, %v2576_v56 }
 0x463   : > { %2638 = vst [vmem:[%s3625_s25 + $0x18] sm:$0xff] %v2622_v9 }
 0x464   : > { %2637 = vst [vmem:[%s3625_s25 + $0x10] sm:$0xff] %v2621_v41 }
 0x469   : > { %v2584_v45 = vpop.permute.xlu1 %2583  ;;  %v2582_v13 = vpop.permute.xlu0 %2581 }
 0x46a   : > { %v2625_v46 = vsel %vm5930_vm12, %v4847_v62, %v2584_v45  ;;  %v2624_v28 = vsel %vm5931_vm13, %v4861_v39, %v2582_v13 }
 0x46b   : > { %2641 = vst [vmem:[%s3625_s25 + $0x30] sm:$0xff] %v2625_v46 }
 0x46c   : > { %2640 = vst [vmem:[%s3625_s25 + $0x28] sm:$0xff] %v2624_v28 }
 0x471   : > { %v2590_v37 = vpop.permute.xlu1 %2589  ;;  %v2588_v30 = vpop.permute.xlu0 %2587 }
 0x472   : > { %v2628_v31 = vsel %vm5932_vm14, %v4894_v42, %v2590_v37  ;;  %v2627_v54 = vsel %vm5933_vm15, %v4942_v10, %v2588_v30 }
 0x473   : > { %2644 = vst [vmem:[%s3625_s25 + $0x48] sm:$0xff] %v2628_v31 }
 0x474   : > { %2643 = vst [vmem:[%s3625_s25 + $0x40] sm:$0xff] %v2627_v54 }
 0x479   : > { %v2596_v62 = vpop.permute.xlu1 %2595  ;;  %v2594_v39 = vpop.permute.xlu0 %2593 }
 0x47a   : > { %v2631_v61 = vsel %vm5934_vm11, %v4955_v7, %v2596_v62  ;;  %v2630_v55 = vsel %vm5936_vm0, %v5935_v60, %v2594_v39 }
 0x47b   : > { %2647 = vst [vmem:[%s3625_s25 + $0x60] sm:$0xff] %v2631_v61 }
 0x47c   : > { %2646 = vst [vmem:[%s3625_s25 + $0x58] sm:$0xff] %v2630_v55 }
 0x481   : > { %v2602_v42 = vpop.permute.xlu1 %2601  ;;  %v2600_v10 = vpop.permute.xlu0 %2599 }
 0x482   : > { %v2634_v22 = vsel %vm5937_vm2, %v5159_v44, %v2602_v42  ;;  %v2633_v7 = vsel %vm5939_vm1, %v5938_v59, %v2600_v10 }
 0x483   : > { %2650 = vst [vmem:[%s3625_s25 + $0x78] sm:$0xff] %v2634_v22 }
 0x484   : > { %2649 = vst [vmem:[%s3625_s25 + $0x70] sm:$0xff] %v2633_v7 }
 0x485   : > { %3375 = shalt.err (!%p3372_p1)
}
 0x486   : > { %s3457_s1 = smov 128   ;;  %s3458_s27 = smov 8  }
 0x487   : > { %3021 = dma.vmem_to_hbm [thread:$0]  (%p3550_p9), %s2667_s11, 2048, %s2669_s6, %s2652_s14, %s3457_s1, %s3457_s1, %s3458_s27  }
 0x488 PF: > { %p3035_p2 = scmp.ge.s32.totalorder %s3450_s22, 2  ;;  %s2683_s25 = sand.u32 1, %s3422_s15  }
 0x489   : > { %s2684_s18 = scalar_lea.sflag [#allocation6], %s2683_s25 }
 0x48a   : > { %p3031_p3 = pnand %p3035_p2, %p3556_p12 }
 0x48c   : > { %p3032_p4 = pneg %p3031_p3 }
 0x48e   : > { %3417 = dma.done.wait (%p3032_p4), %s2684_s18, 2048  }
 0x48f   : > { %3419 = vsyncadd (%p3032_p4), %s2684_s18, 4294965248  ;;  %s23_s22 = sadd.s32 1, %s3450_s22   ;;  %s5940_s18 = sld [smem:[#allocation13_spill]] }
 0x490   : > { %p20_p5 = scmp.ge.s32.totalorder %s23_s22, 10   ;;  %s5941_s19 = sld [smem:[#allocation14_spill]] }
 0x491   : > { %s5942_s20 = sld [smem:[#allocation15_spill]]  ;;  %s5944_s15 = smov %s3426_s16 }
 0x492   : > { %s5943_s21 = sld [smem:[#allocation16_spill]]  ;;  %s5945_s16 = smov %s3430_s17 }
 0x493   : > { %s5946_s17 = smov %s3565_s10  ;;  %22 = sbr.rel (!%p20_p5) target bundleno = 11 (0xb), region = 106 }
 0x498   :  { %2690 = vsyncpa [#allocation5], 1 }
 0x499   :  { %2692 = vsyncpa [#allocation5 + $0x1], 1 }
 0x49a   :  { %2693 = vsyncpa [#allocation8], 1 }
 0x49b   :  { %2695 = vsyncpa [#allocation8 + $0x1], 1 }
 0x49c   :  { %2696 = vsyncpa [#allocation6], 1 }
 0x49d   :  { %2698 = vsyncpa [#allocation6 + $0x1], 1 }

</bundles_post_ra>
